<compile_context>
chip_gen: v5e
topology: v5e:2x2
jax: 0.10.0
libtpu: 0.0.40
codegen_flags: <defaults>
</compile_context>

<pallas_src>
import math

import jax
import jax.numpy as jnp
from jax import lax
from jax.experimental import pallas as pl
from jax.experimental.pallas import tpu as pltpu

d_model = 768
d_ff = 3072


def ffn_kernel(x_ref, w1_ref, b1_ref, w2_ref, b2_ref, o_ref):
    # grid = (m: rows of x/out [parallel], k: d_ff reduction [arbitrary])
    k = pl.program_id(1)

    @pl.when(k == 0)
    def _():
        o_ref[...] = jnp.zeros_like(o_ref)

    # fc1 tile: bf16 MXU matmul with f32 accumulation; bias + GELU in f32.
    x_bf16 = x_ref[...].astype(jnp.bfloat16)
    h = jnp.dot(x_bf16, w1_ref[...], preferred_element_type=jnp.float32)
    h = h + b1_ref[...]
    # tanh-form GELU -> EUP slot (erf form is VALU-heavy); within bf16 tolerance.
    h = jax.nn.gelu(h, approximate=True)

    # fc2 partial contribution, accumulated directly into the resident f32
    # output block (no separate VMEM scratch needed).
    o_ref[...] += jnp.dot(h.astype(jnp.bfloat16), w2_ref[...],
                          preferred_element_type=jnp.float32)

    @pl.when(k == pl.num_programs(1) - 1)
    def _():
        o_ref[...] = o_ref[...] + b2_ref[...]


def poswise_ffn(x, w1, b1, w2, b2, *, tm=256, tk=1024):
    """x: [B, S, d_model]; w1: [d_model, d_ff]; b1: [d_ff]; w2: [d_ff, d_model]; b2: [d_model]."""
    B, S, Dm = x.shape
    Dff = w1.shape[1]
    assert Dm == d_model and Dff == d_ff
    assert Dff % tk == 0
    assert x.dtype == jnp.float32

    M = B * S
    tm = min(tm, M)  # small test shapes: single full-height block

    x2d = x.reshape(M, Dm)
    # bf16 weights: half the HBM streaming traffic, native MXU input dtype.
    w1_bf = w1.astype(jnp.bfloat16)
    w2_bf = w2.astype(jnp.bfloat16)
    # biases stay f32 and are added after the f32-accumulated matmuls.
    b1_2d = b1.reshape(1, Dff).astype(jnp.float32)
    b2_2d = b2.reshape(1, Dm).astype(jnp.float32)

    grid = (pl.cdiv(M, tm), Dff // tk)

    out2d = pl.pallas_call(
        ffn_kernel,
        out_shape=jax.ShapeDtypeStruct((M, Dm), jnp.float32),
        grid_spec=pltpu.PrefetchScalarGridSpec(
            num_scalar_prefetch=0,
            grid=grid,
            in_specs=[
                pl.BlockSpec((tm, Dm), lambda m, k: (m, 0)),   # x tile (resident over k)
                pl.BlockSpec((Dm, tk), lambda m, k: (0, k)),   # W1 tile (bf16)
                pl.BlockSpec((1, tk), lambda m, k: (0, k)),    # b1 tile (f32)
                pl.BlockSpec((tk, Dm), lambda m, k: (k, 0)),   # W2 tile (bf16)
                pl.BlockSpec((1, Dm), lambda m, k: (0, 0)),    # b2 (resident, f32)
            ],
            out_specs=pl.BlockSpec((tm, Dm), lambda m, k: (m, 0)),  # f32 out = accumulator
        ),
        compiler_params=pltpu.CompilerParams(
            dimension_semantics=("parallel", "arbitrary"),
            vmem_limit_bytes=48 * 1024 * 1024,
        ),
    )(x2d, w1_bf, b1_2d, w2_bf, b2_2d)

    return out2d.reshape(B, S, Dm)


def init_params(key):
    """Deterministic init mirroring nn.Linear's U(-1/sqrt(fan_in), 1/sqrt(fan_in))."""
    k1, k2, k3, k4 = jax.random.split(key, 4)
    bound1 = 1.0 / math.sqrt(d_model)
    bound2 = 1.0 / math.sqrt(d_ff)
    # stored directly in (in, out) layout used by the kernel (x @ W)
    w1 = jax.random.uniform(k1, (d_model, d_ff), jnp.float32, -bound1, bound1)
    b1 = jax.random.uniform(k2, (d_ff,), jnp.float32, -bound1, bound1)
    w2 = jax.random.uniform(k3, (d_ff, d_model), jnp.float32, -bound2, bound2)
    b2 = jax.random.uniform(k4, (d_model,), jnp.float32, -bound2, bound2)
    return w1, b1, w2, b2


def _gelu_erf(x):
    return x * 0.5 * (1.0 + lax.erf(x / math.sqrt(2.0)))


def reference_ffn(x, w1, b1, w2, b2):
    h = _gelu_erf(jnp.dot(x, w1) + b1)
    return jnp.dot(h, w2) + b2


if __name__ == "__main__":
    key = jax.random.PRNGKey(0)
    kx, kp = jax.random.split(key)

    B, S = 2, 8  # small batch/seq; feature dims fixed by the module (768 -> 3072 -> 768)
    x = jax.random.normal(kx, (B, S, d_model), jnp.float32)
    w1, b1, w2, b2 = init_params(kp)

    out = poswise_ffn(x, w1, b1, w2, b2)
    out = jax.block_until_ready(out)

    ref = reference_ffn(x, w1, b1, w2, b2)
    assert out.shape == (B, S, d_model)
    # bf16 MXU matmuls + tanh-form GELU vs f32 erf reference -> looser tolerance
    max_err = float(jnp.max(jnp.abs(out - ref)))
    assert jnp.allclose(out, ref, atol=2e-2, rtol=2e-2), (
        f"Pallas FFN mismatch vs reference (max abs err {max_err})")

    print("KERNEL_OK")
</pallas_src>

<mosaic_0001>
module attributes {stable_mosaic.version = 11 : i64} {
  func.func @ffn_kernel(%arg0: i32, %arg1: i32, %arg2: memref<16x768xf32, #tpu.memory_space<vmem>>, %arg3: memref<768x1024xbf16, #tpu.memory_space<vmem>>, %arg4: memref<1x1024xf32, #tpu.memory_space<vmem>>, %arg5: memref<1024x768xbf16, #tpu.memory_space<vmem>>, %arg6: memref<1x768xf32, #tpu.memory_space<vmem>>, %arg7: memref<16x768xf32, #tpu.memory_space<vmem>>) attributes {dimension_semantics = [#tpu.dimension_semantics<parallel>, #tpu.dimension_semantics<arbitrary>], iteration_bounds = array<i64: 1, 3>, scalar_prefetch = 0 : i64, scratch_operands = 0 : i64, tpu.core_type = #tpu.core_type<tc>, window_params = [{transform_indices = @transform_0, window_bounds = array<i64: 16, 768>}, {transform_indices = @transform_1, window_bounds = array<i64: 768, 1024>}, {transform_indices = @transform_2, window_bounds = array<i64: 1, 1024>}, {transform_indices = @transform_3, window_bounds = array<i64: 1024, 768>}, {pipeline_mode = #tpu.pipeline_mode<synchronous>, transform_indices = @transform_4, window_bounds = array<i64: 1, 768>}, {transform_indices = @transform_5, window_bounds = array<i64: 16, 768>}]} {
    %c0_i32 = arith.constant 0 : i32
    %0 = arith.cmpi eq, %arg1, %c0_i32 : i32
    %1 = arith.extui %0 : i1 to i32
    %c0_i32_0 = arith.constant 0 : i32
    %2 = arith.cmpi ne, %1, %c0_i32_0 : i32
    scf.if %2 {
      %cst_18 = arith.constant 0.000000e+00 : f32
      %32 = vector.broadcast %cst_18 : f32 to vector<16x768xf32>
      %c0_19 = arith.constant 0 : index
      %c0_20 = arith.constant 0 : index
      %33 = vector.load %arg7[%c0_19, %c0_20] : memref<16x768xf32, #tpu.memory_space<vmem>>, vector<16x768xf32>
      tpu.vector_store %arg7[%c0_19, %c0_20], %32 {strides = array<i32>} : memref<16x768xf32, #tpu.memory_space<vmem>>, vector<16x768xf32>,
    } else {
    }
    %c0 = arith.constant 0 : index
    %c0_1 = arith.constant 0 : index
    %3 = vector.load %arg2[%c0, %c0_1] : memref<16x768xf32, #tpu.memory_space<vmem>>, vector<16x768xf32>
    %4 = arith.truncf %3 : vector<16x768xf32> to vector<16x768xbf16>
    %c0_2 = arith.constant 0 : index
    %c0_3 = arith.constant 0 : index
    %5 = vector.load %arg3[%c0_2, %c0_3] : memref<768x1024xbf16, #tpu.memory_space<vmem>>, vector<768x1024xbf16>
    %cst = arith.constant dense<0.000000e+00> : vector<16x1024xf32>
    %6 = tpu.matmul %4, %5, %cst {dimension_numbers = #tpu.dot_dimension_numbers<[1], [0], [0], [1], [0, 0, 1, 1], [], []>} : vector<16x768xbf16>, vector<768x1024xbf16>, vector<16x1024xf32> -> vector<16x1024xf32>
    %c0_4 = arith.constant 0 : index
    %c0_5 = arith.constant 0 : index
    %7 = vector.load %arg4[%c0_4, %c0_5] : memref<1x1024xf32, #tpu.memory_space<vmem>>, vector<1x1024xf32>
    %8 = vector.broadcast %7 : vector<1x1024xf32> to vector<16x1024xf32>
    %9 = arith.addf %6, %8 : vector<16x1024xf32>
    %10 = arith.mulf %9, %9 : vector<16x1024xf32>
    %11 = arith.mulf %9, %10 : vector<16x1024xf32>
    %cst_6 = arith.constant 4.471500e-02 : f32
    %12 = vector.broadcast %cst_6 : f32 to vector<16x1024xf32>
    %13 = arith.mulf %12, %11 : vector<16x1024xf32>
    %14 = arith.addf %9, %13 : vector<16x1024xf32>
    %cst_7 = arith.constant 0.797884583 : f32
    %15 = vector.broadcast %cst_7 : f32 to vector<16x1024xf32>
    %16 = arith.mulf %15, %14 : vector<16x1024xf32>
    %17 = math.tanh %16 : vector<16x1024xf32>
    %cst_8 = arith.constant 1.000000e+00 : f32
    %18 = vector.broadcast %cst_8 : f32 to vector<16x1024xf32>
    %19 = arith.addf %18, %17 : vector<16x1024xf32>
    %cst_9 = arith.constant 5.000000e-01 : f32
    %20 = vector.broadcast %cst_9 : f32 to vector<16x1024xf32>
    %21 = arith.mulf %20, %19 : vector<16x1024xf32>
    %22 = arith.mulf %9, %21 : vector<16x1024xf32>
    %c0_10 = arith.constant 0 : index
    %c0_11 = arith.constant 0 : index
    %23 = vector.load %arg7[%c0_10, %c0_11] : memref<16x768xf32, #tpu.memory_space<vmem>>, vector<16x768xf32>
    %24 = arith.truncf %22 : vector<16x1024xf32> to vector<16x1024xbf16>
    %c0_12 = arith.constant 0 : index
    %c0_13 = arith.constant 0 : index
    %25 = vector.load %arg5[%c0_12, %c0_13] : memref<1024x768xbf16, #tpu.memory_space<vmem>>, vector<1024x768xbf16>
    %cst_14 = arith.constant dense<0.000000e+00> : vector<16x768xf32>
    %26 = tpu.matmul %24, %25, %cst_14 {dimension_numbers = #tpu.dot_dimension_numbers<[1], [0], [0], [1], [0, 0, 1, 1], [], []>} : vector<16x1024xbf16>, vector<1024x768xbf16>, vector<16x768xf32> -> vector<16x768xf32>
    %27 = arith.addf %23, %26 : vector<16x768xf32>
    %c0_15 = arith.constant 0 : index
    %c0_16 = arith.constant 0 : index
    %28 = vector.load %arg7[%c0_15, %c0_16] : memref<16x768xf32, #tpu.memory_space<vmem>>, vector<16x768xf32>
    tpu.vector_store %arg7[%c0_15, %c0_16], %27 {strides = array<i32>} : memref<16x768xf32, #tpu.memory_space<vmem>>, vector<16x768xf32>,
    %c2_i32 = arith.constant 2 : i32
    %29 = arith.cmpi eq, %arg1, %c2_i32 : i32
    %30 = arith.extui %29 : i1 to i32
    %c0_i32_17 = arith.constant 0 : i32
    %31 = arith.cmpi ne, %30, %c0_i32_17 : i32
    scf.if %31 {
      %c0_18 = arith.constant 0 : index
      %c0_19 = arith.constant 0 : index
      %32 = vector.load %arg7[%c0_18, %c0_19] : memref<16x768xf32, #tpu.memory_space<vmem>>, vector<16x768xf32>
      %c0_20 = arith.constant 0 : index
      %c0_21 = arith.constant 0 : index
      %33 = vector.load %arg6[%c0_20, %c0_21] : memref<1x768xf32, #tpu.memory_space<vmem>>, vector<1x768xf32>
      %34 = vector.broadcast %33 : vector<1x768xf32> to vector<16x768xf32>
      %35 = arith.addf %32, %34 : vector<16x768xf32>
      %c0_22 = arith.constant 0 : index
      %c0_23 = arith.constant 0 : index
      %36 = vector.load %arg7[%c0_22, %c0_23] : memref<16x768xf32, #tpu.memory_space<vmem>>, vector<16x768xf32>
      tpu.vector_store %arg7[%c0_22, %c0_23], %35 {strides = array<i32>} : memref<16x768xf32, #tpu.memory_space<vmem>>, vector<16x768xf32>,
    } else {
    }
    return
  }
  func.func @transform_0(%arg0: i32, %arg1: i32) -> (i32, i32) {
    %c0_i32 = arith.constant 0 : i32
    %c0_i32_0 = arith.constant 0 : i32
    return %arg0, %c0_i32 : i32, i32
  }
  func.func @transform_1(%arg0: i32, %arg1: i32) -> (i32, i32) {
    %c0_i32 = arith.constant 0 : i32
    %c0_i32_0 = arith.constant 0 : i32
    return %c0_i32, %arg1 : i32, i32
  }
  func.func @transform_2(%arg0: i32, %arg1: i32) -> (i32, i32) {
    %c0_i32 = arith.constant 0 : i32
    %c0_i32_0 = arith.constant 0 : i32
    return %c0_i32, %arg1 : i32, i32
  }
  func.func @transform_3(%arg0: i32, %arg1: i32) -> (i32, i32) {
    %c0_i32 = arith.constant 0 : i32
    %c0_i32_0 = arith.constant 0 : i32
    return %arg1, %c0_i32 : i32, i32
  }
  func.func @transform_4(%arg0: i32, %arg1: i32) -> (i32, i32) {
    %c0_i32 = arith.constant 0 : i32
    %c0_i32_0 = arith.constant 0 : i32
    %c0_i32_1 = arith.constant 0 : i32
    return %c0_i32, %c0_i32_0 : i32, i32
  }
  func.func @transform_5(%arg0: i32, %arg1: i32) -> (i32, i32) {
    %c0_i32 = arith.constant 0 : i32
    %c0_i32_0 = arith.constant 0 : i32
    return %arg0, %c0_i32 : i32, i32
  }
}

</mosaic_0001>

<bundles_post_ra>
// kernel: tpu_custom_call.1
= control target key start
LH: loop header
LB: loop body
LE: loop exit
PB: predicated region body
PF: predicated region fallthrough
CT: control target
= control target key end

     0   :  { %s13183_s0 = inlined_call_operand.hbm [shape: f32[16,768], index: 0, kind: input, shape index: {}]   ;;  %s13184_s1 = inlined_call_operand.hbm [shape: bf16[768,3072], index: 1, kind: input, shape index: {}]   ;;  %s13185_s2 = inlined_call_operand.hbm [shape: f32[1,3072], index: 2, kind: input, shape index: {}]   ;;  %s13186_s3 = inlined_call_operand.hbm [shape: bf16[3072,768], index: 3, kind: input, shape index: {}]   ;;  %s13187_s4 = inlined_call_operand.hbm [shape: f32[1,768], index: 4, kind: input, shape index: {}]   ;;  %s13188_s5 = inlined_call_operand.hbm [shape: f32[16,768], index: 5, kind: output, shape index: {}]  }
   0x1   :  { %13191 = sst [smem:[#allocation19_spill]] %s13184_s1 }
   0x2   :  { %13192 = sst [smem:[#allocation20_spill]] %s13187_s4 }
   0x3   :  { %13193 = sst [smem:[#allocation21_spill]] %s13188_s5 }
   0x4   :  { %10 = vsyncpa [#allocation3], 0 }
   0x5   :  { %11 = vsyncpa [#allocation6], 0 }
   0x6   :  { %13 = vsyncpa [#allocation6 + $0x1], 0 }
   0x7   :  { %14 = vsyncpa [#allocation9], 0 }
   0x8   :  { %16 = vsyncpa [#allocation9 + $0x1], 0 }
   0x9   :  { %17 = vsyncpa [#allocation4], 0  ;;  %s11055_s18 = smov 0   ;;  %s11057_s19 = smov 0  }
   0xa   :  { %s11059_s20 = smov 0   ;;  %s11061_s21 = smov 0  }
   0xb   :  { %s11063_s22 = smov 0   ;;  %s11065_s23 = smov 0  }
   0xc LB: > { %s11084_s24 = sadd.s32 4294967295, %s11010_s23   ;;  %s68_s25 = sadd.s32 1, %s10998_s20  ;;  %s11010_s23 = sphi %s11065_s23, %s23_s23   ;;  %s11006_s22 = sphi %s11063_s22, %s13211_s22   ;;  %s11002_s21 = sphi %s11061_s21, %s13210_s21   ;;  %s10998_s20 = sphi %s11059_s20, %s13209_s20   ;;  %s10994_s19 = sphi %s11057_s19, %s13208_s19   ;;  %s10990_s18 = sphi %s11055_s18, %s13207_s18  }
   0xd   : > { %p75_p0 = scmp.ne.s32.totalorder %s10998_s20, %s10994_s19  ;;  %p76_p1 = scmp.eq.s32.totalorder %s11010_s23, 0 }
   0xe   : > { %p81_p2 = scmp.ne.s32.totalorder %s10994_s19, %s10990_s18  ;;  %p82_p3 = scmp.eq.s32.totalorder %s11084_s24, 0 }
   0xf   : > { %p11092_p4 = por %p76_p1, %p75_p0  ;;  %p6763_p5 = scmp.ge.s32.totalorder %s11010_s23, 1 }
  0x10   : > { %p11099_p6 = por %p82_p3, %p81_p2  ;;  %p191_p7 = scmp.lt.s32.totalorder %s11010_s23, 4 }
  0x11   : > { %s13196_s4 = sld [smem:[#allocation20_spill]]  ;;  %s11012_s7 = smov [#allocation10]  }
  0x12   : > { %p11107_p8 = pnand %p6763_p5, %p191_p7  ;;  %s223_s8 = sshll.u32 %s11012_s7, 4  ;;  %s224_s8 = int_to_ptr.vmem [resolvable:$true] %s223_s8 }
  0x13   : > { %p10666_p10 = scmp.lt.s32.totalorder %s11010_s23, 3  ;;  %s32_s11 = sadd.s32 1, %s11006_s22 }
  0x14   : > { %p10647_p9 = pneg %p11107_p8  ;;  %p33_p13 = scmp.ge.s32.totalorder %s32_s11, 3 }
  0x15   : > { %p11122_p12 = pnand %p10666_p10, %p11092_p4  ;;  %s13190_s12 = sand.u32 1, %s11010_s23  }
  0x16   : > { %p11116_p11 = pnand %p10647_p9, %p82_p3  ;;  %s236_s13 = sand.u32 1, %s10998_s20  }
  0x17   : > { %s221_s30 = sshll.u32 %s13196_s4, 4  ;;  %s13213_s11 = smov (%p33_p13, %s32_s11), 0  ;;  %s222_s30 = int_to_ptr.hbm [resolvable:$true] %s221_s30 }
  0x18   : > { %10653 = dma.hbm_to_vmem [thread:$0]  (!%p11116_p11), %s222_s30, 96, %s224_s8, [#allocation9]  }
  0x19   : > { %13200 = sst [smem:[#allocation17_spill]] %s13213_s11  ;;  %s11133_s14 = smul.u32 3072, %s236_s13 }
  0x1a   : > { %s65_s15 = ssub.s32 %s11006_s22, %s13213_s11  ;;  %s9856_s16 = sshll.u32 %s11006_s22, 5 }
  0x1b   : > { %p66_p0 = scmp.eq.s32.totalorder %s65_s15, 0  ;;  %s13201_s1 = sld [smem:[#allocation19_spill]] }
  0x1c   : > { %s238_s28 = scalar_lea.vmem [#allocation5], %s11133_s14  ;;  %s235_s8 = scalar_lea.sflag [#allocation6], %s13190_s12 }
  0x1d   : > { %s246_s29 = sshll.u32 %s238_s28, 4  ;;  %s11013_s4 = smov 1536   ;;  %s247_s29 = int_to_ptr.vmem [resolvable:$true] %s246_s29 }
  0x1e   : > { %s11145_s30 = scalar_select %p66_p0, %s10998_s20, %s68_s25  }
  0x1f   : > { %s11014_s11 = smov 512   ;;  %s11015_s5 = smov 32  }
  0x20   : > { %13202 = sst [smem:[#allocation18_spill]] %s11145_s30  ;;  %s11016_s25 = smov [#allocation2]  }
  0x21   : > { %s243_s26 = scalar_lea.hbm %s13201_s1, %s9856_s16  ;;  %s206_s16 = sshll.u32 %s13183_s0, 4  ;;  %s207_s16 = int_to_ptr.hbm [resolvable:$true] %s206_s16 }
  0x22   : > { %s244_s7 = sshll.u32 %s243_s26, 4  ;;  %s208_s18 = sshll.u32 %s11016_s25, 4  ;;  %s245_s7 = int_to_ptr.hbm [resolvable:$true] %s244_s7  ;;  %s209_s18 = int_to_ptr.vmem [resolvable:$true] %s208_s18 }
  0x23   : > { %10657 = dma.hbm_to_vmem [thread:$0]  (!%p11122_p12), %s245_s7, 49152, %s247_s29, %s235_s8, %s11013_s4, %s11014_s11, %s11015_s5  }
  0x24   : > { %s6769_s26 = sshll.u32 %s236_s13, 3  ;;  %s11017_s28 = smov 768  }
  0x25   : > { %s11018_s1 = smov 48   ;;  %s6770_s12 = sshll.u32 %s11006_s22, 3 }
  0x26   : > { %10650 = dma.hbm_to_vmem [thread:$0]  (!%p11116_p11), %s207_s16, 1536, %s209_s18, [#allocation3], %s11017_s28, %s11017_s28, %s11018_s1  }
  0x27   : > { %s264_s5 = scalar_lea.hbm %s13185_s2, %s6770_s12  ;;  %s260_s11 = scalar_lea.vmem [#allocation7], %s6769_s26 }
  0x28   : > { %s268_s29 = sshll.u32 %s260_s11, 4  ;;  %s266_s7 = sshll.u32 %s264_s5, 4  ;;  %s269_s29 = int_to_ptr.vmem [resolvable:$true] %s268_s29  ;;  %s267_s7 = int_to_ptr.hbm [resolvable:$true] %s266_s7 }
  0x29   : > { %10660 = dma.hbm_to_vmem [thread:$0]  (!%p11122_p12), %s267_s7, 128, %s269_s29, %s235_s8  }
  0x2a   : > { %s10627_s15 = smul.u32 3072, %s11006_s22  ;;  %s279_s13 = scalar_lea.vmem [#allocation8], %s11133_s14 }
  0x2b   : > { %s288_s17 = sshll.u32 %s279_s13, 4  ;;  %s13203_s30 = sand.u32 1, %s11010_s23   ;;  %s289_s17 = int_to_ptr.vmem [resolvable:$true] %s288_s17 }
  0x2c   : > { %s285_s1 = scalar_lea.hbm %s13186_s3, %s10627_s15  ;;  %s276_s12 = scalar_lea.sflag [#allocation9], %s13203_s30 }
  0x2d   : > { %s286_s16 = sshll.u32 %s285_s1, 4  ;;  %s11019_s18 = smov 384   ;;  %s287_s16 = int_to_ptr.hbm [resolvable:$true] %s286_s16 }
  0x2e   : > { %s11020_s26 = smov 24   ;;  %300 = sbr.rel (%p11107_p8) target bundleno = 1201 (0x4b1), region = 40 }
  0x2f   : > { %10663 = dma.hbm_to_vmem [thread:$0]  (!%p11122_p12), %s287_s16, 49152, %s289_s17, %s276_s12, %s11019_s18, %s11019_s18, %s11020_s26  }
  0x33   : > { %10969 = dma.done.wait (%p82_p3), [#allocation3], 1536  }
  0x34   : > { %10971 = vsyncadd (%p82_p3), [#allocation3], 4294965760  ;;  %s307_s14 = sand.u32 1, %s11084_s24   ;;  %s309_s8 = sand.u32 1, %s10994_s19  }
  0x35   : > { %s10628_s28 = smul.u32 3072, %s309_s8  ;;  %s308_s4 = scalar_lea.sflag [#allocation6], %s307_s14 }
  0x37   : > { %s11179_s5 = scalar_lea.vmem [#allocation5], %s10628_s28 }
  0x38   : > { %10973 = dma.done.wait (%p11099_p6), %s308_s4, 49280  }
  0x39   : > { %10975 = vsyncadd (%p11099_p6), %s308_s4, 4294918016  ;;  %s6776_s6 = sshll.u32 %s309_s8, 3  ;;  %s328_s11 = scalar_lea.sflag [#allocation9], %s307_s14 }
  0x3a   : > { %s11185_s10 = scalar_lea.vmem [#allocation7], %s6776_s6  ;;  %s11187_s29 = scalar_lea.vmem [#allocation8], %s10628_s28 }
  0x3b   : > { %10977 = dma.done.wait (%p11099_p6), %s328_s11, 49152  }
  0x3c   : > { %10979 = vsyncadd (%p11099_p6), %s328_s11, 4294918144 }
  0x3d   : > { %10981 = dma.done.wait (%p82_p3), [#allocation9], 96  }
  0x3e   : > { %10983 = vsyncadd (%p82_p3), [#allocation9], 4294967200  ;;  %p6778_p1 = scmp.ne.s32.totalorder %s11002_s21, 0 }
  0x40   : > { %377 = sbr.rel (%p6778_p1) target bundleno = 82 (0x52), region = 64 }
  0x45   : > { %v11021_v0 = vmov 0.0  }
  0x46   : > { %378 = vst [vmem:[#allocation11] sm:$0xff] %v11021_v0 }
  0x47   : > { %379 = vst [vmem:[#allocation11 + $0x8] sm:$0xff] %v11021_v0 }
  0x48   : > { %380 = vst [vmem:[#allocation11 + $0x10] sm:$0xff] %v11021_v0 }
  0x49   : > { %381 = vst [vmem:[#allocation11 + $0x18] sm:$0xff] %v11021_v0 }
  0x4a   : > { %382 = vst [vmem:[#allocation11 + $0x20] sm:$0xff] %v11021_v0 }
  0x4b   : > { %383 = vst [vmem:[#allocation11 + $0x28] sm:$0xff] %v11021_v0 }
  0x4c   : > { %384 = vst [vmem:[#allocation11 + $0x30] sm:$0xff] %v11021_v0 }
  0x4d   : > { %385 = vst [vmem:[#allocation11 + $0x38] sm:$0xff] %v11021_v0 }
  0x4e   : > { %386 = vst [vmem:[#allocation11 + $0x40] sm:$0xff] %v11021_v0 }
  0x4f   : > { %387 = vst [vmem:[#allocation11 + $0x48] sm:$0xff] %v11021_v0 }
  0x50   : > { %388 = vst [vmem:[#allocation11 + $0x50] sm:$0xff] %v11021_v0 }
  0x51   : > { %389 = vst [vmem:[#allocation11 + $0x58] sm:$0xff] %v11021_v0 }
  0x52 PF: > { %v7005_v1 = vld [vmem:[%s11179_s5 + $0x1c0] sm:$0xf]  ;;  %p9851_p2 = scmp.ne.s32.totalorder %s11002_s21, 2 }
  0x53   : > { %v9917_v2 = vld [vmem:[%s11179_s5 + $0x1dc] sm:$0xf0] }
  0x54   : > { %v7261_v3 = vld [vmem:[%s11179_s5 + $0x3c0] sm:$0xf]  ;;  %v7006_v4 = vor.u32 %v9917_v2, %v7005_v1 }
  0x55   : > { %v9981_v5 = vld [vmem:[%s11179_s5 + $0x3dc] sm:$0xf0] }
  0x56   : > { %v7517_v6 = vld [vmem:[%s11179_s5 + $0x5c0] sm:$0xf]  ;;  %v7262_v8 = vor.u32 %v9981_v5, %v7261_v3  ;;  %2730 = vmatpush.bf16.msra.mxu0 %v7006_v4 }
  0x57   : > { %v10045_v7 = vld [vmem:[%s11179_s5 + $0x5dc] sm:$0xf0] }
  0x58   : > { %v7518_v9 = vor.u32 %v10045_v7, %v7517_v6  ;;  %v7773_v10 = vld [vmem:[%s11179_s5 + $0x7c0] sm:$0xf]  ;;  %2744 = vmatpush.bf16.msra.mxu1 %v7262_v8 }
  0x59   : > { %v10109_v11 = vld [vmem:[%s11179_s5 + $0x7dc] sm:$0xf0] }
  0x5a   : > { %v6973_v12 = vld [vmem:[%s11179_s5 + $0x180] sm:$0xf]  ;;  %v7774_v13 = vor.u32 %v10109_v11, %v7773_v10  ;;  %2758 = vmatpush.bf16.msra.mxu2 %v7518_v9 }
  0x5b   : > { %v9909_v14 = vld [vmem:[%s11179_s5 + $0x19c] sm:$0xf0] }
  0x5c   : > { %v7229_v15 = vld [vmem:[%s11179_s5 + $0x380] sm:$0xf]  ;;  %v6974_v17 = vor.u32 %v9909_v14, %v6973_v12  ;;  %2772 = vmatpush.bf16.msra.mxu3 %v7774_v13 }
  0x5d   : > { %v9973_v16 = vld [vmem:[%s11179_s5 + $0x39c] sm:$0xf0] }
  0x5e   : > { %v7230_v18 = vor.u32 %v9973_v16, %v7229_v15  ;;  %v7485_v19 = vld [vmem:[%s11179_s5 + $0x580] sm:$0xf]  ;;  %2731 = vmatpush.bf16.msra.mxu0 %v6974_v17 }
  0x5f   : > { %v10037_v20 = vld [vmem:[%s11179_s5 + $0x59c] sm:$0xf0] }
  0x60   : > { %v7741_v21 = vld [vmem:[%s11179_s5 + $0x780] sm:$0xf]  ;;  %v7486_v22 = vor.u32 %v10037_v20, %v7485_v19  ;;  %2745 = vmatpush.bf16.msra.mxu1 %v7230_v18 }
  0x61   : > { %v10101_v23 = vld [vmem:[%s11179_s5 + $0x79c] sm:$0xf0] }
  0x62   : > { %v6941_v24 = vld [vmem:[%s11179_s5 + $0x140] sm:$0xf]  ;;  %v7742_v26 = vor.u32 %v10101_v23, %v7741_v21  ;;  %2759 = vmatpush.bf16.msra.mxu2 %v7486_v22 }
  0x63   : > { %v9901_v25 = vld [vmem:[%s11179_s5 + $0x15c] sm:$0xf0] }
  0x64   : > { %v7197_v27 = vld [vmem:[%s11179_s5 + $0x340] sm:$0xf]  ;;  %v6942_v30 = vor.u32 %v9901_v25, %v6941_v24  ;;  %2773 = vmatpush.bf16.msra.mxu3 %v7742_v26 }
  0x65   : > { %v9965_v28 = vld [vmem:[%s11179_s5 + $0x35c] sm:$0xf0] }
  0x66   : > { %v7453_v29 = vld [vmem:[%s11179_s5 + $0x540] sm:$0xf]  ;;  %v7198_v34 = vor.u32 %v9965_v28, %v7197_v27  ;;  %2732 = vmatpush.bf16.msra.mxu0 %v6942_v30 }
  0x67   : > { %v10029_v31 = vld [vmem:[%s11179_s5 + $0x55c] sm:$0xf0] }
  0x68   : > { %v7709_v32 = vld [vmem:[%s11179_s5 + $0x740] sm:$0xf]  ;;  %v7454_v35 = vor.u32 %v10029_v31, %v7453_v29  ;;  %2746 = vmatpush.bf16.msra.mxu1 %v7198_v34  ;;  %v9913_v34 = vld [vmem:[%s11179_s5 + $0x1c4] sm:$0xf] }
  0x69   : > { %v10093_v33 = vld [vmem:[%s11179_s5 + $0x75c] sm:$0xf0] }
  0x6a   : > { %v6909_v36 = vld [vmem:[%s11179_s5 + $0x100] sm:$0xf]  ;;  %v7710_v39 = vor.u32 %v10093_v33, %v7709_v32  ;;  %2760 = vmatpush.bf16.msra.mxu2 %v7454_v35  ;;  %v7007_v35 = vld [vmem:[%s11179_s5 + $0x1e0] sm:$0xf0] }
  0x6b   : > { %v9893_v37 = vld [vmem:[%s11179_s5 + $0x11c] sm:$0xf0] }
  0x6c   : > { %v7165_v38 = vld [vmem:[%s11179_s5 + $0x300] sm:$0xf]  ;;  %v6910_v45 = vor.u32 %v9893_v37, %v6909_v36  ;;  %2774 = vmatpush.bf16.msra.mxu3 %v7710_v39  ;;  %v7263_v39 = vld [vmem:[%s11179_s5 + $0x3e0] sm:$0xf0] }
  0x6d   : > { %v9957_v40 = vld [vmem:[%s11179_s5 + $0x31c] sm:$0xf0] }
  0x6e   : > { %v7421_v41 = vld [vmem:[%s11179_s5 + $0x500] sm:$0xf]  ;;  %v7166_v46 = vor.u32 %v9957_v40, %v7165_v38  ;;  %2733 = vmatpush.bf16.msra.mxu0 %v6910_v45  ;;  %v9977_v38 = vld [vmem:[%s11179_s5 + $0x3c4] sm:$0xf] }
  0x6f   : > { %v10021_v42 = vld [vmem:[%s11179_s5 + $0x51c] sm:$0xf0] }
  0x70   : > { %v7677_v43 = vld [vmem:[%s11179_s5 + $0x700] sm:$0xf]  ;;  %v7422_v47 = vor.u32 %v10021_v42, %v7421_v41  ;;  %2747 = vmatpush.bf16.msra.mxu1 %v7166_v46 }
  0x71   : > { %v10085_v44 = vld [vmem:[%s11179_s5 + $0x71c] sm:$0xf0] }
  0x72   : > { %v6877_v48 = vld [vmem:[%s11179_s5 + $0xc0] sm:$0xf]  ;;  %v7678_v51 = vor.u32 %v10085_v44, %v7677_v43  ;;  %2761 = vmatpush.bf16.msra.mxu2 %v7422_v47  ;;  %v7010_v44 = vor.u32 %v9913_v34, %v7007_v35  ;;  %v6879_v34 = vld [vmem:[%s11179_s5 + $0xe0] sm:$0xf0] }
  0x73   : > { %v9885_v49 = vld [vmem:[%s11179_s5 + $0xdc] sm:$0xf0]  ;;  %v9945_v35 = vld [vmem:[%s11179_s5 + $0x2c4] sm:$0xf] }
  0x74   : > { %v7133_v50 = vld [vmem:[%s11179_s5 + $0x2c0] sm:$0xf]  ;;  %v6878_v57 = vor.u32 %v9885_v49, %v6877_v48  ;;  %2775 = vmatpush.bf16.msra.mxu3 %v7678_v51  ;;  %v7266_v48 = vor.u32 %v9977_v38, %v7263_v39  ;;  %v9905_v49 = vld [vmem:[%s11179_s5 + $0x184] sm:$0xf] }
  0x75   : > { %v9949_v52 = vld [vmem:[%s11179_s5 + $0x2dc] sm:$0xf0]  ;;  %v9969_v51 = vld [vmem:[%s11179_s5 + $0x384] sm:$0xf] }
  0x76   : > { %v7389_v53 = vld [vmem:[%s11179_s5 + $0x4c0] sm:$0xf]  ;;  %v7134_v58 = vor.u32 %v9949_v52, %v7133_v50  ;;  %2734 = vmatpush.bf16.msra.mxu0 %v6878_v57  ;;  %v6975_v50 = vld [vmem:[%s11179_s5 + $0x1a0] sm:$0xf0] }
  0x77   : > { %v10013_v54 = vld [vmem:[%s11179_s5 + $0x4dc] sm:$0xf0]  ;;  %v7231_v52 = vld [vmem:[%s11179_s5 + $0x3a0] sm:$0xf0] }
  0x78   : > { %v7645_v55 = vld [vmem:[%s11179_s5 + $0x6c0] sm:$0xf]  ;;  %v7390_v59 = vor.u32 %v10013_v54, %v7389_v53  ;;  %2748 = vmatpush.bf16.msra.mxu1 %v7134_v58  ;;  %v396_v54 = vld [vmem:[#allocation2 + $0x30] sm:$0xff] }
  0x79   : > { %v10077_v56 = vld [vmem:[%s11179_s5 + $0x6dc] sm:$0xf0] }
  0x7a   : > { %v6845_v60 = vld [vmem:[%s11179_s5 + $0x80] sm:$0xf]  ;;  %v7646_v63 = vor.u32 %v10077_v56, %v7645_v55  ;;  %2762 = vmatpush.bf16.msra.mxu2 %v7390_v59 }
  0x7b   : > { %v9877_v61 = vld [vmem:[%s11179_s5 + $0x9c] sm:$0xf0] }
  0x7c   : > { %v7101_v62 = vld [vmem:[%s11179_s5 + $0x280] sm:$0xf]  ;;  %v6846_v5 = vor.u32 %v9877_v61, %v6845_v60  ;;  %2776 = vmatpush.bf16.msra.mxu3 %v7646_v63  ;;  %v6978_v60 = vor.u32 %v9905_v49, %v6975_v50  ;;  %v9897_v63 = vld [vmem:[%s11179_s5 + $0x144] sm:$0xf] }
  0x7d   : > { %v9941_v0 = vld [vmem:[%s11179_s5 + $0x29c] sm:$0xf0] }
  0x7e   : > { %v7357_v1 = vld [vmem:[%s11179_s5 + $0x480] sm:$0xf]  ;;  %v7102_v6 = vor.u32 %v9941_v0, %v7101_v62  ;;  %2735 = vmatpush.bf16.msra.mxu0 %v6846_v5  ;;  %v7234_v0 = vor.u32 %v9969_v51, %v7231_v52  ;;  %v7199_v5 = vld [vmem:[%s11179_s5 + $0x360] sm:$0xf0] }
  0x7f   : > { %v10005_v2 = vld [vmem:[%s11179_s5 + $0x49c] sm:$0xf0] }
  0x80   : > { %v7613_v3 = vld [vmem:[%s11179_s5 + $0x680] sm:$0xf]  ;;  %v7358_v7 = vor.u32 %v10005_v2, %v7357_v1  ;;  %2749 = vmatpush.bf16.msra.mxu1 %v7102_v6  ;;  %v6943_v1 = vld [vmem:[%s11179_s5 + $0x160] sm:$0xf0]  ;;  %v391_v2 = vld [vmem:[#allocation2 + $0x8] sm:$0xff] }
  0x81   : > { %v10069_v4 = vld [vmem:[%s11179_s5 + $0x69c] sm:$0xf0] }
  0x82   : > { %v6813_v8 = vld [vmem:[%s11179_s5 + $0x40] sm:$0xf]  ;;  %v7614_v11 = vor.u32 %v10069_v4, %v7613_v3  ;;  %2763 = vmatpush.bf16.msra.mxu2 %v7358_v7  ;;  %v397_v3 = vld [vmem:[#allocation2 + $0x38] sm:$0xff]  ;;  %v9961_v4 = vld [vmem:[%s11179_s5 + $0x344] sm:$0xf] }
  0x83   : > { %v9869_v9 = vld [vmem:[%s11179_s5 + $0x5c] sm:$0xf0]  ;;  %v11290_v7 = vpack.c.bf16 %v397_v3, %v391_v2 }
  0x84   : > { %v7069_v10 = vld [vmem:[%s11179_s5 + $0x240] sm:$0xf]  ;;  %v6814_v17 = vor.u32 %v9869_v9, %v6813_v8  ;;  %2777 = vmatpush.bf16.msra.mxu3 %v7614_v11 }
  0x85   : > { %v9933_v12 = vld [vmem:[%s11179_s5 + $0x25c] sm:$0xf0] }
  0x86   : > { %v7325_v13 = vld [vmem:[%s11179_s5 + $0x440] sm:$0xf]  ;;  %v7070_v20 = vor.u32 %v9933_v12, %v7069_v10  ;;  %2736 = vmatpush.bf16.msra.mxu0 %v6814_v17  ;;  %v7202_v17 = vor.u32 %v9961_v4, %v7199_v5  ;;  %v9857_v5 = vld [vmem:[%s11179_s5 + $0x4] sm:$0xf] }
  0x87   : > { %v9997_v14 = vld [vmem:[%s11179_s5 + $0x45c] sm:$0xf0] }
  0x88   : > { %v7581_v15 = vld [vmem:[%s11179_s5 + $0x640] sm:$0xf]  ;;  %v7326_v21 = vor.u32 %v9997_v14, %v7325_v13  ;;  %2750 = vmatpush.bf16.msra.mxu1 %v7070_v20  ;;  %v6946_v13 = vor.u32 %v9897_v63, %v6943_v1  ;;  %v9889_v14 = vld [vmem:[%s11179_s5 + $0x104] sm:$0xf]  ;;  %v399_v20 = vld [vmem:[#allocation2 + $0x48] sm:$0xff] }
  0x89   : > { %v10061_v16 = vld [vmem:[%s11179_s5 + $0x65c] sm:$0xf0] }
  0x8a   : > { %v6781_v18 = vld [vmem:[%s11179_s5] sm:$0xf]  ;;  %v7582_v25 = vor.u32 %v10061_v16, %v7581_v15  ;;  %2764 = vmatpush.bf16.msra.mxu2 %v7326_v21  ;;  %v6911_v15 = vld [vmem:[%s11179_s5 + $0x120] sm:$0xf0]  ;;  %v392_v16 = vld [vmem:[#allocation2 + $0x10] sm:$0xff] }
  0x8b   : > { %v9861_v19 = vld [vmem:[%s11179_s5 + $0x1c] sm:$0xf0]  ;;  %v9953_v21 = vld [vmem:[%s11179_s5 + $0x304] sm:$0xf] }
  0x8c   : > { %v7037_v22 = vld [vmem:[%s11179_s5 + $0x200] sm:$0xf]  ;;  %v6782_v32 = vor.u32 %v9861_v19, %v6781_v18  ;;  %2778 = vmatpush.bf16.msra.mxu3 %v7582_v25  ;;  %v393_v19 = vld [vmem:[#allocation2 + $0x18] sm:$0xff] }
  0x8d   : > { %v9925_v23 = vld [vmem:[%s11179_s5 + $0x21c] sm:$0xf0] }
  0x8e   : > { %v7293_v24 = vld [vmem:[%s11179_s5 + $0x400] sm:$0xf]  ;;  %v7038_v36 = vor.u32 %v9925_v23, %v7037_v22  ;;  %2737 = vmatpush.bf16.msra.mxu0 %v6782_v32  ;;  %v7167_v22 = vld [vmem:[%s11179_s5 + $0x320] sm:$0xf0] }
  0x8f   : > { %v9989_v26 = vld [vmem:[%s11179_s5 + $0x41c] sm:$0xf0] }
  0x90   : > { %v7549_v27 = vld [vmem:[%s11179_s5 + $0x600] sm:$0xf]  ;;  %v7294_v37 = vor.u32 %v9989_v26, %v7293_v24  ;;  %2751 = vmatpush.bf16.msra.mxu1 %v7038_v36  ;;  %v11302_v24 = vpack.c.bf16 %v399_v20, %v393_v19  ;;  %v7135_v36 = vld [vmem:[%s11179_s5 + $0x2e0] sm:$0xf0] }
  0x91   : > { %v10053_v28 = vld [vmem:[%s11179_s5 + $0x61c] sm:$0xf0] }
  0x92   : > { %v8029_v29 = vld [vmem:[%s11179_s5 + $0x9c0] sm:$0xf]  ;;  %v7550_v40 = vor.u32 %v10053_v28, %v7549_v27  ;;  %2765 = vmatpush.bf16.msra.mxu2 %v7294_v37  ;;  %v6914_v27 = vor.u32 %v9889_v14, %v6911_v15  ;;  %v7775_v14 = vld [vmem:[%s11179_s5 + $0x7e0] sm:$0xf0] }
  0x93   : > { %v10173_v30 = vld [vmem:[%s11179_s5 + $0x9dc] sm:$0xf0]  ;;  %2752 = vmatmul.bf16.vlgmr.msra.gmra.mxu1 %v11290_v7 }
  0x94   : > { %v8285_v31 = vld [vmem:[%s11179_s5 + $0xbc0] sm:$0xf]  ;;  %v8030_v41 = vor.u32 %v10173_v30, %v8029_v29  ;;  %2779 = vmatpush.bf16.msra.mxu3 %v7550_v40 }
  0x95   : > { %v10237_v33 = vld [vmem:[%s11179_s5 + $0xbdc] sm:$0xf0] }
  0x96   : > { %v7997_v42 = vld [vmem:[%s11179_s5 + $0x980] sm:$0xf]  ;;  %v8286_v43 = vor.u32 %v10237_v33, %v8285_v31  ;;  %2786 = vmatpush.bf16.msrb.mxu0 %v8030_v41  ;;  %2814 = vmatpush.bf16.msrb.mxu2 %v7010_v44  ;;  %v7170_v31 = vor.u32 %v9953_v21, %v7167_v22  ;;  %v9881_v33 = vld [vmem:[%s11179_s5 + $0xc4] sm:$0xf] }
  0x97   : > { %v10165_v45 = vld [vmem:[%s11179_s5 + $0x99c] sm:$0xf0]  ;;  %2780 = vmatmul.bf16.vlgmr.msra.gmra.mxu3 %v11302_v24  ;;  %v6882_v39 = vor.u32 %v9881_v33, %v6879_v34  ;;  %v8287_v21 = vld [vmem:[%s11179_s5 + $0xbe0] sm:$0xf0] }
  0x98   : > { %v8253_v46 = vld [vmem:[%s11179_s5 + $0xb80] sm:$0xf]  ;;  %v7998_v55 = vor.u32 %v10165_v45, %v7997_v42  ;;  %2800 = vmatpush.bf16.msrb.mxu1 %v8286_v43  ;;  %2828 = vmatpush.bf16.msrb.mxu3 %v7266_v48  ;;  %v7138_v43 = vor.u32 %v9945_v35, %v7135_v36  ;;  %v9873_v45 = vld [vmem:[%s11179_s5 + $0x84] sm:$0xf] }
  0x99   : > { %v10229_v47 = vld [vmem:[%s11179_s5 + $0xb9c] sm:$0xf0]  ;;  %v7103_v48 = vld [vmem:[%s11179_s5 + $0x2a0] sm:$0xf0] }
  0x9a   : > { %v390_v53 = vld [vmem:[#allocation2] sm:$0xff]  ;;  %v8254_v59 = vor.u32 %v10229_v47, %v8253_v46  ;;  %2787 = vmatpush.bf16.msrb.mxu0 %v7998_v55  ;;  %2815 = vmatpush.bf16.msrb.mxu2 %v6978_v60 }
  0x9b   : > { %v7965_v56 = vld [vmem:[%s11179_s5 + $0x940] sm:$0xf]  ;;  %v11280_v58 = vpack.c.bf16 %v396_v54, %v390_v53  ;;  %v6847_v46 = vld [vmem:[%s11179_s5 + $0xa0] sm:$0xf0] }
  0x9c   : > { %v10157_v57 = vld [vmem:[%s11179_s5 + $0x95c] sm:$0xf0]  ;;  %2801 = vmatpush.bf16.msrb.mxu1 %v8254_v59  ;;  %2829 = vmatpush.bf16.msrb.mxu3 %v7234_v0  ;;  %v9937_v47 = vld [vmem:[%s11179_s5 + $0x284] sm:$0xf]  ;;  %v6850_v51 = vor.u32 %v9873_v45, %v6847_v46 }
  0x9d   : > { %v8221_v61 = vld [vmem:[%s11179_s5 + $0xb40] sm:$0xf]  ;;  %2738 = vmatmul.bf16.vlgmr.msra.gmra.mxu0 %v11280_v58  ;;  %v7966_v8 = vor.u32 %v10157_v57, %v7965_v56  ;;  %v7106_v55 = vor.u32 %v9937_v47, %v7103_v48  ;;  %v9865_v57 = vld [vmem:[%s11179_s5 + $0x44] sm:$0xf] }
  0x9e   : > { %v10221_v62 = vld [vmem:[%s11179_s5 + $0xb5c] sm:$0xf0]  ;;  %2816 = vmatpush.bf16.msrb.mxu2 %v6946_v13  ;;  %v6815_v59 = vld [vmem:[%s11179_s5 + $0x60] sm:$0xf0] }
  0x9f   : > { %v7933_v6 = vld [vmem:[%s11179_s5 + $0x900] sm:$0xf]  ;;  %v8222_v12 = vor.u32 %v10221_v62, %v8221_v61  ;;  %2788 = vmatpush.bf16.msrb.mxu0 %v7966_v8  ;;  %v9929_v60 = vld [vmem:[%s11179_s5 + $0x244] sm:$0xf]  ;;  %v6818_v3 = vor.u32 %v9865_v57, %v6815_v59 }
  0xa0   : > { %v10149_v9 = vld [vmem:[%s11179_s5 + $0x91c] sm:$0xf0]  ;;  %2830 = vmatpush.bf16.msrb.mxu3 %v7202_v17  ;;  %v7071_v61 = vld [vmem:[%s11179_s5 + $0x260] sm:$0xf0] }
  0xa1   : > { %v8189_v10 = vld [vmem:[%s11179_s5 + $0xb00] sm:$0xf]  ;;  %v7934_v25 = vor.u32 %v10149_v9, %v7933_v6  ;;  %2802 = vmatpush.bf16.msrb.mxu1 %v8222_v12  ;;  %v6783_v6 = vld [vmem:[%s11179_s5 + $0x20] sm:$0xf0]  ;;  %v7074_v8 = vor.u32 %v9929_v60, %v7071_v61 }
  0xa2   : > { %v10213_v11 = vld [vmem:[%s11179_s5 + $0xb1c] sm:$0xf0]  ;;  %2817 = vmatpush.bf16.msrb.mxu2 %v6914_v27  ;;  %v9921_v9 = vld [vmem:[%s11179_s5 + $0x204] sm:$0xf]  ;;  %v6786_v20 = vor.u32 %v9857_v5, %v6783_v6 }
  0xa3   : > { %v398_v18 = vld [vmem:[#allocation2 + $0x40] sm:$0xff]  ;;  %v8190_v26 = vor.u32 %v10213_v11, %v8189_v10  ;;  %2789 = vmatpush.bf16.msrb.mxu0 %v7934_v25  ;;  %v400_v25 = vld [vmem:[#allocation2 + $0x50] sm:$0xff] }
  0xa4   : > { %v11300_v23 = vpack.c.bf16 %v398_v18, %v392_v16  ;;  %v7901_v28 = vld [vmem:[%s11179_s5 + $0x8c0] sm:$0xf]  ;;  %2831 = vmatpush.bf16.msrb.mxu3 %v7170_v31  ;;  %v7039_v10 = vld [vmem:[%s11179_s5 + $0x220] sm:$0xf0] }
  0xa5   : > { %v10141_v29 = vld [vmem:[%s11179_s5 + $0x8dc] sm:$0xf0]  ;;  %2803 = vmatpush.bf16.msrb.mxu1 %v8190_v26  ;;  %v10041_v11 = vld [vmem:[%s11179_s5 + $0x5c4] sm:$0xf]  ;;  %v7042_v26 = vor.u32 %v9921_v9, %v7039_v10 }
  0xa6   : > { %v8157_v30 = vld [vmem:[%s11179_s5 + $0xac0] sm:$0xf]  ;;  %2766 = vmatmul.bf16.vlgmr.msra.gmra.mxu2 %v11300_v23  ;;  %v7902_v37 = vor.u32 %v10141_v29, %v7901_v28  ;;  %v7519_v12 = vld [vmem:[%s11179_s5 + $0x5e0] sm:$0xf0]  ;;  %v395_v28 = vld [vmem:[#allocation2 + $0x28] sm:$0xff] }
  0xa7   : > { %v10205_v32 = vld [vmem:[%s11179_s5 + $0xadc] sm:$0xf0]  ;;  %2818 = vmatpush.bf16.msrb.mxu2 %v6882_v39  ;;  %v10105_v13 = vld [vmem:[%s11179_s5 + $0x7c4] sm:$0xf]  ;;  %v7522_v27 = vor.u32 %v10041_v11, %v7519_v12  ;;  %v401_v29 = vld [vmem:[#allocation2 + $0x58] sm:$0xff] }
  0xa8   : > { %v8158_v38 = vor.u32 %v10205_v32, %v8157_v30  ;;  %v7869_v40 = vld [vmem:[%s11179_s5 + $0x880] sm:$0xf]  ;;  %2790 = vmatpush.bf16.msrb.mxu0 %v7902_v37  ;;  %2832 = vmatpush.bf16.msrb.mxu3 %v7138_v43  ;;  %v10169_v16 = vld [vmem:[%s11179_s5 + $0x9c4] sm:$0xf]  ;;  %v7778_v30 = vor.u32 %v10105_v13, %v7775_v14 }
  0xa9   : > { %v10133_v41 = vld [vmem:[%s11179_s5 + $0x89c] sm:$0xf0]  ;;  %v8031_v17 = vld [vmem:[%s11179_s5 + $0x9e0] sm:$0xf0] }
  0xaa   : > { %v8125_v42 = vld [vmem:[%s11179_s5 + $0xa80] sm:$0xf]  ;;  %v7870_v49 = vor.u32 %v10133_v41, %v7869_v40  ;;  %2804 = vmatpush.bf16.msrb.mxu1 %v8158_v38  ;;  %v10233_v18 = vld [vmem:[%s11179_s5 + $0xbc4] sm:$0xf]  ;;  %v8034_v31 = vor.u32 %v10169_v16, %v8031_v17  ;;  %v11354_v40 = vpack.c.bf16 %v401_v29, %v395_v28 }
  0xab   : > { %v10197_v44 = vld [vmem:[%s11179_s5 + $0xa9c] sm:$0xf0]  ;;  %2819 = vmatpush.bf16.msrb.mxu2 %v6850_v51  ;;  %v10033_v32 = vld [vmem:[%s11179_s5 + $0x584] sm:$0xf]  ;;  %v8290_v35 = vor.u32 %v10233_v18, %v8287_v21 }
  0xac   : > { %v8126_v50 = vor.u32 %v10197_v44, %v8125_v42  ;;  %v7837_v52 = vld [vmem:[%s11179_s5 + $0x840] sm:$0xf]  ;;  %2791 = vmatpush.bf16.msrb.mxu0 %v7870_v49  ;;  %2833 = vmatpush.bf16.msrb.mxu3 %v7106_v55  ;;  %v7487_v33 = vld [vmem:[%s11179_s5 + $0x5a0] sm:$0xf0] }
  0xad   : > { %v10125_v53 = vld [vmem:[%s11179_s5 + $0x85c] sm:$0xf0]  ;;  %v10097_v34 = vld [vmem:[%s11179_s5 + $0x784] sm:$0xf]  ;;  %v7490_v43 = vor.u32 %v10033_v32, %v7487_v33 }
  0xae   : > { %v8093_v54 = vld [vmem:[%s11179_s5 + $0xa40] sm:$0xf]  ;;  %v7838_v62 = vor.u32 %v10125_v53, %v7837_v52  ;;  %2805 = vmatpush.bf16.msrb.mxu1 %v8126_v50  ;;  %v7743_v37 = vld [vmem:[%s11179_s5 + $0x7a0] sm:$0xf0] }
  0xaf   : > { %v10189_v56 = vld [vmem:[%s11179_s5 + $0xa5c] sm:$0xf0]  ;;  %2820 = vmatpush.bf16.msrb.mxu2 %v6818_v3  ;;  %v10161_v38 = vld [vmem:[%s11179_s5 + $0x984] sm:$0xf]  ;;  %v7746_v44 = vor.u32 %v10097_v34, %v7743_v37 }
  0xb0   : > { %v7805_v63 = vld [vmem:[%s11179_s5 + $0x800] sm:$0xf]  ;;  %v8094_v2 = vor.u32 %v10189_v56, %v8093_v54  ;;  %2792 = vmatpush.bf16.msrb.mxu0 %v7838_v62  ;;  %2834 = vmatpush.bf16.msrb.mxu3 %v7074_v8  ;;  %v7999_v39 = vld [vmem:[%s11179_s5 + $0x9a0] sm:$0xf0] }
  0xb1   : > { %v10117_v0 = vld [vmem:[%s11179_s5 + $0x81c] sm:$0xf0]  ;;  %v10225_v41 = vld [vmem:[%s11179_s5 + $0xb84] sm:$0xf]  ;;  %v8002_v45 = vor.u32 %v10161_v38, %v7999_v39 }
  0xb2   : > { %v8061_v1 = vld [vmem:[%s11179_s5 + $0xa00] sm:$0xf]  ;;  %v7806_v15 = vor.u32 %v10117_v0, %v7805_v63  ;;  %2806 = vmatpush.bf16.msrb.mxu1 %v8094_v2  ;;  %v8255_v42 = vld [vmem:[%s11179_s5 + $0xba0] sm:$0xf0] }
  0xb3   : > { %v10181_v4 = vld [vmem:[%s11179_s5 + $0xa1c] sm:$0xf0]  ;;  %2821 = vmatpush.bf16.msrb.mxu2 %v6786_v20  ;;  %v10025_v46 = vld [vmem:[%s11179_s5 + $0x544] sm:$0xf]  ;;  %v8258_v49 = vor.u32 %v10225_v41, %v8255_v42 }
  0xb4   : > { %v8062_v19 = vor.u32 %v10181_v4, %v8061_v1  ;;  %v394_v22 = vld [vmem:[#allocation2 + $0x20] sm:$0xff]  ;;  %2793 = vmatpush.bf16.msrb.mxu0 %v7806_v15  ;;  %2835 = vmatpush.bf16.msrb.mxu3 %v7042_v26 }
  0xb5   : > { %v11349_v36 = vpack.c.bf16 %v400_v25, %v394_v22  ;;  %v7455_v47 = vld [vmem:[%s11179_s5 + $0x560] sm:$0xf0] }
  0xb6   : > { %2807 = vmatpush.bf16.msrb.mxu1 %v8062_v19  ;;  %v10089_v48 = vld [vmem:[%s11179_s5 + $0x744] sm:$0xf]  ;;  %2822 = vmatmul.bf16.vlgmr.msrb.gmra.mxu2 %v11280_v58  ;;  %v7458_v55 = vor.u32 %v10025_v46, %v7455_v47 }
  0xb7   : > { %2870 = vmatpush.bf16.msra.mxu2 %v8034_v31  ;;  %2794 = vmatmul.bf16.vlgmr.msrb.gmra.mxu0 %v11349_v36  ;;  %v7711_v50 = vld [vmem:[%s11179_s5 + $0x760] sm:$0xf0] }
  0xb8   : > { %2842 = vmatpush.bf16.msra.mxu0 %v7522_v27  ;;  %2884 = vmatpush.bf16.msra.mxu3 %v8290_v35  ;;  %v10153_v51 = vld [vmem:[%s11179_s5 + $0x944] sm:$0xf]  ;;  %v7714_v56 = vor.u32 %v10089_v48, %v7711_v50 }
  0xb9   : > { %v7967_v52 = vld [vmem:[%s11179_s5 + $0x960] sm:$0xf0]  ;;  %2808 = vmatmul.bf16.vlgmr.msrb.gmra.mxu1 %v11354_v40  ;;  %2836 = vmatmul.bf16.vlgmr.msrb.gmra.mxu3 %v11290_v7 }
  0xba   : > { %2856 = vmatpush.bf16.msra.mxu1 %v7778_v30  ;;  %v10217_v53 = vld [vmem:[%s11179_s5 + $0xb44] sm:$0xf]  ;;  %v7970_v57 = vor.u32 %v10153_v51, %v7967_v52 }
  0xbb   : > { %v8223_v54 = vld [vmem:[%s11179_s5 + $0xb60] sm:$0xf0]  ;;  %2871 = vmatpush.bf16.msra.mxu2 %v8002_v45 }
  0xbc   : > { %2843 = vmatpush.bf16.msra.mxu0 %v7490_v43  ;;  %v10017_v59 = vld [vmem:[%s11179_s5 + $0x504] sm:$0xf]  ;;  %2885 = vmatpush.bf16.msra.mxu3 %v8258_v49  ;;  %v8226_v62 = vor.u32 %v10217_v53, %v8223_v54 }
  0xbd   : > { %v7423_v60 = vld [vmem:[%s11179_s5 + $0x520] sm:$0xf0] }
  0xbe   : > { %2857 = vmatpush.bf16.msra.mxu1 %v7746_v44  ;;  %v10081_v61 = vld [vmem:[%s11179_s5 + $0x704] sm:$0xf]  ;;  %v7426_v4 = vor.u32 %v10017_v59, %v7423_v60  ;;  %v9918_v59 = vld [vmem:[%s11179_s5 + $0x1e4] sm:$0xf0] }
  0xbf   : > { %v7679_v63 = vld [vmem:[%s11179_s5 + $0x720] sm:$0xf0]  ;;  %2872 = vmatpush.bf16.msra.mxu2 %v7970_v57  ;;  %v7013_v57 = vld [vmem:[%s11179_s5 + $0x1c8] sm:$0xf] }
  0xc0   : > { %v10145_v0 = vld [vmem:[%s11179_s5 + $0x904] sm:$0xf]  ;;  %2844 = vmatpush.bf16.msra.mxu0 %v7458_v55  ;;  %v7682_v5 = vor.u32 %v10081_v61, %v7679_v63  ;;  %2886 = vmatpush.bf16.msra.mxu3 %v8226_v62  ;;  %v7269_v60 = vld [vmem:[%s11179_s5 + $0x3c8] sm:$0xf] }
  0xc1   : > { %v7935_v1 = vld [vmem:[%s11179_s5 + $0x920] sm:$0xf0]  ;;  %v9982_v62 = vld [vmem:[%s11179_s5 + $0x3e4] sm:$0xf0] }
  0xc2   : > { %v10209_v2 = vld [vmem:[%s11179_s5 + $0xb04] sm:$0xf]  ;;  %2858 = vmatpush.bf16.msra.mxu1 %v7714_v56  ;;  %v7938_v6 = vor.u32 %v10145_v0, %v7935_v1  ;;  %v7525_v63 = vld [vmem:[%s11179_s5 + $0x5c8] sm:$0xf] }
  0xc3   : > { %v8191_v3 = vld [vmem:[%s11179_s5 + $0xb20] sm:$0xf0]  ;;  %v10046_v0 = vld [vmem:[%s11179_s5 + $0x5e4] sm:$0xf0] }
  0xc4   : > { %v10009_v8 = vld [vmem:[%s11179_s5 + $0x4c4] sm:$0xf]  ;;  %v8194_v11 = vor.u32 %v10209_v2, %v8191_v3  ;;  %2845 = vmatpush.bf16.msra.mxu0 %v7426_v4  ;;  %2873 = vmatpush.bf16.msra.mxu2 %v7938_v6  ;;  %v7781_v3 = vld [vmem:[%s11179_s5 + $0x7c8] sm:$0xf]  ;;  %v7014_v6 = vor.u32 %v9918_v59, %v7013_v57 }
  0xc5   : > { %v7391_v9 = vld [vmem:[%s11179_s5 + $0x4e0] sm:$0xf0]  ;;  %v10110_v4 = vld [vmem:[%s11179_s5 + $0x7e4] sm:$0xf0] }
  0xc6   : > { %v10073_v10 = vld [vmem:[%s11179_s5 + $0x6c4] sm:$0xf]  ;;  %v7394_v17 = vor.u32 %v10009_v8, %v7391_v9  ;;  %2859 = vmatpush.bf16.msra.mxu1 %v7682_v5  ;;  %2887 = vmatpush.bf16.msra.mxu3 %v8194_v11  ;;  %v7270_v8 = vor.u32 %v9982_v62, %v7269_v60  ;;  %v7526_v9 = vor.u32 %v10046_v0, %v7525_v63  ;;  %v9910_v11 = vld [vmem:[%s11179_s5 + $0x1a4] sm:$0xf0] }
  0xc7   : > { %v7647_v12 = vld [vmem:[%s11179_s5 + $0x6e0] sm:$0xf0]  ;;  %v7653_v57 = vld [vmem:[%s11179_s5 + $0x6c8] sm:$0xf] }
  0xc8   : > { %v10137_v13 = vld [vmem:[%s11179_s5 + $0x8c4] sm:$0xf]  ;;  %v7650_v18 = vor.u32 %v10073_v10, %v7647_v12  ;;  %2846 = vmatpush.bf16.msra.mxu0 %v7394_v17  ;;  %v6981_v10 = vld [vmem:[%s11179_s5 + $0x188] sm:$0xf] }
  0xc9   : > { %v7903_v14 = vld [vmem:[%s11179_s5 + $0x8e0] sm:$0xf0]  ;;  %v7237_v12 = vld [vmem:[%s11179_s5 + $0x388] sm:$0xf] }
  0xca   : > { %v10201_v15 = vld [vmem:[%s11179_s5 + $0xac4] sm:$0xf]  ;;  %v7906_v19 = vor.u32 %v10137_v13, %v7903_v14  ;;  %2860 = vmatpush.bf16.msra.mxu1 %v7650_v18  ;;  %v7782_v13 = vor.u32 %v10110_v4, %v7781_v3  ;;  %v9974_v14 = vld [vmem:[%s11179_s5 + $0x3a4] sm:$0xf0] }
  0xcb   : > { %v8159_v16 = vld [vmem:[%s11179_s5 + $0xae0] sm:$0xf0]  ;;  %v7749_v17 = vld [vmem:[%s11179_s5 + $0x788] sm:$0xf] }
  0xcc   : > { %v10001_v20 = vld [vmem:[%s11179_s5 + $0x484] sm:$0xf]  ;;  %v8162_v25 = vor.u32 %v10201_v15, %v8159_v16  ;;  %2874 = vmatpush.bf16.msra.mxu2 %v7906_v19  ;;  %v7493_v15 = vld [vmem:[%s11179_s5 + $0x588] sm:$0xf]  ;;  %v6982_v19 = vor.u32 %v9910_v11, %v6981_v10 }
  0xcd   : > { %v7359_v21 = vld [vmem:[%s11179_s5 + $0x4a0] sm:$0xf0]  ;;  %v10038_v16 = vld [vmem:[%s11179_s5 + $0x5a4] sm:$0xf0] }
  0xce   : > { %v10065_v22 = vld [vmem:[%s11179_s5 + $0x684] sm:$0xf]  ;;  %v7362_v31 = vor.u32 %v10001_v20, %v7359_v21  ;;  %2888 = vmatpush.bf16.msra.mxu3 %v8162_v25  ;;  %v10102_v18 = vld [vmem:[%s11179_s5 + $0x7a4] sm:$0xf0]  ;;  %v7238_v20 = vor.u32 %v9974_v14, %v7237_v12  ;;  %v7494_v21 = vor.u32 %v10038_v16, %v7493_v15 }
  0xcf   : > { %v7615_v26 = vld [vmem:[%s11179_s5 + $0x6a0] sm:$0xf0]  ;;  %v9902_v25 = vld [vmem:[%s11179_s5 + $0x164] sm:$0xf0] }
  0xd0   : > { %v10129_v27 = vld [vmem:[%s11179_s5 + $0x884] sm:$0xf]  ;;  %v7618_v32 = vor.u32 %v10065_v22, %v7615_v26  ;;  %2847 = vmatpush.bf16.msra.mxu0 %v7362_v31  ;;  %v6949_v22 = vld [vmem:[%s11179_s5 + $0x148] sm:$0xf] }
  0xd1   : > { %v7871_v28 = vld [vmem:[%s11179_s5 + $0x8a0] sm:$0xf0]  ;;  %v7205_v26 = vld [vmem:[%s11179_s5 + $0x348] sm:$0xf] }
  0xd2   : > { %v10193_v29 = vld [vmem:[%s11179_s5 + $0xa84] sm:$0xf]  ;;  %v7874_v33 = vor.u32 %v10129_v27, %v7871_v28  ;;  %2861 = vmatpush.bf16.msra.mxu1 %v7618_v32  ;;  %v7750_v27 = vor.u32 %v10102_v18, %v7749_v17  ;;  %v9966_v28 = vld [vmem:[%s11179_s5 + $0x364] sm:$0xf0] }
  0xd3   : > { %v8127_v30 = vld [vmem:[%s11179_s5 + $0xaa0] sm:$0xf0]  ;;  %v7717_v31 = vld [vmem:[%s11179_s5 + $0x748] sm:$0xf] }
  0xd4   : > { %v9993_v34 = vld [vmem:[%s11179_s5 + $0x444] sm:$0xf]  ;;  %v8130_v38 = vor.u32 %v10193_v29, %v8127_v30  ;;  %2875 = vmatpush.bf16.msra.mxu2 %v7874_v33  ;;  %v7461_v29 = vld [vmem:[%s11179_s5 + $0x548] sm:$0xf]  ;;  %v6950_v33 = vor.u32 %v9902_v25, %v6949_v22 }
  0xd5   : > { %v7327_v35 = vld [vmem:[%s11179_s5 + $0x460] sm:$0xf0]  ;;  %v10030_v30 = vld [vmem:[%s11179_s5 + $0x564] sm:$0xf0] }
  0xd6   : > { %v10057_v37 = vld [vmem:[%s11179_s5 + $0x644] sm:$0xf]  ;;  %v7330_v45 = vor.u32 %v9993_v34, %v7327_v35  ;;  %2889 = vmatpush.bf16.msra.mxu3 %v8130_v38  ;;  %v10094_v32 = vld [vmem:[%s11179_s5 + $0x764] sm:$0xf0]  ;;  %v7206_v34 = vor.u32 %v9966_v28, %v7205_v26  ;;  %v7462_v35 = vor.u32 %v10030_v30, %v7461_v29 }
  0xd7   : > { %v7583_v39 = vld [vmem:[%s11179_s5 + $0x660] sm:$0xf0]  ;;  %v9894_v38 = vld [vmem:[%s11179_s5 + $0x124] sm:$0xf0] }
  0xd8   : > { %v10121_v41 = vld [vmem:[%s11179_s5 + $0x844] sm:$0xf]  ;;  %v7586_v48 = vor.u32 %v10057_v37, %v7583_v39  ;;  %2848 = vmatpush.bf16.msra.mxu0 %v7330_v45  ;;  %v6917_v37 = vld [vmem:[%s11179_s5 + $0x108] sm:$0xf] }
  0xd9   : > { %v7839_v42 = vld [vmem:[%s11179_s5 + $0x860] sm:$0xf0]  ;;  %v7173_v39 = vld [vmem:[%s11179_s5 + $0x308] sm:$0xf] }
  0xda   : > { %v10185_v43 = vld [vmem:[%s11179_s5 + $0xa44] sm:$0xf]  ;;  %v7842_v49 = vor.u32 %v10121_v41, %v7839_v42  ;;  %2862 = vmatpush.bf16.msra.mxu1 %v7586_v48  ;;  %v7718_v41 = vor.u32 %v10094_v32, %v7717_v31  ;;  %v9958_v42 = vld [vmem:[%s11179_s5 + $0x324] sm:$0xf0] }
  0xdb   : > { %v8095_v44 = vld [vmem:[%s11179_s5 + $0xa60] sm:$0xf0]  ;;  %v7685_v45 = vld [vmem:[%s11179_s5 + $0x708] sm:$0xf]  ;;  %v7174_v48 = vor.u32 %v9958_v42, %v7173_v39  ;;  %v9914_v42 = vld [vmem:[%s11179_s5 + $0x1cc] sm:$0xf] }
  0xdc   : > { %v9985_v46 = vld [vmem:[%s11179_s5 + $0x404] sm:$0xf]  ;;  %v8098_v53 = vor.u32 %v10185_v43, %v8095_v44  ;;  %2876 = vmatpush.bf16.msra.mxu2 %v7842_v49  ;;  %v7429_v43 = vld [vmem:[%s11179_s5 + $0x508] sm:$0xf] }
  0xdd   : > { %v7295_v47 = vld [vmem:[%s11179_s5 + $0x420] sm:$0xf0]  ;;  %v10022_v44 = vld [vmem:[%s11179_s5 + $0x524] sm:$0xf0] }
  0xde   : > { %v10049_v50 = vld [vmem:[%s11179_s5 + $0x604] sm:$0xf]  ;;  %v7298_v61 = vor.u32 %v9985_v46, %v7295_v47  ;;  %2890 = vmatpush.bf16.msra.mxu3 %v8098_v53  ;;  %v10086_v46 = vld [vmem:[%s11179_s5 + $0x724] sm:$0xf0]  ;;  %v6918_v47 = vor.u32 %v9894_v38, %v6917_v37  ;;  %v7430_v49 = vor.u32 %v10022_v44, %v7429_v43  ;;  %v7015_v43 = vld [vmem:[%s11179_s5 + $0x1e8] sm:$0xf0] }
  0xdf   : > { %v7551_v51 = vld [vmem:[%s11179_s5 + $0x620] sm:$0xf0]  ;;  %v7686_v53 = vor.u32 %v10086_v46, %v7685_v45  ;;  %v10078_v59 = vld [vmem:[%s11179_s5 + $0x6e4] sm:$0xf0]  ;;  %v9978_v46 = vld [vmem:[%s11179_s5 + $0x3cc] sm:$0xf] }
  0xe0   : > { %v10113_v52 = vld [vmem:[%s11179_s5 + $0x804] sm:$0xf]  ;;  %v7554_v1 = vor.u32 %v10049_v50, %v7551_v51  ;;  %2849 = vmatpush.bf16.msra.mxu0 %v7298_v61  ;;  %v6885_v50 = vld [vmem:[%s11179_s5 + $0xc8] sm:$0xf] }
  0xe1   : > { %v7807_v54 = vld [vmem:[%s11179_s5 + $0x820] sm:$0xf0]  ;;  %v9886_v51 = vld [vmem:[%s11179_s5 + $0xe4] sm:$0xf0] }
  0xe2   : > { %v10177_v55 = vld [vmem:[%s11179_s5 + $0xa04] sm:$0xf]  ;;  %v7810_v2 = vor.u32 %v10113_v52, %v7807_v54  ;;  %2863 = vmatpush.bf16.msra.mxu1 %v7554_v1  ;;  %v7141_v52 = vld [vmem:[%s11179_s5 + $0x2c8] sm:$0xf]  ;;  %v6886_v60 = vor.u32 %v9886_v51, %v6885_v50  ;;  %v7018_v51 = vor.u32 %v9914_v42, %v7015_v43 }
  0xe3   : > { %v8063_v56 = vld [vmem:[%s11179_s5 + $0xa20] sm:$0xf0]  ;;  %2850 = vmatmul.bf16.vlgmr.msra.gmra.mxu0 %v11300_v23  ;;  %v9950_v54 = vld [vmem:[%s11179_s5 + $0x2e4] sm:$0xf0] }
  0xe4   : > { %v8066_v5 = vor.u32 %v10177_v55, %v8063_v56  ;;  %2877 = vmatpush.bf16.msra.mxu2 %v7810_v2  ;;  %2898 = vmatpush.bf16.msrb.mxu0 %v7014_v6  ;;  %v7397_v55 = vld [vmem:[%s11179_s5 + $0x4c8] sm:$0xf]  ;;  %v7142_v61 = vor.u32 %v9950_v54, %v7141_v52  ;;  %v7654_v2 = vor.u32 %v10078_v59, %v7653_v57  ;;  %v9906_v57 = vld [vmem:[%s11179_s5 + $0x18c] sm:$0xf] }
  0xe5   : > { %2864 = vmatmul.bf16.vlgmr.msra.gmra.mxu1 %v11302_v24  ;;  %v10014_v56 = vld [vmem:[%s11179_s5 + $0x4e4] sm:$0xf0]  ;;  %v6983_v59 = vld [vmem:[%s11179_s5 + $0x1a8] sm:$0xf0] }
  0xe6   : > { %2891 = vmatpush.bf16.msra.mxu3 %v8066_v5  ;;  %2912 = vmatpush.bf16.msrb.mxu1 %v7270_v8  ;;  %v7398_v62 = vor.u32 %v10014_v56, %v7397_v55  ;;  %v6853_v63 = vld [vmem:[%s11179_s5 + $0x88] sm:$0xf] }
  0xe7   : > { %2878 = vmatmul.bf16.vlgmr.msra.gmra.mxu2 %v11349_v36  ;;  %v9878_v0 = vld [vmem:[%s11179_s5 + $0xa4] sm:$0xf0] }
  0xe8   : > { %2926 = vmatpush.bf16.msrb.mxu2 %v7526_v9  ;;  %2899 = vmatpush.bf16.msrb.mxu0 %v6982_v19  ;;  %v7109_v1 = vld [vmem:[%s11179_s5 + $0x288] sm:$0xf]  ;;  %v6854_v9 = vor.u32 %v9878_v0, %v6853_v63  ;;  %v6986_v0 = vor.u32 %v9906_v57, %v6983_v59 }
  0xe9   : > { %2892 = vmatmul.bf16.vlgmr.msra.gmra.mxu3 %v11354_v40  ;;  %v9942_v3 = vld [vmem:[%s11179_s5 + $0x2a4] sm:$0xf0] }
  0xea   : > { %2940 = vmatpush.bf16.msrb.mxu3 %v7782_v13  ;;  %2913 = vmatpush.bf16.msrb.mxu1 %v7238_v20  ;;  %v7365_v4 = vld [vmem:[%s11179_s5 + $0x488] sm:$0xf]  ;;  %v7110_v10 = vor.u32 %v9942_v3, %v7109_v1 }
  0xeb   : > { %v10006_v5 = vld [vmem:[%s11179_s5 + $0x4a4] sm:$0xf0] }
  0xec   : > { %2927 = vmatpush.bf16.msrb.mxu2 %v7494_v21  ;;  %2900 = vmatpush.bf16.msrb.mxu0 %v6950_v33  ;;  %v7621_v6 = vld [vmem:[%s11179_s5 + $0x688] sm:$0xf]  ;;  %v7366_v11 = vor.u32 %v10006_v5, %v7365_v4 }
  0xed   : > { %v10070_v8 = vld [vmem:[%s11179_s5 + $0x6a4] sm:$0xf0] }
  0xee   : > { %2941 = vmatpush.bf16.msrb.mxu3 %v7750_v27  ;;  %2914 = vmatpush.bf16.msrb.mxu1 %v7206_v34  ;;  %v6821_v12 = vld [vmem:[%s11179_s5 + $0x48] sm:$0xf]  ;;  %v7622_v15 = vor.u32 %v10070_v8, %v7621_v6  ;;  %v9898_v6 = vld [vmem:[%s11179_s5 + $0x14c] sm:$0xf] }
  0xef   : > { %v9870_v13 = vld [vmem:[%s11179_s5 + $0x64] sm:$0xf0]  ;;  %v6951_v8 = vld [vmem:[%s11179_s5 + $0x168] sm:$0xf0] }
  0xf0   : > { %2928 = vmatpush.bf16.msrb.mxu2 %v7462_v35  ;;  %2901 = vmatpush.bf16.msrb.mxu0 %v6918_v47  ;;  %v7077_v14 = vld [vmem:[%s11179_s5 + $0x248] sm:$0xf]  ;;  %v6822_v21 = vor.u32 %v9870_v13, %v6821_v12  ;;  %v7271_v47 = vld [vmem:[%s11179_s5 + $0x3e8] sm:$0xf0]  ;;  %v6954_v13 = vor.u32 %v9898_v6, %v6951_v8 }
  0xf1   : > { %v9934_v16 = vld [vmem:[%s11179_s5 + $0x264] sm:$0xf0]  ;;  %v7274_v55 = vor.u32 %v9978_v46, %v7271_v47  ;;  %v9874_v47 = vld [vmem:[%s11179_s5 + $0x8c] sm:$0xf] }
  0xf2   : > { %2942 = vmatpush.bf16.msrb.mxu3 %v7718_v41  ;;  %2915 = vmatpush.bf16.msrb.mxu1 %v7174_v48  ;;  %v7333_v17 = vld [vmem:[%s11179_s5 + $0x448] sm:$0xf]  ;;  %v7078_v26 = vor.u32 %v9934_v16, %v7077_v14  ;;  %v9858_v8 = vld [vmem:[%s11179_s5 + $0xc] sm:$0xf] }
  0xf3   : > { %v9998_v18 = vld [vmem:[%s11179_s5 + $0x464] sm:$0xf0] }
  0xf4   : > { %2929 = vmatpush.bf16.msrb.mxu2 %v7430_v49  ;;  %2902 = vmatpush.bf16.msrb.mxu0 %v6886_v60  ;;  %v7589_v19 = vld [vmem:[%s11179_s5 + $0x648] sm:$0xf]  ;;  %v7334_v27 = vor.u32 %v9998_v18, %v7333_v17  ;;  %v9970_v60 = vld [vmem:[%s11179_s5 + $0x38c] sm:$0xf] }
  0xf5   : > { %v10062_v20 = vld [vmem:[%s11179_s5 + $0x664] sm:$0xf0] }
  0xf6   : > { %2943 = vmatpush.bf16.msrb.mxu3 %v7686_v53  ;;  %2916 = vmatpush.bf16.msrb.mxu1 %v7142_v61  ;;  %v6789_v22 = vld [vmem:[%s11179_s5 + $0x8] sm:$0xf]  ;;  %v7590_v31 = vor.u32 %v10062_v20, %v7589_v19  ;;  %v7239_v61 = vld [vmem:[%s11179_s5 + $0x3a8] sm:$0xf0] }
  0xf7   : > { %v9862_v25 = vld [vmem:[%s11179_s5 + $0x24] sm:$0xf0]  ;;  %v7242_v4 = vor.u32 %v9970_v60, %v7239_v61  ;;  %v9890_v19 = vld [vmem:[%s11179_s5 + $0x10c] sm:$0xf] }
  0xf8   : > { %2930 = vmatpush.bf16.msrb.mxu2 %v7398_v62  ;;  %2903 = vmatpush.bf16.msrb.mxu0 %v6854_v9  ;;  %v7045_v28 = vld [vmem:[%s11179_s5 + $0x208] sm:$0xf]  ;;  %v6790_v39 = vor.u32 %v9862_v25, %v6789_v22  ;;  %v9962_v9 = vld [vmem:[%s11179_s5 + $0x34c] sm:$0xf] }
  0xf9   : > { %v9926_v29 = vld [vmem:[%s11179_s5 + $0x224] sm:$0xf0]  ;;  %v6919_v20 = vld [vmem:[%s11179_s5 + $0x128] sm:$0xf0] }
  0xfa   : > { %2944 = vmatpush.bf16.msrb.mxu3 %v7654_v2  ;;  %2917 = vmatpush.bf16.msrb.mxu1 %v7110_v10  ;;  %v7301_v30 = vld [vmem:[%s11179_s5 + $0x408] sm:$0xf]  ;;  %v7046_v44 = vor.u32 %v9926_v29, %v7045_v28  ;;  %v7207_v10 = vld [vmem:[%s11179_s5 + $0x368] sm:$0xf0] }
  0xfb   : > { %v9990_v32 = vld [vmem:[%s11179_s5 + $0x424] sm:$0xf0]  ;;  %v7210_v17 = vor.u32 %v9962_v9, %v7207_v10  ;;  %v7175_v22 = vld [vmem:[%s11179_s5 + $0x328] sm:$0xf0] }
  0xfc   : > { %2931 = vmatpush.bf16.msrb.mxu2 %v7366_v11  ;;  %v7557_v33 = vld [vmem:[%s11179_s5 + $0x608] sm:$0xf]  ;;  %2904 = vmatpush.bf16.msrb.mxu0 %v6822_v21  ;;  %v7302_v45 = vor.u32 %v9990_v32, %v7301_v30  ;;  %v9954_v21 = vld [vmem:[%s11179_s5 + $0x30c] sm:$0xf] }
  0xfd   : > { %v10054_v34 = vld [vmem:[%s11179_s5 + $0x624] sm:$0xf0]  ;;  %v9866_v60 = vld [vmem:[%s11179_s5 + $0x4c] sm:$0xf] }
  0xfe   : > { %2945 = vmatpush.bf16.msrb.mxu3 %v7622_v15  ;;  %v8037_v35 = vld [vmem:[%s11179_s5 + $0x9c8] sm:$0xf]  ;;  %2918 = vmatpush.bf16.msrb.mxu1 %v7078_v26  ;;  %v7558_v48 = vor.u32 %v10054_v34, %v7557_v33  ;;  %v9882_v33 = vld [vmem:[%s11179_s5 + $0xcc] sm:$0xf] }
  0xff   : > { %v10174_v37 = vld [vmem:[%s11179_s5 + $0x9e4] sm:$0xf0]  ;;  %v6887_v34 = vld [vmem:[%s11179_s5 + $0xe8] sm:$0xf0] }
 0x100   : > { %v8293_v38 = vld [vmem:[%s11179_s5 + $0xbc8] sm:$0xf]  ;;  %2932 = vmatpush.bf16.msrb.mxu2 %v7334_v27  ;;  %v8038_v49 = vor.u32 %v10174_v37, %v8037_v35  ;;  %2905 = vmatpush.bf16.msrb.mxu0 %v6790_v39  ;;  %v6922_v27 = vor.u32 %v9890_v19, %v6919_v20  ;;  %v9946_v35 = vld [vmem:[%s11179_s5 + $0x2cc] sm:$0xf] }
 0x101   : > { %v10238_v41 = vld [vmem:[%s11179_s5 + $0xbe4] sm:$0xf0]  ;;  %v7143_v37 = vld [vmem:[%s11179_s5 + $0x2e8] sm:$0xf0] }
 0x102   : > { %2946 = vmatpush.bf16.msrb.mxu3 %v7590_v31  ;;  %v8294_v50 = vor.u32 %v10238_v41, %v8293_v38  ;;  %v8005_v52 = vld [vmem:[%s11179_s5 + $0x988] sm:$0xf]  ;;  %2919 = vmatpush.bf16.msrb.mxu1 %v7046_v44  ;;  %v7178_v31 = vor.u32 %v9954_v21, %v7175_v22  ;;  %v6890_v41 = vor.u32 %v9882_v33, %v6887_v34  ;;  %v6823_v61 = vld [vmem:[%s11179_s5 + $0x68] sm:$0xf0] }
 0x103   : > { %v10166_v53 = vld [vmem:[%s11179_s5 + $0x9a4] sm:$0xf0]  ;;  %2906 = vmatmul.bf16.vlgmr.msrb.gmra.mxu0 %v11280_v58  ;;  %v6791_v10 = vld [vmem:[%s11179_s5 + $0x28] sm:$0xf0] }
 0x104   : > { %v8261_v54 = vld [vmem:[%s11179_s5 + $0xb88] sm:$0xf]  ;;  %2933 = vmatpush.bf16.msrb.mxu2 %v7302_v45  ;;  %2954 = vmatpush.bf16.msra.mxu0 %v8038_v49  ;;  %v8006_v62 = vor.u32 %v10166_v53, %v8005_v52  ;;  %v7146_v45 = vor.u32 %v9946_v35, %v7143_v37  ;;  %v9938_v49 = vld [vmem:[%s11179_s5 + $0x28c] sm:$0xf]  ;;  %v6794_v21 = vor.u32 %v9858_v8, %v6791_v10 }
 0x105   : > { %v10230_v56 = vld [vmem:[%s11179_s5 + $0xba4] sm:$0xf0]  ;;  %2920 = vmatmul.bf16.vlgmr.msrb.gmra.mxu1 %v11290_v7  ;;  %v8039_v19 = vld [vmem:[%s11179_s5 + $0x9e8] sm:$0xf0] }
 0x106   : > { %2947 = vmatpush.bf16.msrb.mxu3 %v7558_v48  ;;  %2968 = vmatpush.bf16.msra.mxu1 %v8294_v50  ;;  %v8262_v63 = vor.u32 %v10230_v56, %v8261_v54  ;;  %v7973_v1 = vld [vmem:[%s11179_s5 + $0x948] sm:$0xf]  ;;  %v6855_v48 = vld [vmem:[%s11179_s5 + $0xa8] sm:$0xf0] }
 0x107   : > { %v10158_v2 = vld [vmem:[%s11179_s5 + $0x964] sm:$0xf0]  ;;  %2934 = vmatmul.bf16.vlgmr.msrb.gmra.mxu2 %v11300_v23  ;;  %v7111_v50 = vld [vmem:[%s11179_s5 + $0x2a8] sm:$0xf0]  ;;  %v6858_v53 = vor.u32 %v9874_v47, %v6855_v48 }
 0x108   : > { %2982 = vmatpush.bf16.msra.mxu2 %v7018_v51  ;;  %v8229_v3 = vld [vmem:[%s11179_s5 + $0xb48] sm:$0xf]  ;;  %2955 = vmatpush.bf16.msra.mxu0 %v8006_v62  ;;  %v7974_v11 = vor.u32 %v10158_v2, %v7973_v1  ;;  %v7114_v57 = vor.u32 %v9938_v49, %v7111_v50  ;;  %v9930_v62 = vld [vmem:[%s11179_s5 + $0x24c] sm:$0xf] }
 0x109   : > { %v10222_v5 = vld [vmem:[%s11179_s5 + $0xb64] sm:$0xf0]  ;;  %2948 = vmatmul.bf16.vlgmr.msrb.gmra.mxu3 %v11302_v24  ;;  %v10234_v22 = vld [vmem:[%s11179_s5 + $0xbcc] sm:$0xf] }
 0x10a   : > { %2996 = vmatpush.bf16.msra.mxu3 %v7274_v55  ;;  %2969 = vmatpush.bf16.msra.mxu1 %v8262_v63  ;;  %v8230_v12 = vor.u32 %v10222_v5, %v8229_v3  ;;  %v7941_v14 = vld [vmem:[%s11179_s5 + $0x908] sm:$0xf]  ;;  %v7079_v63 = vld [vmem:[%s11179_s5 + $0x268] sm:$0xf0] }
 0x10b   : > { %v10150_v15 = vld [vmem:[%s11179_s5 + $0x924] sm:$0xf0]  ;;  %v7082_v9 = vor.u32 %v9930_v62, %v7079_v63  ;;  %v7751_v34 = vld [vmem:[%s11179_s5 + $0x7a8] sm:$0xf0] }
 0x10c   : > { %2983 = vmatpush.bf16.msra.mxu2 %v6986_v0  ;;  %v8197_v16 = vld [vmem:[%s11179_s5 + $0xb08] sm:$0xf]  ;;  %2956 = vmatpush.bf16.msra.mxu0 %v7974_v11  ;;  %v7942_v25 = vor.u32 %v10150_v15, %v7941_v14  ;;  %v9922_v11 = vld [vmem:[%s11179_s5 + $0x20c] sm:$0xf] }
 0x10d   : > { %v10214_v18 = vld [vmem:[%s11179_s5 + $0xb24] sm:$0xf0]  ;;  %v7527_v14 = vld [vmem:[%s11179_s5 + $0x5e8] sm:$0xf0] }
 0x10e   : > { %2997 = vmatpush.bf16.msra.mxu3 %v7242_v4  ;;  %2970 = vmatpush.bf16.msra.mxu1 %v8230_v12  ;;  %v8198_v26 = vor.u32 %v10214_v18, %v8197_v16  ;;  %v7909_v28 = vld [vmem:[%s11179_s5 + $0x8c8] sm:$0xf]  ;;  %v6826_v4 = vor.u32 %v9866_v60, %v6823_v61  ;;  %v7047_v12 = vld [vmem:[%s11179_s5 + $0x228] sm:$0xf0] }
 0x10f   : > { %v10142_v29 = vld [vmem:[%s11179_s5 + $0x8e4] sm:$0xf0]  ;;  %v10106_v15 = vld [vmem:[%s11179_s5 + $0x7cc] sm:$0xf] }
 0x110   : > { %2984 = vmatpush.bf16.msra.mxu2 %v6954_v13  ;;  %v8165_v30 = vld [vmem:[%s11179_s5 + $0xac8] sm:$0xf]  ;;  %2957 = vmatpush.bf16.msra.mxu0 %v7942_v25  ;;  %v7910_v38 = vor.u32 %v10142_v29, %v7909_v28  ;;  %v10042_v13 = vld [vmem:[%s11179_s5 + $0x5cc] sm:$0xf] }
 0x111   : > { %v10206_v32 = vld [vmem:[%s11179_s5 + $0xae4] sm:$0xf0]  ;;  %v10170_v18 = vld [vmem:[%s11179_s5 + $0x9cc] sm:$0xf] }
 0x112   : > { %2998 = vmatpush.bf16.msra.mxu3 %v7210_v17  ;;  %2971 = vmatpush.bf16.msra.mxu1 %v8198_v26  ;;  %v8166_v39 = vor.u32 %v10206_v32, %v8165_v30  ;;  %v7877_v42 = vld [vmem:[%s11179_s5 + $0x888] sm:$0xf]  ;;  %v7783_v17 = vld [vmem:[%s11179_s5 + $0x7e8] sm:$0xf0]  ;;  %v7050_v26 = vor.u32 %v9922_v11, %v7047_v12  ;;  %v8042_v29 = vor.u32 %v10170_v18, %v8039_v19  ;;  %v2753_v19 = vpop.f32.mrf.mxu1 }
 0x113   : > { %v10134_v43 = vld [vmem:[%s11179_s5 + $0x8a4] sm:$0xf0]  ;;  %v8295_v25 = vld [vmem:[%s11179_s5 + $0xbe8] sm:$0xf0]  ;;  %v7786_v28 = vor.u32 %v10106_v15, %v7783_v17 }
 0x114   : > { %2985 = vmatpush.bf16.msra.mxu2 %v6922_v27  ;;  %v8133_v44 = vld [vmem:[%s11179_s5 + $0xa88] sm:$0xf]  ;;  %2958 = vmatpush.bf16.msra.mxu0 %v7910_v38  ;;  %v7878_v51 = vor.u32 %v10134_v43, %v7877_v42  ;;  %v7530_v27 = vor.u32 %v10042_v13, %v7527_v14  ;;  %v10034_v30 = vld [vmem:[%s11179_s5 + $0x58c] sm:$0xf]  ;;  %v8298_v33 = vor.u32 %v10234_v22, %v8295_v25 }
 0x115   : > { %v10198_v46 = vld [vmem:[%s11179_s5 + $0xaa4] sm:$0xf0]  ;;  %v10098_v32 = vld [vmem:[%s11179_s5 + $0x78c] sm:$0xf] }
 0x116   : > { %2999 = vmatpush.bf16.msra.mxu3 %v7178_v31  ;;  %2972 = vmatpush.bf16.msra.mxu1 %v8166_v39  ;;  %v8134_v52 = vor.u32 %v10198_v46, %v8133_v44  ;;  %v7845_v54 = vld [vmem:[%s11179_s5 + $0x848] sm:$0xf]  ;;  %v7495_v31 = vld [vmem:[%s11179_s5 + $0x5a8] sm:$0xf0]  ;;  %v7754_v43 = vor.u32 %v10098_v32, %v7751_v34 }
 0x117   : > { %v10126_v55 = vld [vmem:[%s11179_s5 + $0x864] sm:$0xf0]  ;;  %v10162_v35 = vld [vmem:[%s11179_s5 + $0x98c] sm:$0xf] }
 0x118   : > { %2986 = vmatpush.bf16.msra.mxu2 %v6890_v41  ;;  %v8101_v56 = vld [vmem:[%s11179_s5 + $0xa48] sm:$0xf]  ;;  %2959 = vmatpush.bf16.msra.mxu0 %v7878_v51  ;;  %v7846_v0 = vor.u32 %v10126_v55, %v7845_v54  ;;  %v8007_v37 = vld [vmem:[%s11179_s5 + $0x9a8] sm:$0xf0]  ;;  %v7498_v41 = vor.u32 %v10034_v30, %v7495_v31 }
 0x119   : > { %v10190_v59 = vld [vmem:[%s11179_s5 + $0xa64] sm:$0xf0]  ;;  %v10226_v38 = vld [vmem:[%s11179_s5 + $0xb8c] sm:$0xf]  ;;  %v8010_v44 = vor.u32 %v10162_v35, %v8007_v37 }
 0x11a   : > { %3000 = vmatpush.bf16.msra.mxu3 %v7146_v45  ;;  %v7813_v1 = vld [vmem:[%s11179_s5 + $0x808] sm:$0xf]  ;;  %2973 = vmatpush.bf16.msra.mxu1 %v8134_v52  ;;  %v8102_v3 = vor.u32 %v10190_v59, %v8101_v56  ;;  %v8263_v39 = vld [vmem:[%s11179_s5 + $0xba8] sm:$0xf0] }
 0x11b   : > { %v10118_v2 = vld [vmem:[%s11179_s5 + $0x824] sm:$0xf0]  ;;  %v10026_v42 = vld [vmem:[%s11179_s5 + $0x54c] sm:$0xf]  ;;  %v8266_v48 = vor.u32 %v10226_v38, %v8263_v39 }
 0x11c   : > { %2987 = vmatpush.bf16.msra.mxu2 %v6858_v53  ;;  %v8069_v5 = vld [vmem:[%s11179_s5 + $0xa08] sm:$0xf]  ;;  %2960 = vmatpush.bf16.msra.mxu0 %v7846_v0  ;;  %v7814_v16 = vor.u32 %v10118_v2, %v7813_v1  ;;  %v7463_v45 = vld [vmem:[%s11179_s5 + $0x568] sm:$0xf0] }
 0x11d   : > { %v10182_v6 = vld [vmem:[%s11179_s5 + $0xa24] sm:$0xf0]  ;;  %v10090_v46 = vld [vmem:[%s11179_s5 + $0x74c] sm:$0xf]  ;;  %v7466_v54 = vor.u32 %v10026_v42, %v7463_v45 }
 0x11e   : > { %3001 = vmatpush.bf16.msra.mxu3 %v7114_v57  ;;  %2974 = vmatpush.bf16.msra.mxu1 %v8102_v3  ;;  %v8070_v20 = vor.u32 %v10182_v6, %v8069_v5  ;;  %v11566_v47 = vld [vmem:[%s11185_s10] sm:$0xff] }
 0x11f   : > { %v7719_v49 = vld [vmem:[%s11179_s5 + $0x768] sm:$0xf0]  ;;  %v794_v55 = vperm.slane %v11566_v47, 0  ;;  %v7349_v47 = vld [vmem:[%s11179_s5 + $0x458] sm:$0xf] }
 0x120   : > { %2988 = vmatpush.bf16.msra.mxu2 %v6826_v4  ;;  %2961 = vmatpush.bf16.msra.mxu0 %v7814_v16  ;;  %v10154_v50 = vld [vmem:[%s11179_s5 + $0x94c] sm:$0xf]  ;;  %v7722_v56 = vor.u32 %v10090_v46, %v7719_v49  ;;  %v2739_v4 = vpop.f32.mrf.mxu0 }
 0x121   : > { %v7975_v51 = vld [vmem:[%s11179_s5 + $0x968] sm:$0xf0]  ;;  %v2740_v6 = vadd.f32 %v2739_v4, %v794_v55  ;;  %v9919_v4 = vld [vmem:[%s11179_s5 + $0x1ec] sm:$0xf0] }
 0x122   : > { %3002 = vmatpush.bf16.msra.mxu3 %v7082_v9  ;;  %2975 = vmatpush.bf16.msra.mxu1 %v8070_v20  ;;  %v10218_v52 = vld [vmem:[%s11179_s5 + $0xb4c] sm:$0xf]  ;;  %v7978_v57 = vor.u32 %v10154_v50, %v7975_v51 }
 0x123   : > { %2962 = vmatmul.bf16.vlgmr.msra.gmra.mxu0 %v11349_v36  ;;  %v8231_v53 = vld [vmem:[%s11179_s5 + $0xb68] sm:$0xf0] }
 0x124   : > { %2989 = vmatpush.bf16.msra.mxu2 %v6794_v21  ;;  %3010 = vmatpush.bf16.msrb.mxu0 %v7530_v27  ;;  %v10018_v59 = vld [vmem:[%s11179_s5 + $0x50c] sm:$0xf]  ;;  %v8234_v62 = vor.u32 %v10218_v52, %v8231_v53  ;;  %v2754_v21 = vadd.f32 %v2753_v19, %v2740_v6 }
 0x125   : > { %2976 = vmatmul.bf16.vlgmr.msra.gmra.mxu1 %v11354_v40  ;;  %v7431_v60 = vld [vmem:[%s11179_s5 + $0x528] sm:$0xf0] }
 0x126   : > { %3003 = vmatpush.bf16.msra.mxu3 %v7050_v26  ;;  %3024 = vmatpush.bf16.msrb.mxu1 %v7786_v28  ;;  %v10082_v61 = vld [vmem:[%s11179_s5 + $0x70c] sm:$0xf]  ;;  %v7434_v5 = vor.u32 %v10018_v59, %v7431_v60 }
 0x127   : > { %2990 = vmatmul.bf16.vlgmr.msra.gmra.mxu2 %v11280_v58  ;;  %v7687_v63 = vld [vmem:[%s11179_s5 + $0x728] sm:$0xf0] }
 0x128   : > { %3038 = vmatpush.bf16.msrb.mxu2 %v8042_v29  ;;  %3011 = vmatpush.bf16.msrb.mxu0 %v7498_v41  ;;  %v10146_v0 = vld [vmem:[%s11179_s5 + $0x90c] sm:$0xf]  ;;  %v7690_v8 = vor.u32 %v10082_v61, %v7687_v63 }
 0x129   : > { %3004 = vmatmul.bf16.vlgmr.msra.gmra.mxu3 %v11290_v7  ;;  %v7943_v1 = vld [vmem:[%s11179_s5 + $0x928] sm:$0xf0]  ;;  %v2767_v60 = vpop.f32.mrf.mxu2 }
 0x12a   : > { %3052 = vmatpush.bf16.msrb.mxu3 %v8298_v33  ;;  %3025 = vmatpush.bf16.msrb.mxu1 %v7754_v43  ;;  %v10210_v2 = vld [vmem:[%s11179_s5 + $0xb0c] sm:$0xf]  ;;  %v7946_v9 = vor.u32 %v10146_v0, %v7943_v1  ;;  %v2768_v1 = vadd.f32 %v2767_v60, %v2754_v21  ;;  %v6989_v21 = vld [vmem:[%s11179_s5 + $0x190] sm:$0xf] }
 0x12b   : > { %v8199_v3 = vld [vmem:[%s11179_s5 + $0xb28] sm:$0xf0] }
 0x12c   : > { %3039 = vmatpush.bf16.msrb.mxu2 %v8010_v44  ;;  %3012 = vmatpush.bf16.msrb.mxu0 %v7466_v54  ;;  %v10010_v10 = vld [vmem:[%s11179_s5 + $0x4cc] sm:$0xf]  ;;  %v8202_v13 = vor.u32 %v10210_v2, %v8199_v3  ;;  %v2781_v2 = vpop.f32.mrf.mxu3  ;;  %v7021_v3 = vld [vmem:[%s11179_s5 + $0x1d0] sm:$0xf] }
 0x12d   : > { %v7399_v11 = vld [vmem:[%s11179_s5 + $0x4e8] sm:$0xf0] }
 0x12e   : > { %3053 = vmatpush.bf16.msrb.mxu3 %v8266_v48  ;;  %3026 = vmatpush.bf16.msrb.mxu1 %v7722_v56  ;;  %v10074_v12 = vld [vmem:[%s11179_s5 + $0x6cc] sm:$0xf]  ;;  %v7402_v20 = vor.u32 %v10010_v10, %v7399_v11  ;;  %v10047_v10 = vld [vmem:[%s11179_s5 + $0x5ec] sm:$0xf0]  ;;  %v11626_v11 = vadd.f32 %v2781_v2, %v2768_v1 }
 0x12f   : > { %v7655_v14 = vld [vmem:[%s11179_s5 + $0x6e8] sm:$0xf0] }
 0x130   : > { %3040 = vmatpush.bf16.msrb.mxu2 %v7978_v57  ;;  %v10138_v15 = vld [vmem:[%s11179_s5 + $0x8cc] sm:$0xf]  ;;  %3013 = vmatpush.bf16.msrb.mxu0 %v7434_v5  ;;  %v7658_v22 = vor.u32 %v10074_v12, %v7655_v14  ;;  %v7277_v5 = vld [vmem:[%s11179_s5 + $0x3d0] sm:$0xf] }
 0x131   : > { %v7911_v16 = vld [vmem:[%s11179_s5 + $0x8e8] sm:$0xf0]  ;;  %v7789_v14 = vld [vmem:[%s11179_s5 + $0x7d0] sm:$0xf] }
 0x132   : > { %3054 = vmatpush.bf16.msrb.mxu3 %v8234_v62  ;;  %v10202_v17 = vld [vmem:[%s11179_s5 + $0xacc] sm:$0xf]  ;;  %3027 = vmatpush.bf16.msrb.mxu1 %v7690_v8  ;;  %v7914_v25 = vor.u32 %v10138_v15, %v7911_v16  ;;  %v9983_v8 = vld [vmem:[%s11179_s5 + $0x3ec] sm:$0xf0] }
 0x133   : > { %v8167_v18 = vld [vmem:[%s11179_s5 + $0xae8] sm:$0xf0]  ;;  %v10111_v15 = vld [vmem:[%s11179_s5 + $0x7ec] sm:$0xf0] }
 0x134   : > { %3041 = vmatpush.bf16.msrb.mxu2 %v7946_v9  ;;  %v10002_v26 = vld [vmem:[%s11179_s5 + $0x48c] sm:$0xf]  ;;  %v8170_v29 = vor.u32 %v10202_v17, %v8167_v18  ;;  %3014 = vmatpush.bf16.msrb.mxu0 %v7402_v20  ;;  %v7533_v9 = vld [vmem:[%s11179_s5 + $0x5d0] sm:$0xf]  ;;  %v7022_v17 = vor.u32 %v9919_v4, %v7021_v3  ;;  %v7278_v18 = vor.u32 %v9983_v8, %v7277_v5  ;;  %v11630_v20 = vpop.f32.mrf.mxu0 }
 0x135   : > { %v7367_v27 = vld [vmem:[%s11179_s5 + $0x4a8] sm:$0xf0]  ;;  %v7534_v19 = vor.u32 %v10047_v10, %v7533_v9  ;;  %v6893_v4 = vld [vmem:[%s11179_s5 + $0xd0] sm:$0xf] }
 0x136   : > { %v10066_v28 = vld [vmem:[%s11179_s5 + $0x68c] sm:$0xf]  ;;  %3055 = vmatpush.bf16.msrb.mxu3 %v8202_v13  ;;  %v7370_v35 = vor.u32 %v10002_v26, %v7367_v27  ;;  %3028 = vmatpush.bf16.msrb.mxu1 %v7658_v22  ;;  %v9911_v22 = vld [vmem:[%s11179_s5 + $0x1ac] sm:$0xf0]  ;;  %v7790_v26 = vor.u32 %v10111_v15, %v7789_v14 }
 0x137   : > { %v7623_v30 = vld [vmem:[%s11179_s5 + $0x6a8] sm:$0xf0]  ;;  %v9975_v27 = vld [vmem:[%s11179_s5 + $0x3ac] sm:$0xf0] }
 0x138   : > { %v10130_v31 = vld [vmem:[%s11179_s5 + $0x88c] sm:$0xf]  ;;  %3042 = vmatpush.bf16.msrb.mxu2 %v7914_v25  ;;  %v7626_v37 = vor.u32 %v10066_v28, %v7623_v30  ;;  %3015 = vmatpush.bf16.msrb.mxu0 %v7370_v35  ;;  %v7245_v25 = vld [vmem:[%s11179_s5 + $0x390] sm:$0xf]  ;;  %v11638_v30 = vpop.f32.mrf.mxu1 }
 0x139   : > { %v7879_v32 = vld [vmem:[%s11179_s5 + $0x8a8] sm:$0xf0]  ;;  %v7501_v28 = vld [vmem:[%s11179_s5 + $0x590] sm:$0xf] }
 0x13a   : > { %v10194_v33 = vld [vmem:[%s11179_s5 + $0xa8c] sm:$0xf]  ;;  %v7882_v38 = vor.u32 %v10130_v31, %v7879_v32  ;;  %3056 = vmatpush.bf16.msrb.mxu3 %v8170_v29  ;;  %3029 = vmatpush.bf16.msrb.mxu1 %v7626_v37  ;;  %v10039_v29 = vld [vmem:[%s11179_s5 + $0x5ac] sm:$0xf0] }
 0x13b   : > { %v8135_v34 = vld [vmem:[%s11179_s5 + $0xaa8] sm:$0xf0]  ;;  %v7757_v31 = vld [vmem:[%s11179_s5 + $0x790] sm:$0xf]  ;;  %v7502_v35 = vor.u32 %v10039_v29, %v7501_v28 }
 0x13c   : > { %v9994_v39 = vld [vmem:[%s11179_s5 + $0x44c] sm:$0xf]  ;;  %v8138_v43 = vor.u32 %v10194_v33, %v8135_v34  ;;  %3043 = vmatpush.bf16.msrb.mxu2 %v7882_v38  ;;  %v10103_v32 = vld [vmem:[%s11179_s5 + $0x7ac] sm:$0xf0]  ;;  %v6990_v33 = vor.u32 %v9911_v22, %v6989_v21  ;;  %v7246_v34 = vor.u32 %v9975_v27, %v7245_v25  ;;  %v2795_v60 = vpop.f32.mrf.mxu0 }
 0x13d   : > { %v7335_v41 = vld [vmem:[%s11179_s5 + $0x468] sm:$0xf0]  ;;  %v6957_v37 = vld [vmem:[%s11179_s5 + $0x150] sm:$0xf] }
 0x13e   : > { %v10058_v42 = vld [vmem:[%s11179_s5 + $0x64c] sm:$0xf]  ;;  %v7338_v50 = vor.u32 %v9994_v39, %v7335_v41  ;;  %3057 = vmatpush.bf16.msrb.mxu3 %v8138_v43  ;;  %v9903_v38 = vld [vmem:[%s11179_s5 + $0x16c] sm:$0xf0]  ;;  %v7758_v41 = vor.u32 %v10103_v32, %v7757_v31 }
 0x13f   : > { %v7591_v44 = vld [vmem:[%s11179_s5 + $0x668] sm:$0xf0]  ;;  %v7213_v39 = vld [vmem:[%s11179_s5 + $0x350] sm:$0xf] }
 0x140   : > { %v10122_v45 = vld [vmem:[%s11179_s5 + $0x84c] sm:$0xf]  ;;  %v7594_v53 = vor.u32 %v10058_v42, %v7591_v44  ;;  %3016 = vmatpush.bf16.msrb.mxu0 %v7338_v50  ;;  %v9967_v42 = vld [vmem:[%s11179_s5 + $0x36c] sm:$0xf0]  ;;  %v2809_v1 = vpop.f32.mrf.mxu1 }
 0x141   : > { %v7847_v46 = vld [vmem:[%s11179_s5 + $0x868] sm:$0xf0]  ;;  %v7469_v43 = vld [vmem:[%s11179_s5 + $0x550] sm:$0xf] }
 0x142   : > { %v10186_v48 = vld [vmem:[%s11179_s5 + $0xa4c] sm:$0xf]  ;;  %v7850_v54 = vor.u32 %v10122_v45, %v7847_v46  ;;  %3030 = vmatpush.bf16.msrb.mxu1 %v7594_v53  ;;  %v10031_v44 = vld [vmem:[%s11179_s5 + $0x56c] sm:$0xf0] }
 0x143   : > { %v8103_v49 = vld [vmem:[%s11179_s5 + $0xa68] sm:$0xf0]  ;;  %v7725_v45 = vld [vmem:[%s11179_s5 + $0x750] sm:$0xf]  ;;  %v7470_v50 = vor.u32 %v10031_v44, %v7469_v43 }
 0x144   : > { %v9986_v51 = vld [vmem:[%s11179_s5 + $0x40c] sm:$0xf]  ;;  %v8106_v61 = vor.u32 %v10186_v48, %v8103_v49  ;;  %3044 = vmatpush.bf16.msrb.mxu2 %v7850_v54  ;;  %v10095_v46 = vld [vmem:[%s11179_s5 + $0x76c] sm:$0xf0]  ;;  %v6958_v48 = vor.u32 %v9903_v38, %v6957_v37  ;;  %v7214_v49 = vor.u32 %v9967_v42, %v7213_v39 }
 0x145   : > { %v7303_v52 = vld [vmem:[%s11179_s5 + $0x428] sm:$0xf0]  ;;  %v7181_v53 = vld [vmem:[%s11179_s5 + $0x310] sm:$0xf]  ;;  %v7726_v54 = vor.u32 %v10095_v46, %v7725_v45 }
 0x146   : > { %v10050_v56 = vld [vmem:[%s11179_s5 + $0x60c] sm:$0xf]  ;;  %v7306_v6 = vor.u32 %v9986_v51, %v7303_v52  ;;  %3058 = vmatpush.bf16.msrb.mxu3 %v8106_v61  ;;  %v6925_v51 = vld [vmem:[%s11179_s5 + $0x110] sm:$0xf] }
 0x147   : > { %v7559_v57 = vld [vmem:[%s11179_s5 + $0x628] sm:$0xf0]  ;;  %v9895_v52 = vld [vmem:[%s11179_s5 + $0x12c] sm:$0xf0] }
 0x148   : > { %v10114_v59 = vld [vmem:[%s11179_s5 + $0x80c] sm:$0xf]  ;;  %v7562_v12 = vor.u32 %v10050_v56, %v7559_v57  ;;  %3017 = vmatpush.bf16.msrb.mxu0 %v7306_v6  ;;  %v9959_v56 = vld [vmem:[%s11179_s5 + $0x32c] sm:$0xf0] }
 0x149   : > { %v7815_v62 = vld [vmem:[%s11179_s5 + $0x828] sm:$0xf0]  ;;  %v7437_v57 = vld [vmem:[%s11179_s5 + $0x510] sm:$0xf]  ;;  %v7182_v2 = vor.u32 %v9959_v56, %v7181_v53 }
 0x14a   : > { %v10178_v63 = vld [vmem:[%s11179_s5 + $0xa0c] sm:$0xf]  ;;  %v7818_v13 = vor.u32 %v10114_v59, %v7815_v62  ;;  %3031 = vmatpush.bf16.msrb.mxu1 %v7562_v12  ;;  %v10023_v59 = vld [vmem:[%s11179_s5 + $0x52c] sm:$0xf0] }
 0x14b   : > { %v8071_v0 = vld [vmem:[%s11179_s5 + $0xa28] sm:$0xf0]  ;;  %3018 = vmatmul.bf16.vlgmr.msrb.gmra.mxu0 %v11300_v23  ;;  %v7693_v61 = vld [vmem:[%s11179_s5 + $0x710] sm:$0xf]  ;;  %v7438_v3 = vor.u32 %v10023_v59, %v7437_v57 }
 0x14c   : > { %v8074_v16 = vor.u32 %v10178_v63, %v8071_v0  ;;  %3045 = vmatpush.bf16.msrb.mxu2 %v7818_v13  ;;  %3066 = vmatpush.bf16.msra.mxu0 %v7022_v17  ;;  %v10087_v62 = vld [vmem:[%s11179_s5 + $0x72c] sm:$0xf0]  ;;  %v2796_v63 = vadd.f32 %v2795_v60, %v11626_v11  ;;  %v6926_v0 = vor.u32 %v9895_v52, %v6925_v51 }
 0x14d   : > { %3032 = vmatmul.bf16.vlgmr.msrb.gmra.mxu1 %v11302_v24  ;;  %v9887_v5 = vld [vmem:[%s11179_s5 + $0xec] sm:$0xf0]  ;;  %v7694_v8 = vor.u32 %v10087_v62, %v7693_v61 }
 0x14e   : > { %3059 = vmatpush.bf16.msrb.mxu3 %v8074_v16  ;;  %3080 = vmatpush.bf16.msra.mxu1 %v7278_v18  ;;  %v7149_v6 = vld [vmem:[%s11179_s5 + $0x2d0] sm:$0xf]  ;;  %v11666_v9 = vadd.f32 %v2809_v1, %v2796_v63  ;;  %v6894_v15 = vor.u32 %v9887_v5, %v6893_v4  ;;  %v9915_v1 = vld [vmem:[%s11179_s5 + $0x1d4] sm:$0xf] }
 0x14f   : > { %3046 = vmatmul.bf16.vlgmr.msrb.gmra.mxu2 %v11349_v36  ;;  %v9951_v10 = vld [vmem:[%s11179_s5 + $0x2ec] sm:$0xf0]  ;;  %v9979_v5 = vld [vmem:[%s11179_s5 + $0x3d4] sm:$0xf] }
 0x150   : > { %3094 = vmatpush.bf16.msra.mxu2 %v7534_v19  ;;  %3067 = vmatpush.bf16.msra.mxu0 %v6990_v33  ;;  %v7405_v11 = vld [vmem:[%s11179_s5 + $0x4d0] sm:$0xf]  ;;  %v7150_v16 = vor.u32 %v9951_v10, %v7149_v6  ;;  %v7279_v6 = vld [vmem:[%s11179_s5 + $0x3f0] sm:$0xf0] }
 0x151   : > { %3060 = vmatmul.bf16.vlgmr.msrb.gmra.mxu3 %v11354_v40  ;;  %v10015_v12 = vld [vmem:[%s11179_s5 + $0x4ec] sm:$0xf0] }
 0x152   : > { %3108 = vmatpush.bf16.msra.mxu3 %v7790_v26  ;;  %3081 = vmatpush.bf16.msra.mxu1 %v7246_v34  ;;  %v7661_v13 = vld [vmem:[%s11179_s5 + $0x6d0] sm:$0xf]  ;;  %v7406_v17 = vor.u32 %v10015_v12, %v7405_v11 }
 0x153   : > { %v10079_v14 = vld [vmem:[%s11179_s5 + $0x6ec] sm:$0xf0] }
 0x154   : > { %3095 = vmatpush.bf16.msra.mxu2 %v7502_v35  ;;  %3068 = vmatpush.bf16.msra.mxu0 %v6958_v48  ;;  %v6861_v18 = vld [vmem:[%s11179_s5 + $0x90] sm:$0xf]  ;;  %v7662_v22 = vor.u32 %v10079_v14, %v7661_v13 }
 0x155   : > { %v9879_v19 = vld [vmem:[%s11179_s5 + $0xac] sm:$0xf0] }
 0x156   : > { %3109 = vmatpush.bf16.msra.mxu3 %v7758_v41  ;;  %3082 = vmatpush.bf16.msra.mxu1 %v7214_v49  ;;  %v7117_v21 = vld [vmem:[%s11179_s5 + $0x290] sm:$0xf]  ;;  %v6862_v31 = vor.u32 %v9879_v19, %v6861_v18  ;;  %v9907_v18 = vld [vmem:[%s11179_s5 + $0x194] sm:$0xf] }
 0x157   : > { %v9943_v25 = vld [vmem:[%s11179_s5 + $0x2ac] sm:$0xf0]  ;;  %v6991_v19 = vld [vmem:[%s11179_s5 + $0x1b0] sm:$0xf0] }
 0x158   : > { %3096 = vmatpush.bf16.msra.mxu2 %v7470_v50  ;;  %3069 = vmatpush.bf16.msra.mxu0 %v6926_v0  ;;  %v7373_v26 = vld [vmem:[%s11179_s5 + $0x490] sm:$0xf]  ;;  %v7118_v32 = vor.u32 %v9943_v25, %v7117_v21  ;;  %v9971_v21 = vld [vmem:[%s11179_s5 + $0x394] sm:$0xf] }
 0x159   : > { %v10007_v27 = vld [vmem:[%s11179_s5 + $0x4ac] sm:$0xf0] }
 0x15a   : > { %3110 = vmatpush.bf16.msra.mxu3 %v7726_v54  ;;  %3083 = vmatpush.bf16.msra.mxu1 %v7182_v2  ;;  %v7629_v28 = vld [vmem:[%s11179_s5 + $0x690] sm:$0xf]  ;;  %v7374_v33 = vor.u32 %v10007_v27, %v7373_v26  ;;  %v7023_v2 = vld [vmem:[%s11179_s5 + $0x1f0] sm:$0xf0]  ;;  %v6994_v27 = vor.u32 %v9907_v18, %v6991_v19 }
 0x15b   : > { %v10071_v29 = vld [vmem:[%s11179_s5 + $0x6ac] sm:$0xf0]  ;;  %v7026_v12 = vor.u32 %v9915_v1, %v7023_v2  ;;  %v9947_v1 = vld [vmem:[%s11179_s5 + $0x2d4] sm:$0xf] }
 0x15c   : > { %3097 = vmatpush.bf16.msra.mxu2 %v7438_v3  ;;  %3070 = vmatpush.bf16.msra.mxu0 %v6894_v15  ;;  %v6829_v34 = vld [vmem:[%s11179_s5 + $0x50] sm:$0xf]  ;;  %v7630_v38 = vor.u32 %v10071_v29, %v7629_v28  ;;  %v7151_v2 = vld [vmem:[%s11179_s5 + $0x2f0] sm:$0xf0] }
 0x15d   : > { %v9871_v35 = vld [vmem:[%s11179_s5 + $0x6c] sm:$0xf0] }
 0x15e   : > { %3111 = vmatpush.bf16.msra.mxu3 %v7694_v8  ;;  %3084 = vmatpush.bf16.msra.mxu1 %v7150_v16  ;;  %v7085_v37 = vld [vmem:[%s11179_s5 + $0x250] sm:$0xf]  ;;  %v6830_v45 = vor.u32 %v9871_v35, %v6829_v34  ;;  %v7282_v16 = vor.u32 %v9979_v5, %v7279_v6  ;;  %v9899_v34 = vld [vmem:[%s11179_s5 + $0x154] sm:$0xf] }
 0x15f   : > { %v9935_v39 = vld [vmem:[%s11179_s5 + $0x26c] sm:$0xf0]  ;;  %v6959_v35 = vld [vmem:[%s11179_s5 + $0x170] sm:$0xf0] }
 0x160   : > { %3098 = vmatpush.bf16.msra.mxu2 %v7406_v17  ;;  %v7341_v41 = vld [vmem:[%s11179_s5 + $0x450] sm:$0xf]  ;;  %3071 = vmatpush.bf16.msra.mxu0 %v6862_v31  ;;  %v7086_v49 = vor.u32 %v9935_v39, %v7085_v37  ;;  %v9963_v37 = vld [vmem:[%s11179_s5 + $0x354] sm:$0xf] }
 0x161   : > { %v9999_v42 = vld [vmem:[%s11179_s5 + $0x46c] sm:$0xf0] }
 0x162   : > { %3112 = vmatpush.bf16.msra.mxu3 %v7662_v22  ;;  %v7597_v43 = vld [vmem:[%s11179_s5 + $0x650] sm:$0xf]  ;;  %3085 = vmatpush.bf16.msra.mxu1 %v7118_v32  ;;  %v7342_v50 = vor.u32 %v9999_v42, %v7341_v41  ;;  %v7247_v22 = vld [vmem:[%s11179_s5 + $0x3b0] sm:$0xf0]  ;;  %v6962_v42 = vor.u32 %v9899_v34, %v6959_v35 }
 0x163   : > { %v10063_v44 = vld [vmem:[%s11179_s5 + $0x66c] sm:$0xf0]  ;;  %v7250_v32 = vor.u32 %v9971_v21, %v7247_v22 }
 0x164   : > { %v6797_v46 = vld [vmem:[%s11179_s5 + $0x10] sm:$0xf]  ;;  %3099 = vmatpush.bf16.msra.mxu2 %v7374_v33  ;;  %v7598_v54 = vor.u32 %v10063_v44, %v7597_v43  ;;  %3072 = vmatpush.bf16.msra.mxu0 %v6830_v45 }
 0x165   : > { %v9863_v48 = vld [vmem:[%s11179_s5 + $0x2c] sm:$0xf0] }
 0x166   : > { %v7053_v51 = vld [vmem:[%s11179_s5 + $0x210] sm:$0xf]  ;;  %3113 = vmatpush.bf16.msra.mxu3 %v7630_v38  ;;  %v6798_v63 = vor.u32 %v9863_v48, %v6797_v46  ;;  %3086 = vmatpush.bf16.msra.mxu1 %v7086_v49  ;;  %v7215_v38 = vld [vmem:[%s11179_s5 + $0x370] sm:$0xf0] }
 0x167   : > { %v9927_v52 = vld [vmem:[%s11179_s5 + $0x22c] sm:$0xf0]  ;;  %v7218_v46 = vor.u32 %v9963_v37, %v7215_v38  ;;  %v9891_v49 = vld [vmem:[%s11179_s5 + $0x114] sm:$0xf] }
 0x168   : > { %v7309_v53 = vld [vmem:[%s11179_s5 + $0x410] sm:$0xf]  ;;  %3100 = vmatpush.bf16.msra.mxu2 %v7342_v50  ;;  %v7054_v3 = vor.u32 %v9927_v52, %v7053_v51  ;;  %3073 = vmatpush.bf16.msra.mxu0 %v6798_v63  ;;  %v6927_v50 = vld [vmem:[%s11179_s5 + $0x130] sm:$0xf0] }
 0x169   : > { %v9991_v56 = vld [vmem:[%s11179_s5 + $0x42c] sm:$0xf0]  ;;  %v9955_v51 = vld [vmem:[%s11179_s5 + $0x314] sm:$0xf] }
 0x16a   : > { %v7565_v57 = vld [vmem:[%s11179_s5 + $0x610] sm:$0xf]  ;;  %v7310_v4 = vor.u32 %v9991_v56, %v7309_v53  ;;  %3114 = vmatpush.bf16.msra.mxu3 %v7598_v54  ;;  %3087 = vmatpush.bf16.msra.mxu1 %v7054_v3  ;;  %v7183_v52 = vld [vmem:[%s11179_s5 + $0x330] sm:$0xf0]  ;;  %v6930_v56 = vor.u32 %v9891_v49, %v6927_v50 }
 0x16b   : > { %v10055_v59 = vld [vmem:[%s11179_s5 + $0x62c] sm:$0xf0]  ;;  %3074 = vmatmul.bf16.vlgmr.msra.gmra.mxu0 %v11280_v58  ;;  %v9883_v63 = vld [vmem:[%s11179_s5 + $0xd4] sm:$0xf] }
 0x16c   : > { %v8045_v60 = vld [vmem:[%s11179_s5 + $0x9d0] sm:$0xf]  ;;  %v7566_v8 = vor.u32 %v10055_v59, %v7565_v57  ;;  %3101 = vmatpush.bf16.msra.mxu2 %v7310_v4  ;;  %v7535_v49 = vld [vmem:[%s11179_s5 + $0x5f0] sm:$0xf0] }
 0x16d   : > { %v10175_v61 = vld [vmem:[%s11179_s5 + $0x9ec] sm:$0xf0]  ;;  %3088 = vmatmul.bf16.vlgmr.msra.gmra.mxu1 %v11290_v7  ;;  %v10107_v50 = vld [vmem:[%s11179_s5 + $0x7d4] sm:$0xf] }
 0x16e   : > { %v8301_v62 = vld [vmem:[%s11179_s5 + $0xbd0] sm:$0xf]  ;;  %v8046_v10 = vor.u32 %v10175_v61, %v8045_v60  ;;  %3115 = vmatpush.bf16.msra.mxu3 %v7566_v8  ;;  %v7186_v61 = vor.u32 %v9955_v51, %v7183_v52  ;;  %v7791_v52 = vld [vmem:[%s11179_s5 + $0x7f0] sm:$0xf0] }
 0x16f   : > { %v10239_v0 = vld [vmem:[%s11179_s5 + $0xbec] sm:$0xf0]  ;;  %3102 = vmatmul.bf16.vlgmr.msra.gmra.mxu2 %v11300_v23 }
 0x170   : > { %v8302_v11 = vor.u32 %v10239_v0, %v8301_v62  ;;  %v8013_v13 = vld [vmem:[%s11179_s5 + $0x990] sm:$0xf]  ;;  %3122 = vmatpush.bf16.msrb.mxu0 %v8046_v10  ;;  %3150 = vmatpush.bf16.msrb.mxu2 %v7026_v12  ;;  %v6895_v0 = vld [vmem:[%s11179_s5 + $0xf0] sm:$0xf0] }
 0x171   : > { %v10167_v14 = vld [vmem:[%s11179_s5 + $0x9ac] sm:$0xf0]  ;;  %3116 = vmatmul.bf16.vlgmr.msra.gmra.mxu3 %v11302_v24  ;;  %v6898_v5 = vor.u32 %v9883_v63, %v6895_v0  ;;  %v7794_v63 = vor.u32 %v10107_v50, %v7791_v52  ;;  %v10075_v50 = vld [vmem:[%s11179_s5 + $0x6d4] sm:$0xf] }
 0x172   : > { %v8269_v15 = vld [vmem:[%s11179_s5 + $0xb90] sm:$0xf]  ;;  %v8014_v25 = vor.u32 %v10167_v14, %v8013_v13  ;;  %3136 = vmatpush.bf16.msrb.mxu1 %v8302_v11  ;;  %3164 = vmatpush.bf16.msrb.mxu3 %v7282_v16  ;;  %v7154_v11 = vor.u32 %v9947_v1, %v7151_v2  ;;  %v9875_v13 = vld [vmem:[%s11179_s5 + $0x94] sm:$0xf] }
 0x173   : > { %v10231_v17 = vld [vmem:[%s11179_s5 + $0xbac] sm:$0xf0]  ;;  %v6863_v14 = vld [vmem:[%s11179_s5 + $0xb0] sm:$0xf0] }
 0x174   : > { %v8270_v26 = vor.u32 %v10231_v17, %v8269_v15  ;;  %v7981_v28 = vld [vmem:[%s11179_s5 + $0x950] sm:$0xf]  ;;  %3123 = vmatpush.bf16.msrb.mxu0 %v8014_v25  ;;  %3151 = vmatpush.bf16.msrb.mxu2 %v6994_v27  ;;  %v9939_v15 = vld [vmem:[%s11179_s5 + $0x294] sm:$0xf]  ;;  %v6866_v19 = vor.u32 %v9875_v13, %v6863_v14 }
 0x175   : > { %v10159_v29 = vld [vmem:[%s11179_s5 + $0x96c] sm:$0xf0]  ;;  %v7119_v16 = vld [vmem:[%s11179_s5 + $0x2b0] sm:$0xf0] }
 0x176   : > { %v8237_v31 = vld [vmem:[%s11179_s5 + $0xb50] sm:$0xf]  ;;  %v7982_v39 = vor.u32 %v10159_v29, %v7981_v28  ;;  %3137 = vmatpush.bf16.msrb.mxu1 %v8270_v26  ;;  %3165 = vmatpush.bf16.msrb.mxu3 %v7250_v32  ;;  %v7122_v26 = vor.u32 %v9939_v15, %v7119_v16  ;;  %v9867_v28 = vld [vmem:[%s11179_s5 + $0x54] sm:$0xf] }
 0x177   : > { %v10223_v33 = vld [vmem:[%s11179_s5 + $0xb6c] sm:$0xf0]  ;;  %v6831_v29 = vld [vmem:[%s11179_s5 + $0x70] sm:$0xf0] }
 0x178   : > { %v8238_v41 = vor.u32 %v10223_v33, %v8237_v31  ;;  %v7949_v43 = vld [vmem:[%s11179_s5 + $0x910] sm:$0xf]  ;;  %3124 = vmatpush.bf16.msrb.mxu0 %v7982_v39  ;;  %3152 = vmatpush.bf16.msrb.mxu2 %v6962_v42  ;;  %v9931_v31 = vld [vmem:[%s11179_s5 + $0x254] sm:$0xf]  ;;  %v6834_v38 = vor.u32 %v9867_v28, %v6831_v29 }
 0x179   : > { %v10151_v44 = vld [vmem:[%s11179_s5 + $0x92c] sm:$0xf0]  ;;  %v7087_v32 = vld [vmem:[%s11179_s5 + $0x270] sm:$0xf0] }
 0x17a   : > { %v8205_v45 = vld [vmem:[%s11179_s5 + $0xb10] sm:$0xf]  ;;  %v7950_v53 = vor.u32 %v10151_v44, %v7949_v43  ;;  %3138 = vmatpush.bf16.msrb.mxu1 %v8238_v41  ;;  %3166 = vmatpush.bf16.msrb.mxu3 %v7218_v46  ;;  %v9859_v42 = vld [vmem:[%s11179_s5 + $0x14] sm:$0xf]  ;;  %v7090_v43 = vor.u32 %v9931_v31, %v7087_v32 }
 0x17b   : > { %v10215_v48 = vld [vmem:[%s11179_s5 + $0xb2c] sm:$0xf0]  ;;  %v6799_v44 = vld [vmem:[%s11179_s5 + $0x30] sm:$0xf0] }
 0x17c   : > { %v8206_v54 = vor.u32 %v10215_v48, %v8205_v45  ;;  %v7917_v57 = vld [vmem:[%s11179_s5 + $0x8d0] sm:$0xf]  ;;  %3125 = vmatpush.bf16.msrb.mxu0 %v7950_v53  ;;  %3153 = vmatpush.bf16.msrb.mxu2 %v6930_v56  ;;  %v9923_v45 = vld [vmem:[%s11179_s5 + $0x214] sm:$0xf] }
 0x17d   : > { %v10143_v59 = vld [vmem:[%s11179_s5 + $0x8ec] sm:$0xf0]  ;;  %v7055_v46 = vld [vmem:[%s11179_s5 + $0x230] sm:$0xf0] }
 0x17e   : > { %v8173_v60 = vld [vmem:[%s11179_s5 + $0xad0] sm:$0xf]  ;;  %v7918_v3 = vor.u32 %v10143_v59, %v7917_v57  ;;  %3139 = vmatpush.bf16.msrb.mxu1 %v8206_v54  ;;  %3167 = vmatpush.bf16.msrb.mxu3 %v7186_v61  ;;  %v10043_v48 = vld [vmem:[%s11179_s5 + $0x5d4] sm:$0xf]  ;;  %v6802_v57 = vor.u32 %v9859_v42, %v6799_v44  ;;  %v7058_v61 = vor.u32 %v9923_v45, %v7055_v46 }
 0x17f   : > { %v10207_v62 = vld [vmem:[%s11179_s5 + $0xaec] sm:$0xf0]  ;;  %v10171_v53 = vld [vmem:[%s11179_s5 + $0x9d4] sm:$0xf] }
 0x180   : > { %v8174_v4 = vor.u32 %v10207_v62, %v8173_v60  ;;  %v7885_v6 = vld [vmem:[%s11179_s5 + $0x890] sm:$0xf]  ;;  %3126 = vmatpush.bf16.msrb.mxu0 %v7918_v3  ;;  %3154 = vmatpush.bf16.msrb.mxu2 %v6898_v5  ;;  %v8047_v54 = vld [vmem:[%s11179_s5 + $0x9f0] sm:$0xf0]  ;;  %v7538_v62 = vor.u32 %v10043_v48, %v7535_v49 }
 0x181   : > { %v10135_v8 = vld [vmem:[%s11179_s5 + $0x8ac] sm:$0xf0]  ;;  %v10235_v59 = vld [vmem:[%s11179_s5 + $0xbd4] sm:$0xf]  ;;  %v8050_v0 = vor.u32 %v10171_v53, %v8047_v54 }
 0x182   : > { %v8141_v10 = vld [vmem:[%s11179_s5 + $0xa90] sm:$0xf]  ;;  %v7886_v17 = vor.u32 %v10135_v8, %v7885_v6  ;;  %3140 = vmatpush.bf16.msrb.mxu1 %v8174_v4  ;;  %3168 = vmatpush.bf16.msrb.mxu3 %v7154_v11  ;;  %v8303_v60 = vld [vmem:[%s11179_s5 + $0xbf0] sm:$0xf0] }
 0x183   : > { %v10199_v12 = vld [vmem:[%s11179_s5 + $0xaac] sm:$0xf0]  ;;  %v10035_v1 = vld [vmem:[%s11179_s5 + $0x594] sm:$0xf]  ;;  %v8306_v4 = vor.u32 %v10235_v59, %v8303_v60 }
 0x184   : > { %v8142_v18 = vor.u32 %v10199_v12, %v8141_v10  ;;  %v7853_v21 = vld [vmem:[%s11179_s5 + $0x850] sm:$0xf]  ;;  %3127 = vmatpush.bf16.msrb.mxu0 %v7886_v17  ;;  %3155 = vmatpush.bf16.msrb.mxu2 %v6866_v19  ;;  %v7503_v2 = vld [vmem:[%s11179_s5 + $0x5b0] sm:$0xf0] }
 0x185   : > { %v10127_v22 = vld [vmem:[%s11179_s5 + $0x86c] sm:$0xf0]  ;;  %v10099_v3 = vld [vmem:[%s11179_s5 + $0x794] sm:$0xf]  ;;  %v7506_v12 = vor.u32 %v10035_v1, %v7503_v2 }
 0x186   : > { %v8109_v25 = vld [vmem:[%s11179_s5 + $0xa50] sm:$0xf]  ;;  %v7854_v33 = vor.u32 %v10127_v22, %v7853_v21  ;;  %3141 = vmatpush.bf16.msrb.mxu1 %v8142_v18  ;;  %3169 = vmatpush.bf16.msrb.mxu3 %v7122_v26  ;;  %v7759_v5 = vld [vmem:[%s11179_s5 + $0x7b0] sm:$0xf0]  ;;  %v11784_v18 = vpop.f32.mrf.mxu2 }
 0x187   : > { %v10191_v27 = vld [vmem:[%s11179_s5 + $0xa6c] sm:$0xf0]  ;;  %v10163_v6 = vld [vmem:[%s11179_s5 + $0x994] sm:$0xf]  ;;  %v7762_v13 = vor.u32 %v10099_v3, %v7759_v5 }
 0x188   : > { %v7821_v34 = vld [vmem:[%s11179_s5 + $0x810] sm:$0xf]  ;;  %v8110_v37 = vor.u32 %v10191_v27, %v8109_v25  ;;  %3128 = vmatpush.bf16.msrb.mxu0 %v7854_v33  ;;  %3156 = vmatpush.bf16.msrb.mxu2 %v6834_v38  ;;  %v8015_v8 = vld [vmem:[%s11179_s5 + $0x9b0] sm:$0xf0] }
 0x189   : > { %v10119_v35 = vld [vmem:[%s11179_s5 + $0x82c] sm:$0xf0]  ;;  %v10227_v10 = vld [vmem:[%s11179_s5 + $0xb94] sm:$0xf]  ;;  %v8018_v14 = vor.u32 %v10163_v6, %v8015_v8 }
 0x18a   : > { %v8077_v39 = vld [vmem:[%s11179_s5 + $0xa10] sm:$0xf]  ;;  %v7822_v51 = vor.u32 %v10119_v35, %v7821_v34  ;;  %3142 = vmatpush.bf16.msrb.mxu1 %v8110_v37  ;;  %3170 = vmatpush.bf16.msrb.mxu3 %v7090_v43  ;;  %v8271_v11 = vld [vmem:[%s11179_s5 + $0xbb0] sm:$0xf0]  ;;  %v11798_v35 = vpop.f32.mrf.mxu3 }
 0x18b   : > { %v10183_v41 = vld [vmem:[%s11179_s5 + $0xa2c] sm:$0xf0]  ;;  %v10027_v15 = vld [vmem:[%s11179_s5 + $0x554] sm:$0xf]  ;;  %v8274_v19 = vor.u32 %v10227_v10, %v8271_v11  ;;  %v11825_v11 = vpop.f32.mrf.mxu0 }
 0x18c   : > { %v8078_v56 = vor.u32 %v10183_v41, %v8077_v39  ;;  %3129 = vmatpush.bf16.msrb.mxu0 %v7822_v51  ;;  %3157 = vmatpush.bf16.msrb.mxu2 %v6802_v57  ;;  %v7471_v16 = vld [vmem:[%s11179_s5 + $0x570] sm:$0xf0] }
 0x18d   : > { %v10091_v17 = vld [vmem:[%s11179_s5 + $0x754] sm:$0xf]  ;;  %v7474_v28 = vor.u32 %v10027_v15, %v7471_v16 }
 0x18e   : > { %3143 = vmatpush.bf16.msrb.mxu1 %v8078_v56  ;;  %3171 = vmatpush.bf16.msrb.mxu3 %v7058_v61  ;;  %v7727_v21 = vld [vmem:[%s11179_s5 + $0x770] sm:$0xf0]  ;;  %v11808_v51 = vpop.f32.mrf.mxu2 }
 0x18f   : > { %3130 = vmatmul.bf16.vlgmr.msrb.gmra.mxu0 %v11349_v36  ;;  %v10155_v22 = vld [vmem:[%s11179_s5 + $0x954] sm:$0xf]  ;;  %3158 = vmatmul.bf16.vlgmr.msrb.gmra.mxu2 %v11280_v58  ;;  %v7730_v29 = vor.u32 %v10091_v17, %v7727_v21 }
 0x190   : > { %3178 = vmatpush.bf16.msra.mxu0 %v7538_v62  ;;  %3206 = vmatpush.bf16.msra.mxu2 %v8050_v0  ;;  %v7983_v25 = vld [vmem:[%s11179_s5 + $0x970] sm:$0xf0] }
 0x191   : > { %3144 = vmatmul.bf16.vlgmr.msrb.gmra.mxu1 %v11354_v40  ;;  %v10219_v26 = vld [vmem:[%s11179_s5 + $0xb54] sm:$0xf]  ;;  %3172 = vmatmul.bf16.vlgmr.msrb.gmra.mxu3 %v11290_v7  ;;  %v7986_v31 = vor.u32 %v10155_v22, %v7983_v25 }
 0x192   : > { %3192 = vmatpush.bf16.msra.mxu1 %v7794_v63  ;;  %3220 = vmatpush.bf16.msra.mxu3 %v8306_v4  ;;  %v8239_v27 = vld [vmem:[%s11179_s5 + $0xb70] sm:$0xf0]  ;;  %v11818_v2 = vpop.f32.mrf.mxu3 }
 0x193   : > { %v10019_v32 = vld [vmem:[%s11179_s5 + $0x514] sm:$0xf]  ;;  %v8242_v37 = vor.u32 %v10219_v26, %v8239_v27 }
 0x194   : > { %3179 = vmatpush.bf16.msra.mxu0 %v7506_v12  ;;  %3207 = vmatpush.bf16.msra.mxu2 %v8018_v14  ;;  %v7439_v33 = vld [vmem:[%s11179_s5 + $0x530] sm:$0xf0] }
 0x195   : > { %v10083_v34 = vld [vmem:[%s11179_s5 + $0x714] sm:$0xf]  ;;  %v7442_v44 = vor.u32 %v10019_v32, %v7439_v33 }
 0x196   : > { %3193 = vmatpush.bf16.msra.mxu1 %v7762_v13  ;;  %3221 = vmatpush.bf16.msra.mxu3 %v8274_v19  ;;  %v7695_v38 = vld [vmem:[%s11179_s5 + $0x730] sm:$0xf0] }
 0x197   : > { %v10147_v39 = vld [vmem:[%s11179_s5 + $0x914] sm:$0xf]  ;;  %v7698_v45 = vor.u32 %v10083_v34, %v7695_v38 }
 0x198   : > { %v7951_v41 = vld [vmem:[%s11179_s5 + $0x930] sm:$0xf0]  ;;  %3180 = vmatpush.bf16.msra.mxu0 %v7474_v28  ;;  %3208 = vmatpush.bf16.msra.mxu2 %v7986_v31  ;;  %v11835_v28 = vpop.f32.mrf.mxu1 }
 0x199   : > { %v10211_v42 = vld [vmem:[%s11179_s5 + $0xb14] sm:$0xf]  ;;  %v7954_v46 = vor.u32 %v10147_v39, %v7951_v41 }
 0x19a   : > { %v8207_v43 = vld [vmem:[%s11179_s5 + $0xb30] sm:$0xf0]  ;;  %3194 = vmatpush.bf16.msra.mxu1 %v7730_v29  ;;  %3222 = vmatpush.bf16.msra.mxu3 %v8242_v37  ;;  %v11837_v29 = vpop.f32.mrf.mxu2 }
 0x19b   : > { %v10011_v48 = vld [vmem:[%s11179_s5 + $0x4d4] sm:$0xf]  ;;  %v8210_v52 = vor.u32 %v10211_v42, %v8207_v43 }
 0x19c   : > { %v7407_v49 = vld [vmem:[%s11179_s5 + $0x4f0] sm:$0xf0]  ;;  %3181 = vmatpush.bf16.msra.mxu0 %v7442_v44  ;;  %3209 = vmatpush.bf16.msra.mxu2 %v7954_v46  ;;  %v7029_v46 = vld [vmem:[%s11179_s5 + $0x1d8] sm:$0xf] }
 0x19d   : > { %v7663_v53 = vld [vmem:[%s11179_s5 + $0x6f0] sm:$0xf0]  ;;  %v7410_v60 = vor.u32 %v10011_v48, %v7407_v49  ;;  %v9920_v48 = vld [vmem:[%s11179_s5 + $0x1f4] sm:$0xf0] }
 0x19e   : > { %v10139_v54 = vld [vmem:[%s11179_s5 + $0x8d4] sm:$0xf]  ;;  %3195 = vmatpush.bf16.msra.mxu1 %v7698_v45  ;;  %v7666_v61 = vor.u32 %v10075_v50, %v7663_v53  ;;  %3223 = vmatpush.bf16.msra.mxu3 %v8210_v52  ;;  %v7285_v49 = vld [vmem:[%s11179_s5 + $0x3d8] sm:$0xf]  ;;  %v11850_v50 = vpop.f32.mrf.mxu3  ;;  %v11852_v52 = vpop.f32.mrf.mxu0 }
 0x19f   : > { %v7919_v56 = vld [vmem:[%s11179_s5 + $0x8f0] sm:$0xf0] }
 0x1a0   : > { %v10203_v57 = vld [vmem:[%s11179_s5 + $0xad4] sm:$0xf]  ;;  %v7922_v62 = vor.u32 %v10139_v54, %v7919_v56  ;;  %3182 = vmatpush.bf16.msra.mxu0 %v7410_v60  ;;  %v9984_v54 = vld [vmem:[%s11179_s5 + $0x3f4] sm:$0xf0] }
 0x1a1   : > { %v8175_v59 = vld [vmem:[%s11179_s5 + $0xaf0] sm:$0xf0]  ;;  %v7541_v56 = vld [vmem:[%s11179_s5 + $0x5d8] sm:$0xf] }
 0x1a2   : > { %v10003_v63 = vld [vmem:[%s11179_s5 + $0x494] sm:$0xf]  ;;  %v8178_v3 = vor.u32 %v10203_v57, %v8175_v59  ;;  %3196 = vmatpush.bf16.msra.mxu1 %v7666_v61  ;;  %3210 = vmatpush.bf16.msra.mxu2 %v7922_v62  ;;  %v10048_v57 = vld [vmem:[%s11179_s5 + $0x5f4] sm:$0xf0] }
 0x1a3   : > { %v7375_v0 = vld [vmem:[%s11179_s5 + $0x4b0] sm:$0xf0]  ;;  %v7797_v61 = vld [vmem:[%s11179_s5 + $0x7d8] sm:$0xf] }
 0x1a4   : > { %v10067_v1 = vld [vmem:[%s11179_s5 + $0x694] sm:$0xf]  ;;  %v7378_v12 = vor.u32 %v10003_v63, %v7375_v0  ;;  %3224 = vmatpush.bf16.msra.mxu3 %v8178_v3  ;;  %v10112_v62 = vld [vmem:[%s11179_s5 + $0x7f4] sm:$0xf0]  ;;  %v7030_v0 = vor.u32 %v9920_v48, %v7029_v46  ;;  %v7542_v3 = vor.u32 %v10048_v57, %v7541_v56 }
 0x1a5   : > { %v7631_v4 = vld [vmem:[%s11179_s5 + $0x6b0] sm:$0xf0]  ;;  %v9896_v46 = vld [vmem:[%s11179_s5 + $0x134] sm:$0xf0] }
 0x1a6   : > { %v10131_v5 = vld [vmem:[%s11179_s5 + $0x894] sm:$0xf]  ;;  %v7634_v13 = vor.u32 %v10067_v1, %v7631_v4  ;;  %3183 = vmatpush.bf16.msra.mxu0 %v7378_v12  ;;  %v7286_v1 = vor.u32 %v9984_v54, %v7285_v49  ;;  %v6997_v4 = vld [vmem:[%s11179_s5 + $0x198] sm:$0xf] }
 0x1a7   : > { %v7887_v6 = vld [vmem:[%s11179_s5 + $0x8b0] sm:$0xf0]  ;;  %v9976_v12 = vld [vmem:[%s11179_s5 + $0x3b4] sm:$0xf0] }
 0x1a8   : > { %v10195_v8 = vld [vmem:[%s11179_s5 + $0xa94] sm:$0xf]  ;;  %v7890_v14 = vor.u32 %v10131_v5, %v7887_v6  ;;  %3197 = vmatpush.bf16.msra.mxu1 %v7634_v13  ;;  %v9912_v5 = vld [vmem:[%s11179_s5 + $0x1b4] sm:$0xf0] }
 0x1a9   : > { %v8143_v10 = vld [vmem:[%s11179_s5 + $0xab0] sm:$0xf0]  ;;  %v7253_v6 = vld [vmem:[%s11179_s5 + $0x398] sm:$0xf] }
 0x1aa   : > { %v9995_v15 = vld [vmem:[%s11179_s5 + $0x454] sm:$0xf]  ;;  %v8146_v19 = vor.u32 %v10195_v8, %v8143_v10  ;;  %3211 = vmatpush.bf16.msra.mxu2 %v7890_v14  ;;  %v11862_v8 = vpop.f32.mrf.mxu1  ;;  %v7798_v10 = vor.u32 %v10112_v62, %v7797_v61  ;;  %v7509_v13 = vld [vmem:[%s11179_s5 + $0x598] sm:$0xf] }
 0x1ab   : > { %v7343_v16 = vld [vmem:[%s11179_s5 + $0x470] sm:$0xf0]  ;;  %v10040_v14 = vld [vmem:[%s11179_s5 + $0x5b4] sm:$0xf0] }
 0x1ac   : > { %v10059_v17 = vld [vmem:[%s11179_s5 + $0x654] sm:$0xf]  ;;  %v7346_v31 = vor.u32 %v9995_v15, %v7343_v16  ;;  %3225 = vmatpush.bf16.msra.mxu3 %v8146_v19  ;;  %v7765_v15 = vld [vmem:[%s11179_s5 + $0x798] sm:$0xf]  ;;  %v6998_v19 = vor.u32 %v9912_v5, %v6997_v4 }
 0x1ad   : > { %v7599_v21 = vld [vmem:[%s11179_s5 + $0x670] sm:$0xf0]  ;;  %v10104_v16 = vld [vmem:[%s11179_s5 + $0x7b4] sm:$0xf0] }
 0x1ae   : > { %v10123_v22 = vld [vmem:[%s11179_s5 + $0x854] sm:$0xf]  ;;  %v7602_v34 = vor.u32 %v10059_v17, %v7599_v21  ;;  %3184 = vmatpush.bf16.msra.mxu0 %v7346_v31  ;;  %v11869_v17 = vpop.f32.mrf.mxu2  ;;  %v7254_v21 = vor.u32 %v9976_v12, %v7253_v6  ;;  %v7766_v31 = vor.u32 %v10104_v16, %v7765_v15  ;;  %v7189_v48 = vld [vmem:[%s11179_s5 + $0x318] sm:$0xf] }
 0x1af   : > { %v7855_v25 = vld [vmem:[%s11179_s5 + $0x870] sm:$0xf0]  ;;  %v7445_v54 = vld [vmem:[%s11179_s5 + $0x518] sm:$0xf] }
 0x1b0   : > { %v10187_v26 = vld [vmem:[%s11179_s5 + $0xa54] sm:$0xf]  ;;  %v7858_v37 = vor.u32 %v10123_v22, %v7855_v25  ;;  %3198 = vmatpush.bf16.msra.mxu1 %v7602_v34  ;;  %v7510_v22 = vor.u32 %v10040_v14, %v7509_v13  ;;  %v6965_v25 = vld [vmem:[%s11179_s5 + $0x158] sm:$0xf] }
 0x1b1   : > { %v8111_v27 = vld [vmem:[%s11179_s5 + $0xa70] sm:$0xf0]  ;;  %v10032_v34 = vld [vmem:[%s11179_s5 + $0x574] sm:$0xf0] }
 0x1b2   : > { %v9987_v32 = vld [vmem:[%s11179_s5 + $0x414] sm:$0xf]  ;;  %v8114_v42 = vor.u32 %v10187_v26, %v8111_v27  ;;  %3212 = vmatpush.bf16.msra.mxu2 %v7858_v37  ;;  %v9904_v26 = vld [vmem:[%s11179_s5 + $0x174] sm:$0xf0] }
 0x1b3   : > { %v7311_v33 = vld [vmem:[%s11179_s5 + $0x430] sm:$0xf0]  ;;  %v7221_v27 = vld [vmem:[%s11179_s5 + $0x358] sm:$0xf] }
 0x1b4   : > { %v10051_v38 = vld [vmem:[%s11179_s5 + $0x614] sm:$0xf]  ;;  %v7314_v53 = vor.u32 %v9987_v32, %v7311_v33  ;;  %3226 = vmatpush.bf16.msra.mxu3 %v8114_v42  ;;  %v9968_v32 = vld [vmem:[%s11179_s5 + $0x374] sm:$0xf0]  ;;  %v6966_v42 = vor.u32 %v9904_v26, %v6965_v25 }
 0x1b5   : > { %v7567_v39 = vld [vmem:[%s11179_s5 + $0x630] sm:$0xf0]  ;;  %v7477_v33 = vld [vmem:[%s11179_s5 + $0x558] sm:$0xf] }
 0x1b6   : > { %v10115_v41 = vld [vmem:[%s11179_s5 + $0x814] sm:$0xf]  ;;  %v7570_v59 = vor.u32 %v10051_v38, %v7567_v39  ;;  %3185 = vmatpush.bf16.msra.mxu0 %v7314_v53  ;;  %v7733_v37 = vld [vmem:[%s11179_s5 + $0x758] sm:$0xf]  ;;  %v11882_v39 = vpop.f32.mrf.mxu0  ;;  %v11900_v4 = vpop.f32.mrf.mxu2 }
 0x1b7   : > { %v7823_v43 = vld [vmem:[%s11179_s5 + $0x830] sm:$0xf0]  ;;  %v10096_v38 = vld [vmem:[%s11179_s5 + $0x774] sm:$0xf0] }
 0x1b8   : > { %v10179_v44 = vld [vmem:[%s11179_s5 + $0xa14] sm:$0xf]  ;;  %v7826_v60 = vor.u32 %v10115_v41, %v7823_v43  ;;  %3199 = vmatpush.bf16.msra.mxu1 %v7570_v59  ;;  %v11884_v41 = vpop.f32.mrf.mxu3  ;;  %v7222_v43 = vor.u32 %v9968_v32, %v7221_v27  ;;  %v7734_v49 = vor.u32 %v10096_v38, %v7733_v37  ;;  %v9960_v53 = vld [vmem:[%s11179_s5 + $0x334] sm:$0xf0] }
 0x1b9   : > { %v8079_v45 = vld [vmem:[%s11179_s5 + $0xa30] sm:$0xf0]  ;;  %3186 = vmatmul.bf16.vlgmr.msra.gmra.mxu0 %v11300_v23  ;;  %v10024_v56 = vld [vmem:[%s11179_s5 + $0x534] sm:$0xf0]  ;;  %v7190_v62 = vor.u32 %v9960_v53, %v7189_v48 }
 0x1ba   : > { %v8082_v63 = vor.u32 %v10179_v44, %v8079_v45  ;;  %3213 = vmatpush.bf16.msra.mxu2 %v7826_v60  ;;  %3234 = vmatpush.bf16.msrb.mxu0 %v7030_v0  ;;  %v7478_v44 = vor.u32 %v10032_v34, %v7477_v33  ;;  %v6933_v45 = vld [vmem:[%s11179_s5 + $0x118] sm:$0xf]  ;;  %v11895_v60 = vpop.f32.mrf.mxu1 }
 0x1bb   : > { %3200 = vmatmul.bf16.vlgmr.msra.gmra.mxu1 %v11302_v24  ;;  %v7701_v57 = vld [vmem:[%s11179_s5 + $0x718] sm:$0xf]  ;;  %v6934_v61 = vor.u32 %v9896_v46, %v6933_v45 }
 0x1bc   : > { %3227 = vmatpush.bf16.msra.mxu3 %v8082_v63  ;;  %3248 = vmatpush.bf16.msrb.mxu1 %v7286_v1  ;;  %v10088_v59 = vld [vmem:[%s11179_s5 + $0x734] sm:$0xf0]  ;;  %v7446_v63 = vor.u32 %v10024_v56, %v7445_v54 }
 0x1bd   : > { %3214 = vmatmul.bf16.vlgmr.msra.gmra.mxu2 %v11349_v36  ;;  %v6901_v0 = vld [vmem:[%s11179_s5 + $0xd8] sm:$0xf]  ;;  %v7702_v5 = vor.u32 %v10088_v59, %v7701_v57 }
 0x1be   : > { %3262 = vmatpush.bf16.msrb.mxu2 %v7542_v3  ;;  %3235 = vmatpush.bf16.msrb.mxu0 %v6998_v19  ;;  %v9888_v1 = vld [vmem:[%s11179_s5 + $0xf4] sm:$0xf0]  ;;  %v11907_v15 = vpop.f32.mrf.mxu0  ;;  %v11927_v54 = vpop.f32.mrf.mxu2 }
 0x1bf   : > { %3228 = vmatmul.bf16.vlgmr.msra.gmra.mxu3 %v11354_v40  ;;  %v7157_v3 = vld [vmem:[%s11179_s5 + $0x2d8] sm:$0xf]  ;;  %v6902_v16 = vor.u32 %v9888_v1, %v6901_v0 }
 0x1c0   : > { %3276 = vmatpush.bf16.msrb.mxu3 %v7798_v10  ;;  %3249 = vmatpush.bf16.msrb.mxu1 %v7254_v21  ;;  %v9952_v6 = vld [vmem:[%s11179_s5 + $0x2f4] sm:$0xf0]  ;;  %v11912_v27 = vpop.f32.mrf.mxu3 }
 0x1c1   : > { %v7413_v10 = vld [vmem:[%s11179_s5 + $0x4d8] sm:$0xf]  ;;  %v7158_v19 = vor.u32 %v9952_v6, %v7157_v3 }
 0x1c2   : > { %3263 = vmatpush.bf16.msrb.mxu2 %v7510_v22  ;;  %3236 = vmatpush.bf16.msrb.mxu0 %v6966_v42  ;;  %v10016_v12 = vld [vmem:[%s11179_s5 + $0x4f4] sm:$0xf0]  ;;  %v11919_v42 = vpop.f32.mrf.mxu1 }
 0x1c3   : > { %v7669_v13 = vld [vmem:[%s11179_s5 + $0x6d8] sm:$0xf]  ;;  %v7414_v21 = vor.u32 %v10016_v12, %v7413_v10 }
 0x1c4   : > { %3277 = vmatpush.bf16.msrb.mxu3 %v7766_v31  ;;  %3250 = vmatpush.bf16.msrb.mxu1 %v7222_v43  ;;  %v10080_v14 = vld [vmem:[%s11179_s5 + $0x6f4] sm:$0xf0] }
 0x1c5   : > { %v6869_v22 = vld [vmem:[%s11179_s5 + $0x98] sm:$0xf]  ;;  %v7670_v31 = vor.u32 %v10080_v14, %v7669_v13 }
 0x1c6   : > { %3264 = vmatpush.bf16.msrb.mxu2 %v7478_v44  ;;  %3237 = vmatpush.bf16.msrb.mxu0 %v6934_v61  ;;  %v9880_v25 = vld [vmem:[%s11179_s5 + $0xb4] sm:$0xf0]  ;;  %v2742_v44 = vadd.f32 %v11630_v20, %v794_v55  ;;  %v11940_v12 = vpop.f32.mrf.mxu0 }
 0x1c7   : > { %v7125_v26 = vld [vmem:[%s11179_s5 + $0x298] sm:$0xf]  ;;  %v6870_v43 = vor.u32 %v9880_v25, %v6869_v22 }
 0x1c8   : > { %3278 = vmatpush.bf16.msrb.mxu3 %v7734_v49  ;;  %3251 = vmatpush.bf16.msrb.mxu1 %v7190_v62  ;;  %v9944_v32 = vld [vmem:[%s11179_s5 + $0x2b4] sm:$0xf0]  ;;  %v2756_v0 = vadd.f32 %v11638_v30, %v2742_v44  ;;  %v11942_v13 = vpop.f32.mrf.mxu3  ;;  %v7287_v44 = vld [vmem:[%s11179_s5 + $0x3f8] sm:$0xf0] }
 0x1c9   : > { %v7381_v33 = vld [vmem:[%s11179_s5 + $0x498] sm:$0xf]  ;;  %v7126_v45 = vor.u32 %v9944_v32, %v7125_v26  ;;  %v9916_v32 = vld [vmem:[%s11179_s5 + $0x1dc] sm:$0xf] }
 0x1ca   : > { %3265 = vmatpush.bf16.msrb.mxu2 %v7446_v63  ;;  %v10008_v34 = vld [vmem:[%s11179_s5 + $0x4b4] sm:$0xf0]  ;;  %3238 = vmatpush.bf16.msrb.mxu0 %v6902_v16 }
 0x1cb   : > { %v7637_v37 = vld [vmem:[%s11179_s5 + $0x698] sm:$0xf]  ;;  %v7382_v46 = vor.u32 %v10008_v34, %v7381_v33  ;;  %v7031_v33 = vld [vmem:[%s11179_s5 + $0x1f8] sm:$0xf0]  ;;  %v2770_v34 = vadd.f32 %v11784_v18, %v2756_v0  ;;  %v3402_v0 = vmul.f32 %v11666_v9, %v11666_v9 }
 0x1cc   : > { %3279 = vmatpush.bf16.msrb.mxu3 %v7702_v5  ;;  %v10072_v38 = vld [vmem:[%s11179_s5 + $0x6b4] sm:$0xf0]  ;;  %3252 = vmatpush.bf16.msrb.mxu1 %v7158_v19 }
 0x1cd   : > { %v6837_v48 = vld [vmem:[%s11179_s5 + $0x58] sm:$0xf]  ;;  %v7638_v56 = vor.u32 %v10072_v38, %v7637_v37 }
 0x1ce   : > { %3266 = vmatpush.bf16.msrb.mxu2 %v7414_v21  ;;  %v9872_v49 = vld [vmem:[%s11179_s5 + $0x74] sm:$0xf0]  ;;  %3239 = vmatpush.bf16.msrb.mxu0 %v6870_v43  ;;  %v9980_v43 = vld [vmem:[%s11179_s5 + $0x3dc] sm:$0xf] }
 0x1cf   : > { %v7093_v53 = vld [vmem:[%s11179_s5 + $0x258] sm:$0xf]  ;;  %v6838_v61 = vor.u32 %v9872_v49, %v6837_v48  ;;  %v11960_v48 = vpop.f32.mrf.mxu1 }
 0x1d0   : > { %3280 = vmatpush.bf16.msrb.mxu3 %v7670_v31  ;;  %v9936_v57 = vld [vmem:[%s11179_s5 + $0x274] sm:$0xf0]  ;;  %3253 = vmatpush.bf16.msrb.mxu1 %v7126_v45  ;;  %v11957_v45 = vld [vmem:[%s11185_s10] sm:$0xff] }
 0x1d1   : > { %v10000_v59 = vld [vmem:[%s11179_s5 + $0x474] sm:$0xf0]  ;;  %v7094_v1 = vor.u32 %v9936_v57, %v7093_v53 }
 0x1d2   : > { %v7605_v55 = vld [vmem:[%s11179_s5 + $0x658] sm:$0xf]  ;;  %3267 = vmatpush.bf16.msrb.mxu2 %v7382_v46  ;;  %v7350_v3 = vor.u32 %v10000_v59, %v7349_v47  ;;  %3240 = vmatpush.bf16.msrb.mxu0 %v6838_v61  ;;  %v795_v46 = vperm.slane %v11957_v45, 1 }
 0x1d3   : > { %v10064_v20 = vld [vmem:[%s11179_s5 + $0x674] sm:$0xf0] }
 0x1d4   : > { %v6805_v62 = vld [vmem:[%s11179_s5 + $0x18] sm:$0xf]  ;;  %3281 = vmatpush.bf16.msrb.mxu3 %v7638_v56  ;;  %v7606_v14 = vor.u32 %v10064_v20, %v7605_v55  ;;  %3254 = vmatpush.bf16.msrb.mxu1 %v7094_v1  ;;  %v7034_v56 = vor.u32 %v9916_v32, %v7031_v33  ;;  %v11965_v55 = vpop.f32.mrf.mxu2  ;;  %v7290_v20 = vor.u32 %v9980_v43, %v7287_v44  ;;  %v6967_v32 = vld [vmem:[%s11179_s5 + $0x178] sm:$0xf0] }
 0x1d5   : > { %v9864_v63 = vld [vmem:[%s11179_s5 + $0x34] sm:$0xf0]  ;;  %v2784_v1 = vadd.f32 %v11798_v35, %v2770_v34  ;;  %v3418_v33 = vmul.f32 %v3402_v0, %v11666_v9 }
 0x1d6   : > { %v7061_v5 = vld [vmem:[%s11179_s5 + $0x218] sm:$0xf]  ;;  %v6806_v26 = vor.u32 %v9864_v63, %v6805_v62  ;;  %3268 = vmatpush.bf16.msrb.mxu2 %v7350_v3  ;;  %v9908_v62 = vld [vmem:[%s11179_s5 + $0x19c] sm:$0xf] }
 0x1d7   : > { %v9928_v6 = vld [vmem:[%s11179_s5 + $0x234] sm:$0xf0]  ;;  %v6999_v63 = vld [vmem:[%s11179_s5 + $0x1b8] sm:$0xf0]  ;;  %v2798_v34 = vadd.f32 %v11825_v11, %v2784_v1 }
 0x1d8   : > { %v7317_v10 = vld [vmem:[%s11179_s5 + $0x418] sm:$0xf]  ;;  %v7062_v37 = vor.u32 %v9928_v6, %v7061_v5  ;;  %3282 = vmatpush.bf16.msrb.mxu3 %v7606_v14  ;;  %3241 = vmatpush.bf16.msrb.mxu0 %v6806_v26  ;;  %v9972_v3 = vld [vmem:[%s11179_s5 + $0x39c] sm:$0xf]  ;;  %v2824_v6 = vadd.f32 %v11808_v51, %v795_v46  ;;  %v7002_v35 = vor.u32 %v9908_v62, %v6999_v63  ;;  %v11982_v51 = vpop.f32.mrf.mxu3  ;;  %v3434_v63 = vmul.f32 0.044715, %v3418_v33 }
 0x1d9   : > { %v9992_v16 = vld [vmem:[%s11179_s5 + $0x434] sm:$0xf0]  ;;  %v7255_v5 = vld [vmem:[%s11179_s5 + $0x3b8] sm:$0xf0]  ;;  %v12011_v0 = vadd.f32 %v11835_v28, %v2798_v34 }
 0x1da   : > { %v7573_v30 = vld [vmem:[%s11179_s5 + $0x618] sm:$0xf]  ;;  %v7318_v38 = vor.u32 %v9992_v16, %v7317_v10  ;;  %3255 = vmatpush.bf16.msrb.mxu1 %v7062_v37  ;;  %v796_v10 = vperm.slane %v11957_v45, 2  ;;  %v9964_v37 = vld [vmem:[%s11179_s5 + $0x35c] sm:$0xf]  ;;  %v2838_v43 = vadd.f32 %v11818_v2, %v2824_v6 }
 0x1db   : > { %v10056_v19 = vld [vmem:[%s11179_s5 + $0x634] sm:$0xf0]  ;;  %3242 = vmatmul.bf16.vlgmr.msrb.gmra.mxu0 %v11280_v58  ;;  %v6935_v62 = vld [vmem:[%s11179_s5 + $0x138] sm:$0xf0] }
 0x1dc   : > { %v8053_v21 = vld [vmem:[%s11179_s5 + $0x9d8] sm:$0xf]  ;;  %v7574_v49 = vor.u32 %v10056_v19, %v7573_v30  ;;  %3269 = vmatpush.bf16.msrb.mxu2 %v7318_v38  ;;  %v7223_v38 = vld [vmem:[%s11179_s5 + $0x378] sm:$0xf0]  ;;  %v2908_v44 = vadd.f32 %v11907_v15, %v796_v10  ;;  %v12005_v15 = vpop.f32.mrf.mxu2 }
 0x1dd   : > { %v10176_v22 = vld [vmem:[%s11179_s5 + $0x9f4] sm:$0xf0]  ;;  %3256 = vmatmul.bf16.vlgmr.msrb.gmra.mxu1 %v11290_v7  ;;  %v9956_v1 = vld [vmem:[%s11179_s5 + $0x31c] sm:$0xf] }
 0x1de   : > { %v8309_v25 = vld [vmem:[%s11179_s5 + $0xbd8] sm:$0xf]  ;;  %v8054_v18 = vor.u32 %v10176_v22, %v8053_v21  ;;  %3283 = vmatpush.bf16.msrb.mxu3 %v7574_v49  ;;  %v11980_v22 = vpop.f32.mrf.mxu0  ;;  %v7159_v33 = vld [vmem:[%s11179_s5 + $0x2f8] sm:$0xf0] }
 0x1df   : > { %v10240_v31 = vld [vmem:[%s11179_s5 + $0xbf4] sm:$0xf0]  ;;  %3270 = vmatmul.bf16.vlgmr.msrb.gmra.mxu2 %v11300_v23 }
 0x1e0   : > { %v8310_v53 = vor.u32 %v10240_v31, %v8309_v25  ;;  %v8021_v57 = vld [vmem:[%s11179_s5 + $0x998] sm:$0xf]  ;;  %3290 = vmatpush.bf16.msra.mxu0 %v8054_v18  ;;  %3318 = vmatpush.bf16.msra.mxu2 %v7034_v56  ;;  %v7258_v25 = vor.u32 %v9972_v3, %v7255_v5  ;;  %v9900_v31 = vld [vmem:[%s11179_s5 + $0x15c] sm:$0xf] }
 0x1e1   : > { %v10168_v47 = vld [vmem:[%s11179_s5 + $0x9b4] sm:$0xf0]  ;;  %3284 = vmatmul.bf16.vlgmr.msrb.gmra.mxu3 %v11302_v24  ;;  %v6970_v18 = vor.u32 %v9900_v31, %v6967_v32  ;;  %v7191_v3 = vld [vmem:[%s11179_s5 + $0x338] sm:$0xf0]  ;;  %v3410_v31 = vmul.f32 %v12011_v0, %v12011_v0 }
 0x1e2   : > { %v8277_v59 = vld [vmem:[%s11179_s5 + $0xb98] sm:$0xf]  ;;  %v8022_v14 = vor.u32 %v10168_v47, %v8021_v57  ;;  %3304 = vmatpush.bf16.msra.mxu1 %v8310_v53  ;;  %3332 = vmatpush.bf16.msra.mxu3 %v7290_v20  ;;  %v2826_v57 = vadd.f32 %v11837_v29, %v795_v46  ;;  %v12003_v47 = vpop.f32.mrf.mxu1  ;;  %v2852_v29 = vadd.f32 %v11852_v52, %v2838_v43  ;;  %v9948_v32 = vld [vmem:[%s11179_s5 + $0x2dc] sm:$0xf] }
 0x1e3   : > { %v10232_v61 = vld [vmem:[%s11179_s5 + $0xbb4] sm:$0xf0]  ;;  %v2922_v46 = vadd.f32 %v11919_v42, %v2908_v44  ;;  %v7194_v52 = vor.u32 %v9956_v1, %v7191_v3  ;;  %v9884_v42 = vld [vmem:[%s11179_s5 + $0xdc] sm:$0xf] }
 0x1e4   : > { %v8278_v16 = vor.u32 %v10232_v61, %v8277_v59  ;;  %v7989_v30 = vld [vmem:[%s11179_s5 + $0x958] sm:$0xf]  ;;  %3291 = vmatpush.bf16.msra.mxu0 %v8022_v14  ;;  %3319 = vmatpush.bf16.msra.mxu2 %v7002_v35  ;;  %v7226_v59 = vor.u32 %v9964_v37, %v7223_v38  ;;  %v9892_v61 = vld [vmem:[%s11179_s5 + $0x11c] sm:$0xf]  ;;  %v2866_v34 = vadd.f32 %v11862_v8, %v2852_v29  ;;  %v797_v38 = vperm.slane %v11957_v45, 3 }
 0x1e5   : > { %v10160_v19 = vld [vmem:[%s11179_s5 + $0x974] sm:$0xf0]  ;;  %v6938_v14 = vor.u32 %v9892_v61, %v6935_v62  ;;  %v9940_v61 = vld [vmem:[%s11179_s5 + $0x29c] sm:$0xf] }
 0x1e6   : > { %v8245_v21 = vld [vmem:[%s11179_s5 + $0xb58] sm:$0xf]  ;;  %v7990_v49 = vor.u32 %v10160_v19, %v7989_v30  ;;  %3305 = vmatpush.bf16.msra.mxu1 %v8278_v16  ;;  %3333 = vmatpush.bf16.msra.mxu3 %v7258_v25  ;;  %v2840_v30 = vadd.f32 %v11850_v50, %v2826_v57  ;;  %v12021_v19 = vpop.f32.mrf.mxu3  ;;  %v6903_v25 = vld [vmem:[%s11179_s5 + $0xf8] sm:$0xf0]  ;;  %v2936_v50 = vadd.f32 %v11927_v54, %v2922_v46  ;;  %v12033_v37 = vpop.f32.mrf.mxu0 }
 0x1e7   : > { %v10224_v26 = vld [vmem:[%s11179_s5 + $0xb74] sm:$0xf0]  ;;  %v9876_v57 = vld [vmem:[%s11179_s5 + $0x9c] sm:$0xf]  ;;  %v2880_v1 = vadd.f32 %v11869_v17, %v2866_v34 }
 0x1e8   : > { %v8246_v11 = vor.u32 %v10224_v26, %v8245_v21  ;;  %v7957_v53 = vld [vmem:[%s11179_s5 + $0x918] sm:$0xf]  ;;  %3292 = vmatpush.bf16.msra.mxu0 %v7990_v49  ;;  %3320 = vmatpush.bf16.msra.mxu2 %v6970_v18  ;;  %v3450_v26 = vadd.f32 %v3434_v63, %v11666_v9  ;;  %v6906_v49 = vor.u32 %v9884_v42, %v6903_v25  ;;  %v7127_v62 = vld [vmem:[%s11179_s5 + $0x2b8] sm:$0xf0] }
 0x1e9   : > { %v10152_v56 = vld [vmem:[%s11179_s5 + $0x934] sm:$0xf0]  ;;  %v2854_v54 = vadd.f32 %v11882_v39, %v2840_v30  ;;  %v2950_v39 = vadd.f32 %v11942_v13, %v2936_v50  ;;  %v9868_v30 = vld [vmem:[%s11179_s5 + $0x5c] sm:$0xf] }
 0x1ea   : > { %v8213_v2 = vld [vmem:[%s11179_s5 + $0xb18] sm:$0xf]  ;;  %v7958_v5 = vor.u32 %v10152_v56, %v7957_v53  ;;  %3306 = vmatpush.bf16.msra.mxu1 %v8246_v11  ;;  %3334 = vmatpush.bf16.msra.mxu3 %v7226_v59  ;;  %v2910_v53 = vadd.f32 %v11940_v12, %v796_v10  ;;  %v7162_v56 = vor.u32 %v9948_v32, %v7159_v33  ;;  %v6871_v59 = vld [vmem:[%s11179_s5 + $0xb8] sm:$0xf0]  ;;  %v3466_v63 = vmul.f32 0.7978846, %v3450_v26  ;;  %v12051_v3 = vpop.f32.mrf.mxu1  ;;  %v2993_v12 = vpop.f32.mrf.mxu2 }
 0x1eb   : > { %v10216_v20 = vld [vmem:[%s11179_s5 + $0xb34] sm:$0xf0]  ;;  %v6874_v46 = vor.u32 %v9876_v57, %v6871_v59  ;;  %v2868_v17 = vadd.f32 %v11895_v60, %v2854_v54  ;;  %v9932_v42 = vld [vmem:[%s11179_s5 + $0x25c] sm:$0xf]  ;;  %v12067_v60 = vadd.f32 %v11884_v41, %v2880_v1 }
 0x1ec   : > { %v8214_v6 = vor.u32 %v10216_v20, %v8213_v2  ;;  %v7925_v16 = vld [vmem:[%s11179_s5 + $0x8d8] sm:$0xf]  ;;  %3293 = vmatpush.bf16.msra.mxu0 %v7958_v5  ;;  %3321 = vmatpush.bf16.msra.mxu2 %v6938_v14  ;;  %v3426_v20 = vmul.f32 %v3410_v31, %v12011_v0  ;;  %v2924_v13 = vadd.f32 %v11960_v48, %v2910_v53  ;;  %v7095_v25 = vld [vmem:[%s11179_s5 + $0x278] sm:$0xf0]  ;;  %10732 = vtanh.f32 %v3466_v63 }
 0x1ed   : > { %v10144_v28 = vld [vmem:[%s11179_s5 + $0x8f4] sm:$0xf0]  ;;  %v2882_v48 = vadd.f32 %v11900_v4, %v2868_v17  ;;  %v7063_v54 = vld [vmem:[%s11179_s5 + $0x238] sm:$0xf0]  ;;  %v3403_v59 = vmul.f32 %v12067_v60, %v12067_v60 }
 0x1ee   : > { %v8181_v35 = vld [vmem:[%s11179_s5 + $0xad8] sm:$0xf]  ;;  %v7926_v43 = vor.u32 %v10144_v28, %v7925_v16  ;;  %3307 = vmatpush.bf16.msra.mxu1 %v8214_v6  ;;  %3335 = vmatpush.bf16.msra.mxu3 %v7194_v52  ;;  %v2992_v16 = vadd.f32 %v12005_v15, %v797_v38  ;;  %v7130_v28 = vor.u32 %v9940_v61, %v7127_v62  ;;  %v6839_v52 = vld [vmem:[%s11179_s5 + $0x78] sm:$0xf0]  ;;  %v3007_v26 = vpop.f32.mrf.mxu3  ;;  %v3019_v31 = vpop.f32.mrf.mxu0 }
 0x1ef   : > { %v10208_v21 = vld [vmem:[%s11179_s5 + $0xaf4] sm:$0xf0]  ;;  %v2964_v15 = vadd.f32 %v11980_v22, %v2950_v39  ;;  %v6842_v50 = vor.u32 %v9868_v30, %v6839_v52  ;;  %v2938_v22 = vadd.f32 %v11965_v55, %v2924_v13  ;;  %v10108_v57 = vld [vmem:[%s11179_s5 + $0x7dc] sm:$0xf]  ;;  %v12088_v55 = vadd.f32 %v11912_v27, %v2882_v48 }
 0x1f0   : > { %v8182_v44 = vor.u32 %v10208_v21, %v8181_v35  ;;  %v7893_v11 = vld [vmem:[%s11179_s5 + $0x898] sm:$0xf]  ;;  %3294 = vmatpush.bf16.msra.mxu0 %v7926_v43  ;;  %3322 = vmatpush.bf16.msra.mxu2 %v6906_v49  ;;  %v3442_v21 = vmul.f32 0.044715, %v3426_v20  ;;  %v3006_v49 = vadd.f32 %v12021_v19, %v2992_v16  ;;  %v7799_v62 = vld [vmem:[%s11179_s5 + $0x7f8] sm:$0xf0] }
 0x1f1   : > { %v10136_v18 = vld [vmem:[%s11179_s5 + $0x8b4] sm:$0xf0]  ;;  %v12091_v19 = vadd.f32 %v12003_v47, %v2964_v15  ;;  %v10172_v1 = vld [vmem:[%s11179_s5 + $0x9dc] sm:$0xf]  ;;  %v7802_v13 = vor.u32 %v10108_v57, %v7799_v62 }
 0x1f2   : > { %v8149_v8 = vld [vmem:[%s11179_s5 + $0xa98] sm:$0xf]  ;;  %v7894_v10 = vor.u32 %v10136_v18, %v7893_v11  ;;  %3308 = vmatpush.bf16.msra.mxu1 %v8182_v44  ;;  %3336 = vmatpush.bf16.msra.mxu3 %v7162_v56  ;;  %v9860_v44 = vld [vmem:[%s11179_s5 + $0x1c] sm:$0xf]  ;;  %v7098_v11 = vor.u32 %v9932_v42, %v7095_v25  ;;  %v3458_v53 = vadd.f32 %v3442_v21, %v12011_v0  ;;  %v3033_v20 = vpop.f32.mrf.mxu1 }
 0x1f3   : > { %v10200_v2 = vld [vmem:[%s11179_s5 + $0xab4] sm:$0xf0]  ;;  %v6807_v18 = vld [vmem:[%s11179_s5 + $0x38] sm:$0xf0]  ;;  %v3411_v42 = vmul.f32 %v12088_v55, %v12088_v55  ;;  %v3404_v25 = vmul.f32 %v12091_v19, %v12091_v19 }
 0x1f4   : > { %v8150_v29 = vor.u32 %v10200_v2, %v8149_v8  ;;  %v7861_v5 = vld [vmem:[%s11179_s5 + $0x858] sm:$0xf]  ;;  %3295 = vmatpush.bf16.msra.mxu0 %v7894_v10  ;;  %3323 = vmatpush.bf16.msra.mxu2 %v6874_v46  ;;  %v9924_v8 = vld [vmem:[%s11179_s5 + $0x21c] sm:$0xf]  ;;  %v2994_v10 = vadd.f32 %v2993_v12, %v797_v38 }
 0x1f5   : > { %v10128_v6 = vld [vmem:[%s11179_s5 + $0x874] sm:$0xf0]  ;;  %v10044_v56 = vld [vmem:[%s11179_s5 + $0x5dc] sm:$0xf]  ;;  %v7066_v63 = vor.u32 %v9924_v8, %v7063_v54 }
 0x1f6   : > { %v8117_v14 = vld [vmem:[%s11179_s5 + $0xa58] sm:$0xf]  ;;  %v7862_v32 = vor.u32 %v10128_v6, %v7861_v5  ;;  %3309 = vmatpush.bf16.msra.mxu1 %v8150_v29  ;;  %3337 = vmatpush.bf16.msra.mxu3 %v7130_v28  ;;  %v7543_v2 = vld [vmem:[%s11179_s5 + $0x5f8] sm:$0xf0]  ;;  %v6810_v29 = vor.u32 %v9860_v44, %v6807_v18  ;;  %v2952_v5 = vadd.f32 %v11982_v51, %v2938_v22 }
 0x1f7   : > { %v10192_v35 = vld [vmem:[%s11179_s5 + $0xa74] sm:$0xf0]  ;;  %v8055_v39 = vld [vmem:[%s11179_s5 + $0x9f8] sm:$0xf0]  ;;  %v3020_v6 = vadd.f32 %v3019_v31, %v3006_v49  ;;  %v7546_v17 = vor.u32 %v10044_v56, %v7543_v2  ;;  %v3008_v48 = vadd.f32 %v3007_v26, %v2994_v10  ;;  %v3427_v56 = vmul.f32 %v3411_v42, %v12088_v55 }
 0x1f8   : > { %v7829_v33 = vld [vmem:[%s11179_s5 + $0x818] sm:$0xf]  ;;  %v8118_v41 = vor.u32 %v10192_v35, %v8117_v14  ;;  %3296 = vmatpush.bf16.msra.mxu0 %v7862_v32  ;;  %3324 = vmatpush.bf16.msra.mxu2 %v6842_v50  ;;  %v10236_v46 = vld [vmem:[%s11179_s5 + $0xbdc] sm:$0xf]  ;;  %v3047_v14 = vpop.f32.mrf.mxu2  ;;  %v8058_v38 = vor.u32 %v10172_v1, %v8055_v39  ;;  %v3419_v35 = vmul.f32 %v3403_v59, %v12067_v60  ;;  %v12114_v32 = vmul.f32 0.7978846, %v3458_v53  ;;  %v3061_v50 = vpop.f32.mrf.mxu3 }
 0x1f9   : > { %v10120_v34 = vld [vmem:[%s11179_s5 + $0x834] sm:$0xf0]  ;;  %v8311_v47 = vld [vmem:[%s11179_s5 + $0xbf8] sm:$0xf0]  ;;  %v3420_v2 = vmul.f32 %v3404_v25, %v12091_v19 }
 0x1fa   : > { %v8085_v43 = vld [vmem:[%s11179_s5 + $0xa18] sm:$0xf]  ;;  %v7830_v61 = vor.u32 %v10120_v34, %v7829_v33  ;;  %3310 = vmatpush.bf16.msra.mxu1 %v8118_v41  ;;  %3338 = vmatpush.bf16.msra.mxu3 %v7098_v11  ;;  %v10036_v12 = vld [vmem:[%s11179_s5 + $0x59c] sm:$0xf]  ;;  %v8314_v30 = vor.u32 %v10236_v46, %v8311_v47  ;;  %v2966_v33 = vadd.f32 %v12033_v37, %v2952_v5  ;;  %v3021_v41 = vpop.f32.mrf.mxu0  ;;  %v3435_v53 = vmul.f32 0.044715, %v3419_v35  ;;  %v3035_v39 = vpop.f32.mrf.mxu1 }
 0x1fb   : > { %v10184_v4 = vld [vmem:[%s11179_s5 + $0xa34] sm:$0xf0]  ;;  %v7511_v16 = vld [vmem:[%s11179_s5 + $0x5b8] sm:$0xf0]  ;;  %v3034_v34 = vadd.f32 %v3033_v20, %v3020_v6  ;;  %v3022_v57 = vadd.f32 %v3021_v41, %v3008_v48  ;;  %10734 = vtanh.f32 %v12114_v32 }
 0x1fc   : > { %v8086_v27 = vor.u32 %v10184_v4, %v8085_v43  ;;  %v10100_v28 = vld [vmem:[%s11179_s5 + $0x79c] sm:$0xf]  ;;  %3297 = vmatpush.bf16.msra.mxu0 %v7830_v61  ;;  %3325 = vmatpush.bf16.msra.mxu2 %v6810_v29  ;;  %v7514_v26 = vor.u32 %v10036_v12, %v7511_v16  ;;  %v10733_v43 = vpop.eup %10732  ;;  %v12133_v62 = vadd.f32 %v12051_v3, %v2966_v33  ;;  %v3436_v16 = vmul.f32 0.044715, %v3420_v2 }
 0x1fd   : > { %v7767_v52 = vld [vmem:[%s11179_s5 + $0x7b8] sm:$0xf0]  ;;  %v12130_v61 = vadd.f32 1.0, %v10733_v43  ;;  %v3048_v1 = vadd.f32 %v3047_v14, %v3034_v34 }
 0x1fe   : > { %v10164_v21 = vld [vmem:[%s11179_s5 + $0x99c] sm:$0xf]  ;;  %3311 = vmatpush.bf16.msra.mxu1 %v8086_v27  ;;  %3339 = vmatpush.bf16.msra.mxu3 %v7066_v63  ;;  %v7770_v4 = vor.u32 %v10100_v28, %v7767_v52  ;;  %v3412_v28 = vmul.f32 %v12133_v62, %v12133_v62 }
 0x1ff   : > { %v8023_v51 = vld [vmem:[%s11179_s5 + $0x9b8] sm:$0xf0]  ;;  %3298 = vmatmul.bf16.vlgmr.msra.gmra.mxu0 %v11349_v36  ;;  %3326 = vmatmul.bf16.vlgmr.msra.gmra.mxu2 %v11280_v58  ;;  %v12147_v35 = vadd.f32 %v3061_v50, %v3048_v1 }
 0x200   : > { %v10228_v15 = vld [vmem:[%s11179_s5 + $0xb9c] sm:$0xf]  ;;  %3346 = vmatpush.bf16.msrb.mxu0 %v7546_v17  ;;  %3374 = vmatpush.bf16.msrb.mxu2 %v8058_v38  ;;  %v8026_v44 = vor.u32 %v10164_v21, %v8023_v51  ;;  %v3049_v3 = vpop.f32.mrf.mxu2  ;;  %v3451_v17 = vadd.f32 %v3435_v53, %v12067_v60 }
 0x201   : > { %v8279_v31 = vld [vmem:[%s11179_s5 + $0xbb8] sm:$0xf0]  ;;  %3312 = vmatmul.bf16.vlgmr.msra.gmra.mxu1 %v11354_v40  ;;  %3340 = vmatmul.bf16.vlgmr.msra.gmra.mxu3 %v11290_v7  ;;  %v3443_v7 = vmul.f32 0.044715, %v3427_v56 }
 0x202   : > { %3360 = vmatpush.bf16.msrb.mxu1 %v7802_v13  ;;  %v10028_v22 = vld [vmem:[%s11179_s5 + $0x55c] sm:$0xf]  ;;  %3388 = vmatpush.bf16.msrb.mxu3 %v8314_v30  ;;  %v8282_v37 = vor.u32 %v10228_v15, %v8279_v31  ;;  %v3036_v13 = vadd.f32 %v3035_v39, %v3022_v57  ;;  %v3063_v15 = vpop.f32.mrf.mxu3  ;;  %v12155_v50 = vmul.f32 0.7978846, %v3451_v17 }
 0x203   : > { %v7479_v49 = vld [vmem:[%s11179_s5 + $0x578] sm:$0xf0] }
 0x204   : > { %v10092_v11 = vld [vmem:[%s11179_s5 + $0x75c] sm:$0xf]  ;;  %3347 = vmatpush.bf16.msrb.mxu0 %v7514_v26  ;;  %v7482_v10 = vor.u32 %v10028_v22, %v7479_v49  ;;  %3375 = vmatpush.bf16.msrb.mxu2 %v8026_v44  ;;  %v3050_v52 = vadd.f32 %v3049_v3, %v3036_v13  ;;  %v3459_v26 = vadd.f32 %v3443_v7, %v12088_v55  ;;  %10736 = vtanh.f32 %v12155_v50  ;;  %v10424_v50 = vld [vmem:[%s11187_s29 + $0x5b4] sm:$0xf0] }
 0x205   : > { %v7735_v18 = vld [vmem:[%s11179_s5 + $0x778] sm:$0xf0]  ;;  %v3452_v44 = vadd.f32 %v3436_v16, %v12091_v19  ;;  %v3428_v22 = vmul.f32 %v3412_v28, %v12133_v62  ;;  %v3405_v49 = vmul.f32 %v12147_v35, %v12147_v35  ;;  %v12187_v16 = vpop.f32.mrf.mxu1  ;;  %v12190_v28 = vmul.f32 0.5, %v12130_v61 }
 0x206   : > { %v10156_v8 = vld [vmem:[%s11179_s5 + $0x95c] sm:$0xf]  ;;  %3361 = vmatpush.bf16.msrb.mxu1 %v7770_v4  ;;  %v7738_v58 = vor.u32 %v10092_v11, %v7735_v18  ;;  %3389 = vmatpush.bf16.msrb.mxu3 %v8282_v37  ;;  %v12164_v37 = vadd.f32 %v3063_v15, %v3050_v52  ;;  %v12172_v1 = vmul.f32 0.7978846, %v3459_v26 }
 0x207   : > { %v7991_v54 = vld [vmem:[%s11179_s5 + $0x978] sm:$0xf0] }
 0x208   : > { %v10220_v59 = vld [vmem:[%s11179_s5 + $0xb5c] sm:$0xf]  ;;  %v7994_v27 = vor.u32 %v10156_v8, %v7991_v54  ;;  %3348 = vmatpush.bf16.msrb.mxu0 %v7482_v10  ;;  %10738 = vtanh.f32 %v12172_v1 }
 0x209   : > { %v8247_v20 = vld [vmem:[%s11179_s5 + $0xb78] sm:$0xf0] }
 0x20a   : > { %v10020_v29 = vld [vmem:[%s11179_s5 + $0x51c] sm:$0xf]  ;;  %v8250_v5 = vor.u32 %v10220_v59, %v8247_v20  ;;  %3362 = vmatpush.bf16.msrb.mxu1 %v7738_v58  ;;  %3376 = vmatpush.bf16.msrb.mxu2 %v7994_v27  ;;  %v12176_v58 = vmul.f32 0.7978846, %v3452_v44  ;;  %v3444_v27 = vmul.f32 0.044715, %v3428_v22 }
 0x20b   : > { %v7447_v46 = vld [vmem:[%s11179_s5 + $0x538] sm:$0xf0]  ;;  %v8485_v44 = vld [vmem:[%s11187_s29 + $0x150] sm:$0xf]  ;;  %v10286_v22 = vld [vmem:[%s11187_s29 + $0x164] sm:$0xf0] }
 0x20c   : > { %v10084_v47 = vld [vmem:[%s11179_s5 + $0x71c] sm:$0xf]  ;;  %v7450_v30 = vor.u32 %v10020_v29, %v7447_v46  ;;  %3390 = vmatpush.bf16.msrb.mxu3 %v8250_v5  ;;  %v3421_v29 = vmul.f32 %v3405_v49, %v12147_v35  ;;  %v8677_v49 = vld [vmem:[%s11187_s29 + $0x2d0] sm:$0xf]  ;;  %10740 = vtanh.f32 %v12176_v58 }
 0x20d   : > { %v7703_v6 = vld [vmem:[%s11179_s5 + $0x738] sm:$0xf0] }
 0x20e   : > { %v10148_v14 = vld [vmem:[%s11179_s5 + $0x91c] sm:$0xf]  ;;  %v7706_v21 = vor.u32 %v10084_v47, %v7703_v6  ;;  %3349 = vmatpush.bf16.msrb.mxu0 %v7450_v30  ;;  %v3413_v47 = vmul.f32 %v12164_v37, %v12164_v37  ;;  %v3075_v6 = vpop.f32.mrf.mxu0  ;;  %v798_v30 = vperm.slane %v11957_v45, 4  ;;  %v8821_v45 = vld [vmem:[%s11187_s29 + $0x3f0] sm:$0xf] }
 0x20f   : > { %v7959_v63 = vld [vmem:[%s11179_s5 + $0x938] sm:$0xf0] }
 0x210   : > { %v10212_v38 = vld [vmem:[%s11179_s5 + $0xb1c] sm:$0xf]  ;;  %v7962_v51 = vor.u32 %v10148_v14, %v7959_v63  ;;  %3363 = vmatpush.bf16.msrb.mxu1 %v7706_v21  ;;  %v3429_v61 = vmul.f32 %v3413_v47, %v12164_v37  ;;  %v8486_v47 = vor.u32 %v10286_v22, %v8485_v44  ;;  %v10418_v44 = vld [vmem:[%s11187_s29 + $0x584] sm:$0xf0] }
 0x211   : > { %v8215_v12 = vld [vmem:[%s11179_s5 + $0xb38] sm:$0xf0] }
 0x212   : > { %v10012_v42 = vld [vmem:[%s11179_s5 + $0x4dc] sm:$0xf]  ;;  %v8218_v31 = vor.u32 %v10212_v38, %v8215_v12  ;;  %3377 = vmatpush.bf16.msrb.mxu2 %v7962_v51  ;;  %v3437_v51 = vmul.f32 0.044715, %v3421_v29  ;;  %v3076_v29 = vadd.f32 %v3075_v6, %v798_v30 }
 0x213   : > { %v7415_v25 = vld [vmem:[%s11179_s5 + $0x4f8] sm:$0xf0] }
 0x214   : > { %v10076_v48 = vld [vmem:[%s11179_s5 + $0x6dc] sm:$0xf]  ;;  %v7418_v11 = vor.u32 %v10012_v42, %v7415_v25  ;;  %3391 = vmatpush.bf16.msrb.mxu3 %v8218_v31 }
 0x215   : > { %v7671_v33 = vld [vmem:[%s11179_s5 + $0x6f8] sm:$0xf0] }
 0x216   : > { %v10140_v34 = vld [vmem:[%s11179_s5 + $0x8dc] sm:$0xf]  ;;  %v7674_v18 = vor.u32 %v10076_v48, %v7671_v33  ;;  %3350 = vmatpush.bf16.msrb.mxu0 %v7418_v11 }
 0x217   : > { %v7927_v41 = vld [vmem:[%s11179_s5 + $0x8f8] sm:$0xf0] }
 0x218   : > { %v10204_v43 = vld [vmem:[%s11179_s5 + $0xadc] sm:$0xf]  ;;  %v7930_v8 = vor.u32 %v10140_v34, %v7927_v41  ;;  %3364 = vmatpush.bf16.msrb.mxu1 %v7674_v18  ;;  %v10334_v18 = vld [vmem:[%s11187_s29 + $0x2e4] sm:$0xf0] }
 0x219   : > { %v8183_v4 = vld [vmem:[%s11179_s5 + $0xaf8] sm:$0xf0] }
 0x21a   : > { %v10004_v54 = vld [vmem:[%s11179_s5 + $0x49c] sm:$0xf]  ;;  %v8186_v2 = vor.u32 %v10204_v43, %v8183_v4  ;;  %3378 = vmatpush.bf16.msrb.mxu2 %v7930_v8  ;;  %v8869_v8 = vld [vmem:[%s11187_s29 + $0x450] sm:$0xf] }
 0x21b   : > { %v7383_v53 = vld [vmem:[%s11179_s5 + $0x4b8] sm:$0xf0] }
 0x21c   : > { %v10068_v56 = vld [vmem:[%s11179_s5 + $0x69c] sm:$0xf]  ;;  %v7386_v46 = vor.u32 %v10004_v54, %v7383_v53  ;;  %3392 = vmatpush.bf16.msrb.mxu3 %v8186_v2  ;;  %v10382_v54 = vld [vmem:[%s11187_s29 + $0x464] sm:$0xf0]  ;;  %v3445_v53 = vmul.f32 0.044715, %v3429_v61 }
 0x21d   : > { %v7639_v57 = vld [vmem:[%s11179_s5 + $0x6b8] sm:$0xf0] }
 0x21e   : > { %v10132_v59 = vld [vmem:[%s11179_s5 + $0x89c] sm:$0xf]  ;;  %v7642_v3 = vor.u32 %v10068_v56, %v7639_v57  ;;  %3351 = vmatpush.bf16.msrb.mxu0 %v7386_v46  ;;  %v9061_v57 = vld [vmem:[%s11187_s29 + $0x5d0] sm:$0xf] }
 0x21f   : > { %v7895_v20 = vld [vmem:[%s11179_s5 + $0x8b8] sm:$0xf0] }
 0x220   : > { %v10196_v39 = vld [vmem:[%s11179_s5 + $0xa9c] sm:$0xf]  ;;  %v7898_v5 = vor.u32 %v10132_v59, %v7895_v20  ;;  %3365 = vmatpush.bf16.msrb.mxu1 %v7642_v3  ;;  %v10430_v59 = vld [vmem:[%s11187_s29 + $0x5e4] sm:$0xf0]  ;;  %v3103_v20 = vpop.f32.mrf.mxu2  ;;  %v8678_v3 = vor.u32 %v10334_v18, %v8677_v49 }
 0x221   : > { %v8151_v10 = vld [vmem:[%s11179_s5 + $0xab8] sm:$0xf0] }
 0x222   : > { %v9996_v14 = vld [vmem:[%s11179_s5 + $0x45c] sm:$0xf]  ;;  %v8154_v7 = vor.u32 %v10196_v39, %v8151_v10  ;;  %3379 = vmatpush.bf16.msrb.mxu2 %v7898_v5  ;;  %v10735_v39 = vpop.eup %10734  ;;  %v3460_v10 = vadd.f32 %v3444_v27, %v12133_v62  ;;  %v8870_v5 = vor.u32 %v10382_v54, %v8869_v8  ;;  %v10328_v27 = vld [vmem:[%s11187_s29 + $0x2b4] sm:$0xf0]  ;;  %v8413_v8 = vld [vmem:[%s11187_s29 + $0xc0] sm:$0xf] }
 0x223   : > { %v7351_v63 = vld [vmem:[%s11179_s5 + $0x478] sm:$0xf0]  ;;  %v3506_v6 = vadd.f32 1.0, %v10735_v39  ;;  %v10737_v22 = vpop.eup %10736  ;;  %v10268_v54 = vld [vmem:[%s11187_s29 + $0xd4] sm:$0xf0] }
 0x224   : > { %v10060_v17 = vld [vmem:[%s11179_s5 + $0x65c] sm:$0xf]  ;;  %v7354_v42 = vor.u32 %v9996_v14, %v7351_v63  ;;  %3393 = vmatpush.bf16.msrb.mxu3 %v8154_v7  ;;  %v3077_v14 = vpop.f32.mrf.mxu0  ;;  %v8461_v63 = vld [vmem:[%s11187_s29 + $0x120] sm:$0xf]  ;;  %v3476_v61 = vmul.f32 0.7978846, %v3460_v10  ;;  %v10739_v18 = vpop.eup %10738 }
 0x225   : > { %v7607_v13 = vld [vmem:[%s11179_s5 + $0x678] sm:$0xf0]  ;;  %v8653_v7 = vld [vmem:[%s11187_s29 + $0x2a0] sm:$0xf]  ;;  %v3078_v1 = vadd.f32 %v3077_v14, %v798_v30  ;;  %v3499_v39 = vadd.f32 1.0, %v10737_v22  ;;  %v8414_v14 = vor.u32 %v10268_v54, %v8413_v8 }
 0x226   : > { %v10124_v38 = vld [vmem:[%s11179_s5 + $0x85c] sm:$0xf]  ;;  %v7610_v15 = vor.u32 %v10060_v17, %v7607_v13  ;;  %3352 = vmatpush.bf16.msrb.mxu0 %v7354_v42  ;;  %v10280_v17 = vld [vmem:[%s11187_s29 + $0x134] sm:$0xf0]  ;;  %v9062_v13 = vor.u32 %v10430_v59, %v9061_v57  ;;  %v3461_v42 = vadd.f32 %v3445_v53, %v12164_v37  ;;  %v8605_v53 = vld [vmem:[%s11187_s29 + $0x240] sm:$0xf]  ;;  %10742 = vtanh.f32 %v3476_v61 }
 0x227   : > { %v7863_v12 = vld [vmem:[%s11179_s5 + $0x878] sm:$0xf0]  ;;  %v8797_v57 = vld [vmem:[%s11187_s29 + $0x3c0] sm:$0xf]  ;;  %v10364_v59 = vld [vmem:[%s11187_s29 + $0x3d4] sm:$0xf0] }
 0x228   : > { %v10188_v52 = vld [vmem:[%s11179_s5 + $0xa5c] sm:$0xf]  ;;  %v7866_v31 = vor.u32 %v10124_v38, %v7863_v12  ;;  %3366 = vmatpush.bf16.msrb.mxu1 %v7610_v15  ;;  %v8845_v38 = vld [vmem:[%s11187_s29 + $0x420] sm:$0xf]  ;;  %v10376_v12 = vld [vmem:[%s11187_s29 + $0x434] sm:$0xf0]  ;;  %v3090_v15 = vadd.f32 %v12187_v16, %v3076_v29 }
 0x229   : > { %v8119_v21 = vld [vmem:[%s11179_s5 + $0xa78] sm:$0xf0]  ;;  %v3477_v30 = vmul.f32 0.7978846, %v3461_v42  ;;  %v8989_v29 = vld [vmem:[%s11187_s29 + $0x540] sm:$0xf] }
 0x22a   : > { %v9988_v25 = vld [vmem:[%s11179_s5 + $0x41c] sm:$0xf]  ;;  %v8122_v41 = vor.u32 %v10188_v52, %v8119_v21  ;;  %3380 = vmatpush.bf16.msrb.mxu2 %v7866_v31  ;;  %v3091_v52 = vpop.f32.mrf.mxu1  ;;  %v3453_v21 = vadd.f32 %v3437_v51, %v12147_v35  ;;  %v8462_v51 = vor.u32 %v10280_v17, %v8461_v63  ;;  %v8654_v31 = vor.u32 %v10328_v27, %v8653_v7  ;;  %v8389_v27 = vld [vmem:[%s11187_s29 + $0x90] sm:$0xf]  ;;  %v10352_v22 = vld [vmem:[%s11187_s29 + $0x374] sm:$0xf0] }
 0x22b   : > { %v7319_v48 = vld [vmem:[%s11179_s5 + $0x438] sm:$0xf0]  ;;  %v3104_v58 = vadd.f32 %v3103_v20, %v3090_v15  ;;  %v12250_v20 = vmul.f32 0.5, %v3506_v6  ;;  %10744 = vtanh.f32 %v3477_v30  ;;  %v8773_v42 = vld [vmem:[%s11187_s29 + $0x390] sm:$0xf] }
 0x22c   : > { %v10052_v32 = vld [vmem:[%s11179_s5 + $0x61c] sm:$0xf]  ;;  %v7322_v11 = vor.u32 %v9988_v25, %v7319_v48  ;;  %3394 = vmatpush.bf16.msrb.mxu3 %v8122_v41  ;;  %v9037_v25 = vld [vmem:[%s11187_s29 + $0x5a0] sm:$0xf]  ;;  %v3117_v48 = vpop.f32.mrf.mxu3  ;;  %v8629_v41 = vld [vmem:[%s11187_s29 + $0x270] sm:$0xf]  ;;  %v3131_v10 = vpop.f32.mrf.mxu0 }
 0x22d   : > { %v7575_v33 = vld [vmem:[%s11179_s5 + $0x638] sm:$0xf0]  ;;  %v9038_v16 = vor.u32 %v10424_v50, %v9037_v25  ;;  %v3469_v49 = vmul.f32 0.7978846, %v3453_v21  ;;  %v10310_v21 = vld [vmem:[%s11187_s29 + $0x224] sm:$0xf0] }
 0x22e   : > { %v10116_v34 = vld [vmem:[%s11179_s5 + $0x81c] sm:$0xf]  ;;  %v7578_v56 = vor.u32 %v10052_v32, %v7575_v33  ;;  %3353 = vmatpush.bf16.msrb.mxu0 %v7322_v11  ;;  %v8846_v32 = vor.u32 %v10376_v12, %v8845_v38  ;;  %v8437_v33 = vld [vmem:[%s11187_s29 + $0xf0] sm:$0xf]  ;;  %v10262_v38 = vld [vmem:[%s11187_s29 + $0xa4] sm:$0xf0] }
 0x22f   : > { %v7831_v26 = vld [vmem:[%s11179_s5 + $0x838] sm:$0xf0]  ;;  %v8581_v12 = vld [vmem:[%s11187_s29 + $0x210] sm:$0xf]  ;;  %10746 = vtanh.f32 %v3469_v49  ;;  %v10358_v25 = vld [vmem:[%s11187_s29 + $0x3a4] sm:$0xf0] }
 0x230   : > { %v10180_v43 = vld [vmem:[%s11179_s5 + $0xa1c] sm:$0xf]  ;;  %v7834_v2 = vor.u32 %v10116_v34, %v7831_v26  ;;  %3367 = vmatpush.bf16.msrb.mxu1 %v7578_v56  ;;  %v10274_v34 = vld [vmem:[%s11187_s29 + $0x104] sm:$0xf0]  ;;  %v3105_v56 = vpop.f32.mrf.mxu2  ;;  %v12260_v50 = vmul.f32 0.5, %v3499_v39 }
 0x231   : > { %v8087_v4 = vld [vmem:[%s11179_s5 + $0xa38] sm:$0xf0]  ;;  %3354 = vmatmul.bf16.vlgmr.msrb.gmra.mxu0 %v11300_v23  ;;  %v10322_v26 = vld [vmem:[%s11187_s29 + $0x284] sm:$0xf0]  ;;  %v3092_v23 = vadd.f32 %v3091_v52, %v3078_v1  ;;  %v8438_v11 = vor.u32 %v10274_v34, %v8437_v33  ;;  %v8965_v61 = vld [vmem:[%s11187_s29 + $0x510] sm:$0xf] }
 0x232   : > { %v8090_v46 = vor.u32 %v10180_v43, %v8087_v4  ;;  %3381 = vmatpush.bf16.msrb.mxu2 %v7834_v2  ;;  %5870 = vmatpush.bf16.msra.mxu0 %v8486_v47  ;;  %v10370_v43 = vld [vmem:[%s11187_s29 + $0x404] sm:$0xf0]  ;;  %v9013_v4 = vld [vmem:[%s11187_s29 + $0x570] sm:$0xf]  ;;  %v10316_v2 = vld [vmem:[%s11187_s29 + $0x254] sm:$0xf0]  ;;  %v10741_v47 = vpop.eup %10740  ;;  %v3145_v63 = vpop.f32.mrf.mxu1 }
 0x233   : > { %3368 = vmatmul.bf16.vlgmr.msrb.gmra.mxu1 %v11302_v24  ;;  %v8630_v24 = vor.u32 %v10322_v26, %v8629_v41  ;;  %v3106_v17 = vadd.f32 %v3105_v56, %v3092_v23  ;;  %v8606_v7 = vor.u32 %v10316_v2, %v8605_v53  ;;  %v10406_v15 = vld [vmem:[%s11187_s29 + $0x524] sm:$0xf0]  ;;  %v10743_v1 = vpop.eup %10742  ;;  %v8582_v41 = vor.u32 %v10310_v21, %v8581_v12  ;;  %v8365_v26 = vld [vmem:[%s11187_s29 + $0x60] sm:$0xf]  ;;  %v8533_v39 = vld [vmem:[%s11187_s29 + $0x1b0] sm:$0xf] }
 0x234   : > { %3395 = vmatpush.bf16.msrb.mxu3 %v8090_v46  ;;  %5884 = vmatpush.bf16.msra.mxu1 %v8678_v3  ;;  %v10412_v46 = vld [vmem:[%s11187_s29 + $0x554] sm:$0xf0]  ;;  %v3507_v3 = vadd.f32 1.0, %v10739_v18  ;;  %v3119_v52 = vpop.f32.mrf.mxu3  ;;  %v10745_v34 = vpop.eup %10744  ;;  %v8966_v30 = vor.u32 %v10406_v15, %v8965_v61  ;;  %v3508_v23 = vadd.f32 1.0, %v10743_v1  ;;  %v8317_v12 = vld [vmem:[%s11187_s29] sm:$0xf] }
 0x235   : > { %3382 = vmatmul.bf16.vlgmr.msrb.gmra.mxu2 %v11349_v36  ;;  %v8822_v36 = vor.u32 %v10370_v43, %v8821_v45  ;;  %v8990_v6 = vor.u32 %v10412_v46, %v8989_v29  ;;  %v3120_v33 = vadd.f32 %v3119_v52, %v3106_v17  ;;  %v10256_v45 = vld [vmem:[%s11187_s29 + $0x74] sm:$0xf0]  ;;  %v8557_v43 = vld [vmem:[%s11187_s29 + $0x1e0] sm:$0xf]  ;;  %v10298_v46 = vld [vmem:[%s11187_s29 + $0x1c4] sm:$0xf0] }
 0x236   : > { %5898 = vmatpush.bf16.msra.mxu2 %v8870_v5  ;;  %5871 = vmatpush.bf16.msra.mxu0 %v8462_v51  ;;  %v3118_v5 = vadd.f32 %v3117_v48, %v3104_v58  ;;  %v3500_v48 = vadd.f32 1.0, %v10741_v47  ;;  %v12264_v51 = vmul.f32 0.5, %v3507_v3  ;;  %v3133_v58 = vpop.f32.mrf.mxu0  ;;  %v10400_v18 = vld [vmem:[%s11187_s29 + $0x4f4] sm:$0xf0]  ;;  %v8366_v53 = vor.u32 %v10256_v45, %v8365_v26  ;;  %v8725_v47 = vld [vmem:[%s11187_s29 + $0x330] sm:$0xf] }
 0x237   : > { %3396 = vmatmul.bf16.vlgmr.msrb.gmra.mxu3 %v11354_v40  ;;  %v9014_v40 = vor.u32 %v10418_v44, %v9013_v4  ;;  %v10304_v4 = vld [vmem:[%s11187_s29 + $0x1f4] sm:$0xf0]  ;;  %v8749_v44 = vld [vmem:[%s11187_s29 + $0x360] sm:$0xf]  ;;  %v3134_v54 = vadd.f32 %v3133_v58, %v3120_v33  ;;  %v10346_v3 = vld [vmem:[%s11187_s29 + $0x344] sm:$0xf0]  ;;  %v8534_v52 = vor.u32 %v10298_v46, %v8533_v39 }
 0x238   : > { %5912 = vmatpush.bf16.msra.mxu3 %v9062_v13  ;;  %5885 = vmatpush.bf16.msra.mxu1 %v8654_v31  ;;  %v8798_v13 = vor.u32 %v10364_v59, %v8797_v57  ;;  %v3132_v31 = vadd.f32 %v3131_v10, %v3118_v5  ;;  %v12272_v49 = vmul.f32 0.5, %v3500_v48  ;;  %v8750_v2 = vor.u32 %v10352_v22, %v8749_v44  ;;  %v8341_v57 = vld [vmem:[%s11187_s29 + $0x30] sm:$0xf]  ;;  %v10250_v59 = vld [vmem:[%s11187_s29 + $0x44] sm:$0xf0]  ;;  %v3159_v44 = vpop.f32.mrf.mxu2 }
 0x239   : > { %v3524_v5 = vmul.f32 0.5, %v3508_v23  ;;  %v10394_v17 = vld [vmem:[%s11187_s29 + $0x4c4] sm:$0xf0]  ;;  %v10244_v21 = vld [vmem:[%s11187_s29 + $0x14] sm:$0xf0]  ;;  %v3539_v26 = vmul.f32 %v12264_v51, %v12088_v55 }
 0x23a   : > { %5899 = vmatpush.bf16.msra.mxu2 %v8846_v32  ;;  %5872 = vmatpush.bf16.msra.mxu0 %v8438_v11  ;;  %v8390_v32 = vor.u32 %v10262_v38, %v8389_v27  ;;  %v8941_v11 = vld [vmem:[%s11187_s29 + $0x4e0] sm:$0xf]  ;;  %v12276_v8 = vadd.f32 %v3145_v63, %v3132_v31  ;;  %v3147_v56 = vpop.f32.mrf.mxu1  ;;  %v8917_v63 = vld [vmem:[%s11187_s29 + $0x4b0] sm:$0xf]  ;;  %v8342_v38 = vor.u32 %v10250_v59, %v8341_v57  ;;  %v10340_v1 = vld [vmem:[%s11187_s29 + $0x314] sm:$0xf0] }
 0x23b   : > { %v8942_v10 = vor.u32 %v10400_v18, %v8941_v11  ;;  %v12281_v29 = vadd.f32 %v3147_v56, %v3134_v54  ;;  %v8918_v61 = vor.u32 %v10394_v17, %v8917_v63  ;;  %v8701_v15 = vld [vmem:[%s11187_s29 + $0x300] sm:$0xf]  ;;  %v10388_v33 = vld [vmem:[%s11187_s29 + $0x494] sm:$0xf0]  ;;  %v3540_v22 = vmul.f32 %v3524_v5, %v12133_v62  ;;  %v9205_v46 = vld [vmem:[%s11187_s29 + $0x6f0] sm:$0xf] }
 0x23c   : > { %5913 = vmatpush.bf16.msra.mxu3 %v9038_v16  ;;  %5886 = vmatpush.bf16.msra.mxu1 %v8630_v24  ;;  %v8774_v16 = vor.u32 %v10358_v25, %v8773_v42  ;;  %v10747_v24 = vpop.eup %10746  ;;  %v8509_v42 = vld [vmem:[%s11187_s29 + $0x180] sm:$0xf]  ;;  %v10292_v25 = vld [vmem:[%s11187_s29 + $0x194] sm:$0xf0]  ;;  %v3531_v62 = vmul.f32 %v12260_v50, %v12067_v60  ;;  %v3532_v18 = vmul.f32 %v12272_v49, %v12091_v19  ;;  %v10514_v5 = vld [vmem:[%s11187_s29 + $0x884] sm:$0xf0] }
 0x23d   : > { %v3414_v27 = vmul.f32 %v12281_v29, %v12281_v29  ;;  %v8893_v31 = vld [vmem:[%s11187_s29 + $0x480] sm:$0xf]  ;;  %v12314_v58 = vld [vmem:[%s11185_s10] sm:$0xff] }
 0x23e   : > { %5900 = vmatpush.bf16.msra.mxu2 %v8822_v36  ;;  %5873 = vmatpush.bf16.msra.mxu0 %v8414_v14  ;;  %v3509_v36 = vadd.f32 1.0, %v10745_v34  ;;  %v3501_v14 = vadd.f32 1.0, %v10747_v24  ;;  %v9253_v34 = vld [vmem:[%s11187_s29 + $0x750] sm:$0xf]  ;;  %v8894_v51 = vor.u32 %v10388_v33, %v8893_v31  ;;  %v799_v11 = vperm.slane %v12314_v58, 5 }
 0x23f   : > { %v3430_v48 = vmul.f32 %v3414_v27, %v12281_v29  ;;  %v9229_v54 = vld [vmem:[%s11187_s29 + $0x720] sm:$0xf]  ;;  %v10520_v57 = vld [vmem:[%s11187_s29 + $0x8b4] sm:$0xf0]  ;;  %v12328_v59 = vpack.c.bf16 %v3539_v26, %v3531_v62  ;;  %v12330_v39 = vpack.c.bf16 %v3540_v22, %v3532_v18  ;;  %v9157_v31 = vld [vmem:[%s11187_s29 + $0x690] sm:$0xf] }
 0x240   : > { %5914 = vmatpush.bf16.msra.mxu3 %v9014_v40  ;;  %5887 = vmatpush.bf16.msra.mxu1 %v8606_v7  ;;  %v8558_v40 = vor.u32 %v10304_v4, %v8557_v43  ;;  %v3525_v7 = vmul.f32 0.5, %v3509_v36  ;;  %v8318_v43 = vor.u32 %v10244_v21, %v8317_v12  ;;  %v10526_v4 = vld [vmem:[%s11187_s29 + $0x8e4] sm:$0xf0]  ;;  %v10460_v12 = vld [vmem:[%s11187_s29 + $0x6d4] sm:$0xf0] }
 0x241   : > { %v3446_v55 = vmul.f32 0.044715, %v3430_v48  ;;  %v10508_v21 = vld [vmem:[%s11187_s29 + $0x854] sm:$0xf0]  ;;  %v9349_v33 = vld [vmem:[%s11187_s29 + $0x810] sm:$0xf] }
 0x242   : > { %5901 = vmatpush.bf16.msra.mxu2 %v8798_v13  ;;  %5874 = vmatpush.bf16.msra.mxu0 %v8390_v32  ;;  %v3406_v13 = vmul.f32 %v12276_v8, %v12276_v8  ;;  %v3530_v32 = vmul.f32 %v12190_v28, %v11666_v9  ;;  %v3517_v9 = vmul.f32 0.5, %v3501_v14  ;;  %v8510_v28 = vor.u32 %v10292_v25, %v8509_v42  ;;  %v3187_v42 = vpop.f32.mrf.mxu0  ;;  %v9325_v22 = vld [vmem:[%s11187_s29 + $0x7e0] sm:$0xf]  ;;  %v9109_v62 = vld [vmem:[%s11187_s29 + $0x630] sm:$0xf] }
 0x243   : > { %v3541_v24 = vmul.f32 %v3525_v7, %v12164_v37  ;;  %v3462_v19 = vadd.f32 %v3446_v55, %v12281_v29  ;;  %v3160_v37 = vadd.f32 %v3159_v44, %v799_v11  ;;  %v3161_v7 = vpop.f32.mrf.mxu2  ;;  %v9637_v55 = vld [vmem:[%s11187_s29 + $0xa50] sm:$0xf] }
 0x244   : > { %5915 = vmatpush.bf16.msra.mxu3 %v8990_v6  ;;  %5888 = vmatpush.bf16.msra.mxu1 %v8582_v41  ;;  %v8726_v6 = vor.u32 %v10346_v3, %v8725_v47  ;;  %v10478_v41 = vld [vmem:[%s11187_s29 + $0x764] sm:$0xf0]  ;;  %v3422_v45 = vmul.f32 %v3406_v13, %v12276_v8  ;;  %v3533_v60 = vmul.f32 %v3517_v9, %v12147_v35  ;;  %v9397_v3 = vld [vmem:[%s11187_s29 + $0x870] sm:$0xf]  ;;  %v10496_v9 = vld [vmem:[%s11187_s29 + $0x7f4] sm:$0xf0] }
 0x245   : > { %v9254_v23 = vor.u32 %v10478_v41, %v9253_v34  ;;  %v10466_v47 = vld [vmem:[%s11187_s29 + $0x704] sm:$0xf0]  ;;  %v3478_v14 = vmul.f32 0.7978846, %v3462_v19  ;;  %v9398_v13 = vor.u32 %v10514_v5, %v9397_v3  ;;  %v9613_v19 = vld [vmem:[%s11187_s29 + $0xa20] sm:$0xf] }
 0x246   : > { %5902 = vmatpush.bf16.msra.mxu2 %v8774_v16  ;;  %5875 = vmatpush.bf16.msra.mxu0 %v8366_v53  ;;  %v3538_v16 = vmul.f32 %v12250_v20, %v12011_v0  ;;  %v8702_v0 = vor.u32 %v10340_v1, %v8701_v15  ;;  %v3173_v20 = vpop.f32.mrf.mxu3  ;;  %v10472_v53 = vld [vmem:[%s11187_s29 + $0x734] sm:$0xf0]  ;;  %v12334_v49 = vpack.c.bf16 %v3541_v24, %v3533_v60  ;;  %v10502_v34 = vld [vmem:[%s11187_s29 + $0x824] sm:$0xf0]  ;;  %v9277_v5 = vld [vmem:[%s11187_s29 + $0x780] sm:$0xf] }
 0x247   : > { %v9230_v50 = vor.u32 %v10472_v53, %v9229_v54  ;;  %v3174_v63 = vadd.f32 %v3173_v20, %v3160_v37  ;;  %v9206_v17 = vor.u32 %v10466_v47, %v9205_v46  ;;  %10748 = vtanh.f32 %v3478_v14  ;;  %v10490_v60 = vld [vmem:[%s11187_s29 + $0x7c4] sm:$0xf0]  ;;  %v10568_v37 = vld [vmem:[%s11187_s29 + $0xa34] sm:$0xf0]  ;;  %v9085_v46 = vld [vmem:[%s11187_s29 + $0x600] sm:$0xf] }
 0x248   : > { %5916 = vmatpush.bf16.msra.mxu3 %v8966_v30  ;;  %5889 = vmatpush.bf16.msra.mxu1 %v8558_v40  ;;  %v9445_v30 = vld [vmem:[%s11187_s29 + $0x8d0] sm:$0xf]  ;;  %v12324_v56 = vpack.c.bf16 %v3538_v16, %v3530_v32  ;;  %v3438_v40 = vmul.f32 0.044715, %v3422_v45  ;;  %v3162_v15 = vadd.f32 %v3161_v7, %v799_v11  ;;  %v10454_v32 = vld [vmem:[%s11187_s29 + $0x6a4] sm:$0xf0]  ;;  %v9350_v45 = vor.u32 %v10502_v34, %v9349_v33 }
 0x249   : > { %v9446_v36 = vor.u32 %v10526_v4, %v9445_v30  ;;  %v3188_v25 = vadd.f32 %v3187_v42, %v3174_v63  ;;  %v9158_v16 = vor.u32 %v10454_v32, %v9157_v31  ;;  %v10448_v30 = vld [vmem:[%s11187_s29 + $0x674] sm:$0xf0]  ;;  %v9326_v53 = vor.u32 %v10496_v9, %v9325_v22  ;;  %v9565_v9 = vld [vmem:[%s11187_s29 + $0x9c0] sm:$0xf] }
 0x24a   : > { %5903 = vmatpush.bf16.msra.mxu2 %v8750_v2  ;;  %5876 = vmatpush.bf16.msra.mxu0 %v8342_v38  ;;  %v9421_v2 = vld [vmem:[%s11187_s29 + $0x8a0] sm:$0xf]  ;;  %v3454_v35 = vadd.f32 %v3438_v40, %v12276_v8  ;;  %v10442_v40 = vld [vmem:[%s11187_s29 + $0x644] sm:$0xf0]  ;;  %v9614_v47 = vor.u32 %v10568_v37, %v9613_v19  ;;  %v10436_v3 = vld [vmem:[%s11187_s29 + $0x614] sm:$0xf0] }
 0x24b   : > { %v9181_v38 = vld [vmem:[%s11187_s29 + $0x6c0] sm:$0xf]  ;;  %v3215_v44 = vpop.f32.mrf.mxu2  ;;  %v10484_v14 = vld [vmem:[%s11187_s29 + $0x794] sm:$0xf0]  ;;  %v9086_v31 = vor.u32 %v10436_v3, %v9085_v46  ;;  %v8415_v37 = vld [vmem:[%s11187_s29 + $0xd8] sm:$0xf0] }
 0x24c   : > { %5917 = vmatpush.bf16.msra.mxu3 %v8942_v10  ;;  %5890 = vmatpush.bf16.msra.mxu1 %v8534_v52  ;;  %v9422_v10 = vor.u32 %v10520_v57, %v9421_v2  ;;  %v3470_v52 = vmul.f32 0.7978846, %v3454_v35  ;;  %v9182_v48 = vor.u32 %v10460_v12, %v9181_v38  ;;  %v9301_v2 = vld [vmem:[%s11187_s29 + $0x7b0] sm:$0xf]  ;;  %v9110_v35 = vor.u32 %v10442_v40, %v9109_v62  ;;  %v8487_v38 = vld [vmem:[%s11187_s29 + $0x168] sm:$0xf0] }
 0x24d   : > { %v10749_v4 = vpop.eup %10748  ;;  %v9278_v32 = vor.u32 %v10484_v14, %v9277_v5  ;;  %v10319_v62 = vld [vmem:[%s11187_s29 + $0x274] sm:$0xf] }
 0x24e   : > { %5904 = vmatpush.bf16.msra.mxu2 %v8726_v6  ;;  %5877 = vmatpush.bf16.msra.mxu0 %v8318_v43  ;;  %v3175_v27 = vpop.f32.mrf.mxu3  ;;  %v9373_v6 = vld [vmem:[%s11187_s29 + $0x840] sm:$0xf]  ;;  %10750 = vtanh.f32 %v3470_v52  ;;  %v3510_v24 = vadd.f32 1.0, %v10749_v4  ;;  %v10331_v52 = vld [vmem:[%s11187_s29 + $0x2d4] sm:$0xf] }
 0x24f   : > { %v9374_v1 = vor.u32 %v10508_v21, %v9373_v6  ;;  %v3176_v26 = vadd.f32 %v3175_v27, %v3162_v15  ;;  %v9133_v43 = vld [vmem:[%s11187_s29 + $0x660] sm:$0xf]  ;;  %v10283_v27 = vld [vmem:[%s11187_s29 + $0x154] sm:$0xf]  ;;  %v9589_v6 = vld [vmem:[%s11187_s29 + $0x9f0] sm:$0xf] }
 0x250   : > { %5918 = vmatpush.bf16.msra.mxu3 %v8918_v61  ;;  %5891 = vmatpush.bf16.msra.mxu1 %v8510_v28  ;;  %v3201_v61 = vpop.f32.mrf.mxu1  ;;  %v9134_v11 = vor.u32 %v10448_v30, %v9133_v43  ;;  %v3526_v63 = vmul.f32 0.5, %v3510_v24  ;;  %v10562_v21 = vld [vmem:[%s11187_s29 + $0xa04] sm:$0xf0]  ;;  %v8679_v15 = vld [vmem:[%s11187_s29 + $0x2e8] sm:$0xf0] }
 0x251   : > { %5878 = vmatmul.bf16.vlgmr.msra.gmra.mxu0 %v12324_v56  ;;  %v3202_v41 = vadd.f32 %v3201_v61, %v3188_v25  ;;  %v8463_v43 = vld [vmem:[%s11187_s29 + $0x138] sm:$0xf0]  ;;  %v10325_v30 = vld [vmem:[%s11187_s29 + $0x2a4] sm:$0xf] }
 0x252   : > { %5905 = vmatpush.bf16.msra.mxu2 %v8702_v0  ;;  %5926 = vmatpush.bf16.msrb.mxu0 %v9254_v23  ;;  %v3189_v0 = vpop.f32.mrf.mxu0  ;;  %v3542_v33 = vmul.f32 %v3526_v63, %v12281_v29  ;;  %v8655_v4 = vld [vmem:[%s11187_s29 + $0x2b8] sm:$0xf0] }
 0x253   : > { %5892 = vmatmul.bf16.vlgmr.msra.gmra.mxu1 %v12328_v59  ;;  %v3216_v28 = vadd.f32 %v3215_v44, %v3202_v41  ;;  %v3217_v12 = vpop.f32.mrf.mxu2 }
 0x254   : > { %5919 = vmatpush.bf16.msra.mxu3 %v8894_v51  ;;  %5940 = vmatpush.bf16.msrb.mxu1 %v9446_v36  ;;  %v10574_v51 = vld [vmem:[%s11187_s29 + $0xa64] sm:$0xf0]  ;;  %v10751_v23 = vpop.eup %10750  ;;  %v3190_v36 = vadd.f32 %v3189_v0, %v3176_v26  ;;  %v10277_v26 = vld [vmem:[%s11187_s29 + $0x124] sm:$0xf] }
 0x255   : > { %5906 = vmatmul.bf16.vlgmr.msra.gmra.mxu2 %v12330_v39  ;;  %v9638_v18 = vor.u32 %v10574_v51, %v9637_v55  ;;  %v8466_v51 = vor.u32 %v10277_v26, %v8463_v43  ;;  %v10379_v26 = vld [vmem:[%s11187_s29 + $0x454] sm:$0xf] }
 0x256   : > { %5927 = vmatpush.bf16.msrb.mxu0 %v9230_v50  ;;  %v3229_v20 = vpop.f32.mrf.mxu3  ;;  %v3502_v50 = vadd.f32 1.0, %v10751_v23  ;;  %v8658_v23 = vor.u32 %v10325_v30, %v8655_v4 }
 0x257   : > { %5920 = vmatmul.bf16.vlgmr.msra.gmra.mxu3 %v12334_v49  ;;  %v12360_v54 = vadd.f32 %v3229_v20, %v3216_v28  ;;  %5954 = vmatpush.bf16.msrb.mxu2 %v9638_v18  ;;  %v10556_v28 = vld [vmem:[%s11187_s29 + $0x9d4] sm:$0xf0]  ;;  %v8631_v18 = vld [vmem:[%s11187_s29 + $0x288] sm:$0xf0] }
 0x258   : > { %5941 = vmatpush.bf16.msrb.mxu1 %v9422_v10  ;;  %v3203_v57 = vpop.f32.mrf.mxu1  ;;  %v3518_v42 = vmul.f32 0.5, %v3502_v50  ;;  %v9566_v0 = vor.u32 %v10556_v28, %v9565_v9  ;;  %v8634_v19 = vor.u32 %v10319_v62, %v8631_v18  ;;  %v10313_v50 = vld [vmem:[%s11187_s29 + $0x244] sm:$0xf]  ;;  %v10295_v28 = vld [vmem:[%s11187_s29 + $0x1b4] sm:$0xf] }
 0x259   : > { %v3407_v10 = vmul.f32 %v12360_v54, %v12360_v54  ;;  %v3204_v7 = vadd.f32 %v3203_v57, %v3190_v36  ;;  %v9541_v36 = vld [vmem:[%s11187_s29 + $0x990] sm:$0xf]  ;;  %v8847_v62 = vld [vmem:[%s11187_s29 + $0x438] sm:$0xf0] }
 0x25a   : > { %5928 = vmatpush.bf16.msrb.mxu0 %v9206_v17  ;;  %v3534_v44 = vmul.f32 %v3518_v42, %v12276_v8  ;;  %v10271_v8 = vld [vmem:[%s11187_s29 + $0xf4] sm:$0xf]  ;;  %v3243_v9 = vpop.f32.mrf.mxu0 }
 0x25b   : > { %v3423_v17 = vmul.f32 %v3407_v10, %v12360_v54  ;;  %5955 = vmatpush.bf16.msrb.mxu2 %v9614_v47  ;;  %v8607_v10 = vld [vmem:[%s11187_s29 + $0x258] sm:$0xf0]  ;;  %v9517_v47 = vld [vmem:[%s11187_s29 + $0x960] sm:$0xf] }
 0x25c   : > { %5942 = vmatpush.bf16.msrb.mxu1 %v9398_v13  ;;  %v9302_v13 = vor.u32 %v10490_v60, %v9301_v2  ;;  %v12393_v20 = vpack.c.bf16 %v3542_v33, %v3534_v44  ;;  %v10265_v60 = vld [vmem:[%s11187_s29 + $0xc4] sm:$0xf]  ;;  %v8610_v63 = vor.u32 %v10313_v50, %v8607_v10  ;;  %v10523_v50 = vld [vmem:[%s11187_s29 + $0x8d4] sm:$0xf] }
 0x25d   : > { %v3439_v25 = vmul.f32 0.044715, %v3423_v17  ;;  %v8418_v14 = vor.u32 %v10265_v60, %v8415_v37  ;;  %v10259_v17 = vld [vmem:[%s11187_s29 + $0x94] sm:$0xf]  ;;  %v10622_v60 = vld [vmem:[%s11187_s29 + $0xbe4] sm:$0xf0] }
 0x25e   : > { %5929 = vmatpush.bf16.msrb.mxu0 %v9182_v48  ;;  %v3218_v48 = vadd.f32 %v3217_v12, %v3204_v7  ;;  %v3231_v61 = vpop.f32.mrf.mxu3  ;;  %v8391_v7 = vld [vmem:[%s11187_s29 + $0xa8] sm:$0xf0]  ;;  %v10538_v12 = vld [vmem:[%s11187_s29 + $0x944] sm:$0xf0] }
 0x25f   : > { %v3455_v34 = vadd.f32 %v3439_v25, %v12360_v54  ;;  %v10253_v25 = vld [vmem:[%s11187_s29 + $0x64] sm:$0xf]  ;;  %v9255_v37 = vld [vmem:[%s11187_s29 + $0x768] sm:$0xf0] }
 0x260   : > { %5943 = vmatpush.bf16.msrb.mxu1 %v9374_v1  ;;  %v9590_v1 = vor.u32 %v10562_v21, %v9589_v6  ;;  %v12382_v41 = vadd.f32 %v3231_v61, %v3218_v48  ;;  %v8394_v21 = vor.u32 %v10259_v17, %v8391_v7  ;;  %v8367_v48 = vld [vmem:[%s11187_s29 + $0x78] sm:$0xf0]  ;;  %v10301_v61 = vld [vmem:[%s11187_s29 + $0x1e4] sm:$0xf] }
 0x261   : > { %v3471_v22 = vmul.f32 0.7978846, %v3455_v34  ;;  %v8370_v43 = vor.u32 %v10253_v25, %v8367_v48  ;;  %v10469_v7 = vld [vmem:[%s11187_s29 + $0x724] sm:$0xf] }
 0x262   : > { %5930 = vmatpush.bf16.msrb.mxu0 %v9158_v16  ;;  %v8490_v16 = vor.u32 %v10283_v27, %v8487_v38  ;;  %5956 = vmatpush.bf16.msrb.mxu2 %v9590_v1  ;;  %v3415_v29 = vmul.f32 %v12382_v41, %v12382_v41  ;;  %v8583_v27 = vld [vmem:[%s11187_s29 + $0x228] sm:$0xf0]  ;;  %v9493_v38 = vld [vmem:[%s11187_s29 + $0x930] sm:$0xf]  ;;  %v8559_v1 = vld [vmem:[%s11187_s29 + $0x1f8] sm:$0xf0] }
 0x263   : > { %10752 = vtanh.f32 %v3471_v22  ;;  %v9494_v6 = vor.u32 %v10538_v12, %v9493_v38  ;;  %v8562_v44 = vor.u32 %v10301_v61, %v8559_v1  ;;  %v10247_v22 = vld [vmem:[%s11187_s29 + $0x34] sm:$0xf]  ;;  %v10517_v38 = vld [vmem:[%s11187_s29 + $0x8a4] sm:$0xf]  ;;  %v3271_v12 = vpop.f32.mrf.mxu2  ;;  %v8799_v61 = vld [vmem:[%s11187_s29 + $0x3d8] sm:$0xf0] }
 0x264   : > { %5944 = vmatpush.bf16.msrb.mxu1 %v9350_v45  ;;  %v8682_v45 = vor.u32 %v10331_v52, %v8679_v15  ;;  %v3431_v55 = vmul.f32 %v3415_v29, %v12382_v41  ;;  %v8343_v29 = vld [vmem:[%s11187_s29 + $0x48] sm:$0xf0]  ;;  %v10361_v48 = vld [vmem:[%s11187_s29 + $0x3c4] sm:$0xf] }
 0x265   : > { %v8346_v18 = vor.u32 %v10247_v22, %v8343_v29  ;;  %v8802_v1 = vor.u32 %v10361_v48, %v8799_v61  ;;  %v9399_v29 = vld [vmem:[%s11187_s29 + $0x888] sm:$0xf0]  ;;  %v10445_v48 = vld [vmem:[%s11187_s29 + $0x664] sm:$0xf]  ;;  %v9135_v61 = vld [vmem:[%s11187_s29 + $0x678] sm:$0xf0] }
 0x266   : > { %5931 = vmatpush.bf16.msrb.mxu0 %v9134_v11  ;;  %v8439_v11 = vld [vmem:[%s11187_s29 + $0x108] sm:$0xf0]  ;;  %5957 = vmatpush.bf16.msrb.mxu2 %v9566_v0  ;;  %v3447_v24 = vmul.f32 0.044715, %v3431_v55 }
 0x267   : > { %v8442_v57 = vor.u32 %v10271_v8, %v8439_v11  ;;  %v8535_v0 = vld [vmem:[%s11187_s29 + $0x1c8] sm:$0xf0]  ;;  %v800_v8 = vperm.slane %v12314_v58, 6  ;;  %v10373_v11 = vld [vmem:[%s11187_s29 + $0x424] sm:$0xf] }
 0x268   : > { %5945 = vmatpush.bf16.msrb.mxu1 %v9326_v53  ;;  %v10550_v53 = vld [vmem:[%s11187_s29 + $0x9a4] sm:$0xf0]  ;;  %v3463_v2 = vadd.f32 %v3447_v24, %v12382_v41  ;;  %v10241_v24 = vld [vmem:[%s11187_s29 + $0x4] sm:$0xf] }
 0x269   : > { %v9542_v40 = vor.u32 %v10550_v53, %v9541_v36  ;;  %v10753_v5 = vpop.eup %10752  ;;  %v8319_v36 = vld [vmem:[%s11187_s29 + $0x18] sm:$0xf0]  ;;  %v10289_v53 = vld [vmem:[%s11187_s29 + $0x184] sm:$0xf] }
 0x26a   : > { %5932 = vmatpush.bf16.msrb.mxu0 %v9110_v35  ;;  %v3479_v46 = vmul.f32 0.7978846, %v3463_v2  ;;  %v10544_v35 = vld [vmem:[%s11187_s29 + $0x974] sm:$0xf0]  ;;  %v3503_v52 = vadd.f32 1.0, %v10753_v5  ;;  %v8322_v5 = vor.u32 %v10241_v24, %v8319_v36 }
 0x26b   : > { %5958 = vmatpush.bf16.msrb.mxu2 %v9542_v40  ;;  %v9518_v3 = vor.u32 %v10544_v35, %v9517_v47  ;;  %v8511_v2 = vld [vmem:[%s11187_s29 + $0x198] sm:$0xf0]  ;;  %v9447_v47 = vld [vmem:[%s11187_s29 + $0x8e8] sm:$0xf0]  ;;  %v10367_v35 = vld [vmem:[%s11187_s29 + $0x3f4] sm:$0xf] }
 0x26c   : > { %5946 = vmatpush.bf16.msrb.mxu1 %v9302_v13  ;;  %10754 = vtanh.f32 %v3479_v46  ;;  %v10307_v13 = vld [vmem:[%s11187_s29 + $0x214] sm:$0xf]  ;;  %v3519_v33 = vmul.f32 0.5, %v3503_v52  ;;  %v3244_v46 = vadd.f32 %v3243_v9, %v800_v8  ;;  %v9805_v52 = vld [vmem:[%s11187_s29 + $0xba0] sm:$0xf] }
 0x26d   : > { %v8586_v42 = vor.u32 %v10307_v13, %v8583_v27  ;;  %v9231_v13 = vld [vmem:[%s11187_s29 + $0x738] sm:$0xf0]  ;;  %v9450_v27 = vor.u32 %v10523_v50, %v9447_v47  ;;  %v10355_v9 = vld [vmem:[%s11187_s29 + $0x394] sm:$0xf]  ;;  %v10598_v50 = vld [vmem:[%s11187_s29 + $0xb24] sm:$0xf0] }
 0x26e   : > { %5933 = vmatpush.bf16.msrb.mxu0 %v9086_v31  ;;  %v9469_v31 = vld [vmem:[%s11187_s29 + $0x900] sm:$0xf]  ;;  %v3535_v55 = vmul.f32 %v3519_v33, %v12360_v54  ;;  %v8850_v54 = vor.u32 %v10373_v11, %v8847_v62  ;;  %v9781_v33 = vld [vmem:[%s11187_s29 + $0xb70] sm:$0xf]  ;;  %v10457_v62 = vld [vmem:[%s11187_s29 + $0x6c4] sm:$0xf] }
 0x26f   : > { %5959 = vmatpush.bf16.msrb.mxu2 %v9518_v3  ;;  %v8823_v3 = vld [vmem:[%s11187_s29 + $0x408] sm:$0xf0]  ;;  %v10451_v47 = vld [vmem:[%s11187_s29 + $0x694] sm:$0xf] }
 0x270   : > { %5947 = vmatpush.bf16.msrb.mxu1 %v9278_v32  ;;  %v10532_v32 = vld [vmem:[%s11187_s29 + $0x914] sm:$0xf0] }
 0x271   : > { %5934 = vmatmul.bf16.vlgmr.msrb.gmra.mxu0 %v12393_v20 }
 0x272   : > { %5982 = vmatpush.bf16.msra.mxu0 %v8490_v16  ;;  %v10755_v15 = vpop.eup %10754  ;;  %v9470_v16 = vor.u32 %v10532_v32, %v9469_v31  ;;  %v9234_v31 = vor.u32 %v10469_v7, %v9231_v13  ;;  %v9351_v7 = vld [vmem:[%s11187_s29 + $0x828] sm:$0xf0]  ;;  %v10343_v13 = vld [vmem:[%s11187_s29 + $0x334] sm:$0xf] }
 0x273   : > { %5960 = vmatpush.bf16.msrb.mxu2 %v9494_v6  ;;  %v3511_v34 = vadd.f32 1.0, %v10755_v15  ;;  %v10616_v6 = vld [vmem:[%s11187_s29 + $0xbb4] sm:$0xf0]  ;;  %v3245_v15 = vpop.f32.mrf.mxu0 }
 0x274   : > { %5996 = vmatpush.bf16.msra.mxu1 %v8682_v45  ;;  %v8871_v45 = vld [vmem:[%s11187_s29 + $0x468] sm:$0xf0]  ;;  %v9806_v25 = vor.u32 %v10616_v6, %v9805_v52 }
 0x275   : > { %v8874_v30 = vor.u32 %v10379_v26, %v8871_v45  ;;  %v3527_v4 = vmul.f32 0.5, %v3511_v34  ;;  %v10610_v34 = vld [vmem:[%s11187_s29 + $0xb84] sm:$0xf0]  ;;  %v3285_v26 = vpop.f32.mrf.mxu3  ;;  %v10463_v45 = vld [vmem:[%s11187_s29 + $0x6f4] sm:$0xf] }
 0x276   : > { %5983 = vmatpush.bf16.msra.mxu0 %v8466_v51 }
 0x277   : > { %5961 = vmatpush.bf16.msrb.mxu2 %v9470_v16  ;;  %v3543_v51 = vmul.f32 %v3527_v4, %v12382_v41  ;;  %v8538_v41 = vor.u32 %v10295_v28, %v8535_v0  ;;  %v9782_v4 = vor.u32 %v10610_v34, %v9781_v33  ;;  %v8775_v28 = vld [vmem:[%s11187_s29 + $0x3a8] sm:$0xf0]  ;;  %v9327_v33 = vld [vmem:[%s11187_s29 + $0x7f8] sm:$0xf0]  ;;  %v10337_v34 = vld [vmem:[%s11187_s29 + $0x304] sm:$0xf] }
 0x278   : > { %5997 = vmatpush.bf16.msra.mxu1 %v8658_v23  ;;  %v3257_v23 = vpop.f32.mrf.mxu1  ;;  %v8778_v0 = vor.u32 %v10355_v9, %v8775_v28  ;;  %v10586_v9 = vld [vmem:[%s11187_s29 + $0xac4] sm:$0xf0] }
 0x279   : > { %v12436_v40 = vpack.c.bf16 %v3543_v51, %v3535_v55  ;;  %v9757_v51 = vld [vmem:[%s11187_s29 + $0xb40] sm:$0xf] }
 0x27a   : > { %5984 = vmatpush.bf16.msra.mxu0 %v8442_v57  ;;  %v9829_v57 = vld [vmem:[%s11187_s29 + $0xbd0] sm:$0xf] }
 0x27b   : > { %6010 = vmatpush.bf16.msra.mxu2 %v8874_v30  ;;  %v9830_v10 = vor.u32 %v10622_v60, %v9829_v57  ;;  %5948 = vmatmul.bf16.vlgmr.msrb.gmra.mxu1 %v12436_v40  ;;  %v10511_v30 = vld [vmem:[%s11187_s29 + $0x874] sm:$0xf]  ;;  %v3273_v57 = vpop.f32.mrf.mxu2 }
 0x27c   : > { %5998 = vmatpush.bf16.msra.mxu1 %v8634_v19  ;;  %v10475_v19 = vld [vmem:[%s11187_s29 + $0x754] sm:$0xf]  ;;  %v9402_v11 = vor.u32 %v10511_v30, %v9399_v29  ;;  %v9685_v29 = vld [vmem:[%s11187_s29 + $0xab0] sm:$0xf] }
 0x27d   : > { %5968 = vmatpush.bf16.msrb.mxu3 %v9830_v10  ;;  %v9258_v17 = vor.u32 %v10475_v19, %v9255_v37  ;;  %v9733_v37 = vld [vmem:[%s11187_s29 + $0xb10] sm:$0xf]  ;;  %v3299_v10 = vpop.f32.mrf.mxu0  ;;  %v10439_v30 = vld [vmem:[%s11187_s29 + $0x634] sm:$0xf] }
 0x27e   : > { %5985 = vmatpush.bf16.msra.mxu0 %v8418_v14  ;;  %v8826_v14 = vor.u32 %v10367_v35, %v8823_v3  ;;  %v9159_v35 = vld [vmem:[%s11187_s29 + $0x6a8] sm:$0xf0]  ;;  %v10499_v3 = vld [vmem:[%s11187_s29 + $0x814] sm:$0xf] }
 0x27f   : > { %6011 = vmatpush.bf16.msra.mxu2 %v8850_v54  ;;  %v9375_v54 = vld [vmem:[%s11187_s29 + $0x858] sm:$0xf0]  ;;  %v9162_v6 = vor.u32 %v10451_v47, %v9159_v35  ;;  %v9063_v47 = vld [vmem:[%s11187_s29 + $0x5e8] sm:$0xf0]  ;;  %v8685_v35 = vld [vmem:[%s11187_s29 + $0x2d8] sm:$0xf] }
 0x280   : > { %5999 = vmatpush.bf16.msra.mxu1 %v8610_v63  ;;  %v8514_v63 = vor.u32 %v10289_v53, %v8511_v2  ;;  %v3259_v32 = vpop.f32.mrf.mxu1  ;;  %v8751_v2 = vld [vmem:[%s11187_s29 + $0x378] sm:$0xf0] }
 0x281   : > { %5969 = vmatpush.bf16.msrb.mxu3 %v9806_v25  ;;  %v9354_v25 = vor.u32 %v10499_v3, %v9351_v7  ;;  %v10335_v3 = vld [vmem:[%s11187_s29 + $0x2ec] sm:$0xf0] }
 0x282   : > { %5986 = vmatpush.bf16.msra.mxu0 %v8394_v21  ;;  %v3258_v21 = vadd.f32 %v3257_v23, %v3244_v46  ;;  %v10604_v23 = vld [vmem:[%s11187_s29 + $0xb54] sm:$0xf0] }
 0x283   : > { %6012 = vmatpush.bf16.msra.mxu2 %v8826_v14  ;;  %v9758_v24 = vor.u32 %v10604_v23, %v9757_v51  ;;  %v10487_v51 = vld [vmem:[%s11187_s29 + $0x7b4] sm:$0xf]  ;;  %v9303_v23 = vld [vmem:[%s11187_s29 + $0x7c8] sm:$0xf0] }
 0x284   : > { %6000 = vmatpush.bf16.msra.mxu1 %v8586_v42  ;;  %v9423_v42 = vld [vmem:[%s11187_s29 + $0x8b8] sm:$0xf0]  ;;  %v3272_v22 = vadd.f32 %v3271_v12, %v3258_v21  ;;  %v9709_v21 = vld [vmem:[%s11187_s29 + $0xae0] sm:$0xf] }
 0x285   : > { %v9426_v16 = vor.u32 %v10517_v38, %v9423_v42  ;;  %5970 = vmatpush.bf16.msrb.mxu3 %v9782_v4  ;;  %v3287_v38 = vpop.f32.mrf.mxu3  ;;  %v10592_v42 = vld [vmem:[%s11187_s29 + $0xaf4] sm:$0xf0]  ;;  %v3301_v4 = vpop.f32.mrf.mxu0 }
 0x286   : > { %5987 = vmatpush.bf16.msra.mxu0 %v8370_v43  ;;  %v9207_v43 = vld [vmem:[%s11187_s29 + $0x708] sm:$0xf0]  ;;  %v3286_v53 = vadd.f32 %v3285_v26, %v3272_v22 }
 0x287   : > { %6013 = vmatpush.bf16.msra.mxu2 %v8802_v1  ;;  %v9210_v55 = vor.u32 %v10463_v45, %v9207_v43  ;;  %v9710_v1 = vor.u32 %v10592_v42, %v9709_v21  ;;  %v9138_v43 = vor.u32 %v10445_v48, %v9135_v61  ;;  %v9111_v22 = vld [vmem:[%s11187_s29 + $0x648] sm:$0xf0]  ;;  %v8661_v21 = vld [vmem:[%s11187_s29 + $0x2a8] sm:$0xf]  ;;  %v10329_v42 = vld [vmem:[%s11187_s29 + $0x2bc] sm:$0xf0]  ;;  %v3327_v61 = vpop.f32.mrf.mxu2 }
 0x288   : > { %6001 = vmatpush.bf16.msra.mxu1 %v8562_v44  ;;  %v3246_v44 = vadd.f32 %v3245_v15, %v800_v8  ;;  %v10505_v8 = vld [vmem:[%s11187_s29 + $0x844] sm:$0xf]  ;;  %v3300_v14 = vadd.f32 %v3299_v10, %v3286_v53  ;;  %v10287_v10 = vld [vmem:[%s11187_s29 + $0x16c] sm:$0xf0] }
 0x289   : > { %v9378_v46 = vor.u32 %v10505_v8, %v9375_v54  ;;  %5971 = vmatpush.bf16.msrb.mxu3 %v9758_v24  ;;  %v10493_v15 = vld [vmem:[%s11187_s29 + $0x7e4] sm:$0xf]  ;;  %v9279_v54 = vld [vmem:[%s11187_s29 + $0x798] sm:$0xf0] }
 0x28a   : > { %5988 = vmatpush.bf16.msra.mxu0 %v8346_v18  ;;  %v9183_v18 = vld [vmem:[%s11187_s29 + $0x6d8] sm:$0xf0]  ;;  %v3260_v36 = vadd.f32 %v3259_v32, %v3246_v44  ;;  %v9330_v44 = vor.u32 %v10493_v15, %v9327_v33  ;;  %v10481_v53 = vld [vmem:[%s11187_s29 + $0x784] sm:$0xf]  ;;  %v9015_v33 = vld [vmem:[%s11187_s29 + $0x588] sm:$0xf0] }
 0x28b   : > { %6014 = vmatpush.bf16.msra.mxu2 %v8778_v0  ;;  %v9186_v19 = vor.u32 %v10457_v62, %v9183_v18  ;;  %v10433_v62 = vld [vmem:[%s11187_s29 + $0x604] sm:$0xf]  ;;  %v9087_v18 = vld [vmem:[%s11187_s29 + $0x618] sm:$0xf0] }
 0x28c   : > { %6002 = vmatpush.bf16.msra.mxu1 %v8538_v41  ;;  %v10349_v41 = vld [vmem:[%s11187_s29 + $0x364] sm:$0xf] }
 0x28d   : > { %v8754_v60 = vor.u32 %v10349_v41, %v8751_v2  ;;  %v8493_v41 = vld [vmem:[%s11187_s29 + $0x158] sm:$0xf]  ;;  %v9306_v2 = vor.u32 %v10487_v51, %v9303_v23 }
 0x28e   : > { %5989 = vmatpush.bf16.msra.mxu0 %v8322_v5  ;;  %v9734_v5 = vor.u32 %v10598_v50, %v9733_v37  ;;  %v8494_v7 = vor.u32 %v10287_v10, %v8493_v41 }
 0x28f   : > { %6015 = vmatpush.bf16.msra.mxu2 %v8754_v60  ;;  %v10580_v60 = vld [vmem:[%s11187_s29 + $0xa94] sm:$0xf0]  ;;  %v3329_v41 = vpop.f32.mrf.mxu2 }
 0x290   : > { %6003 = vmatpush.bf16.msra.mxu1 %v8514_v63  ;;  %v3313_v63 = vpop.f32.mrf.mxu1  ;;  %5972 = vmatpush.bf16.msrb.mxu3 %v9734_v5 }
 0x291   : > { %5990 = vmatmul.bf16.vlgmr.msra.gmra.mxu0 %v12324_v56  ;;  %v12486_v52 = vadd.f32 %v3313_v63, %v3300_v14  ;;  %v9090_v63 = vor.u32 %v10433_v62, %v9087_v18  ;;  %v10317_v62 = vld [vmem:[%s11187_s29 + $0x25c] sm:$0xf0] }
 0x292   : > { %6038 = vmatpush.bf16.msrb.mxu0 %v9258_v17  ;;  %v3274_v17 = vadd.f32 %v3273_v57, %v3260_v36  ;;  %v9114_v36 = vor.u32 %v10439_v30, %v9111_v22  ;;  %v9661_v57 = vld [vmem:[%s11187_s29 + $0xa80] sm:$0xf]  ;;  %v801_v30 = vperm.slane %v12314_v58, 7  ;;  %v8991_v58 = vld [vmem:[%s11187_s29 + $0x558] sm:$0xf0] }
 0x293   : > { %6004 = vmatmul.bf16.vlgmr.msra.gmra.mxu1 %v12328_v59 }
 0x294   : > { %6052 = vmatpush.bf16.msrb.mxu1 %v9450_v27  ;;  %v8727_v27 = vld [vmem:[%s11187_s29 + $0x348] sm:$0xf0]  ;;  %v3288_v32 = vadd.f32 %v3287_v38, %v3274_v17  ;;  %5973 = vmatpush.bf16.msrb.mxu3 %v9710_v1  ;;  %v9282_v17 = vor.u32 %v10481_v53, %v9279_v54  ;;  %v8686_v38 = vor.u32 %v10335_v3, %v8685_v35  ;;  %v3341_v1 = vpop.f32.mrf.mxu3  ;;  %v8589_v35 = vld [vmem:[%s11187_s29 + $0x218] sm:$0xf]  ;;  %v10311_v3 = vld [vmem:[%s11187_s29 + $0x22c] sm:$0xf0] }
 0x295   : > { %v8730_v12 = vor.u32 %v10343_v13, %v8727_v27  ;;  %v8469_v13 = vld [vmem:[%s11187_s29 + $0x128] sm:$0xf]  ;;  %v3328_v23 = vadd.f32 %v3327_v61, %v801_v30  ;;  %v8967_v53 = vld [vmem:[%s11187_s29 + $0x528] sm:$0xf0] }
 0x296   : > { %6039 = vmatpush.bf16.msrb.mxu0 %v9234_v31  ;;  %v3408_v31 = vmul.f32 %v12486_v52, %v12486_v52  ;;  %v3302_v0 = vadd.f32 %v3301_v4, %v3288_v32  ;;  %v10415_v32 = vld [vmem:[%s11187_s29 + $0x574] sm:$0xf]  ;;  %v8637_v4 = vld [vmem:[%s11187_s29 + $0x278] sm:$0xf]  ;;  %v8565_v61 = vld [vmem:[%s11187_s29 + $0x1e8] sm:$0xf] }
 0x297   : > { %6016 = vmatpush.bf16.msra.mxu2 %v8730_v12  ;;  %v10281_v12 = vld [vmem:[%s11187_s29 + $0x13c] sm:$0xf0]  ;;  %v3342_v10 = vadd.f32 %v3341_v1, %v3328_v23 }
 0x298   : > { %6053 = vmatpush.bf16.msrb.mxu1 %v9426_v16  ;;  %v8703_v16 = vld [vmem:[%s11187_s29 + $0x318] sm:$0xf0]  ;;  %v3424_v45 = vmul.f32 %v3408_v31, %v12486_v52  ;;  %v8470_v31 = vor.u32 %v10281_v12, %v8469_v13  ;;  %v10397_v13 = vld [vmem:[%s11187_s29 + $0x4e4] sm:$0xf]  ;;  %v8373_v12 = vld [vmem:[%s11187_s29 + $0x68] sm:$0xf] }
 0x299   : > { %v8706_v26 = vor.u32 %v10337_v34, %v8703_v16  ;;  %v8662_v16 = vor.u32 %v10329_v42, %v8661_v21  ;;  %v8943_v21 = vld [vmem:[%s11187_s29 + $0x4f8] sm:$0xf0] }
 0x29a   : > { %6040 = vmatpush.bf16.msrb.mxu0 %v9210_v55  ;;  %v3440_v28 = vmul.f32 0.044715, %v3424_v45  ;;  %v3315_v55 = vpop.f32.mrf.mxu1  ;;  %v10275_v45 = vld [vmem:[%s11187_s29 + $0x10c] sm:$0xf0]  ;;  %v8946_v1 = vor.u32 %v10397_v13, %v8943_v21  ;;  %v9237_v21 = vld [vmem:[%s11187_s29 + $0x728] sm:$0xf] }
 0x29b   : > { %6017 = vmatpush.bf16.msra.mxu2 %v8706_v26  ;;  %v12508_v24 = vadd.f32 %v3315_v55, %v3302_v0  ;;  %v8445_v26 = vld [vmem:[%s11187_s29 + $0xf8] sm:$0xf]  ;;  %v8421_v0 = vld [vmem:[%s11187_s29 + $0xc8] sm:$0xf]  ;;  %v10269_v55 = vld [vmem:[%s11187_s29 + $0xdc] sm:$0xf0] }
 0x29c   : > { %6054 = vmatpush.bf16.msrb.mxu1 %v9402_v11  ;;  %v9686_v11 = vor.u32 %v10586_v9, %v9685_v29  ;;  %v3456_v8 = vadd.f32 %v3440_v28, %v12486_v52  ;;  %v8446_v29 = vor.u32 %v10275_v45, %v8445_v26  ;;  %v10409_v9 = vld [vmem:[%s11187_s29 + $0x544] sm:$0xf]  ;;  %v9615_v26 = vld [vmem:[%s11187_s29 + $0xa38] sm:$0xf0] }
 0x29d   : > { %v3416_v50 = vmul.f32 %v12508_v24, %v12508_v24  ;;  %v8994_v18 = vor.u32 %v10409_v9, %v8991_v58 }
 0x29e   : > { %6041 = vmatpush.bf16.msrb.mxu0 %v9186_v19  ;;  %5974 = vmatpush.bf16.msrb.mxu3 %v9686_v11  ;;  %v10427_v19 = vld [vmem:[%s11187_s29 + $0x5d4] sm:$0xf]  ;;  %v3472_v37 = vmul.f32 0.7978846, %v3456_v8  ;;  %v8613_v11 = vld [vmem:[%s11187_s29 + $0x248] sm:$0xf]  ;;  %v8422_v8 = vor.u32 %v10269_v55, %v8421_v0 }
 0x29f   : > { %v9066_v5 = vor.u32 %v10427_v19, %v9063_v47  ;;  %v3432_v14 = vmul.f32 %v3416_v50, %v12508_v24  ;;  %v10299_v0 = vld [vmem:[%s11187_s29 + $0x1cc] sm:$0xf0] }
 0x2a0   : > { %6055 = vmatpush.bf16.msrb.mxu1 %v9378_v46  ;;  %v9662_v46 = vor.u32 %v10580_v60, %v9661_v57  ;;  %10756 = vtanh.f32 %v3472_v37  ;;  %v8397_v57 = vld [vmem:[%s11187_s29 + $0x98] sm:$0xf]  ;;  %v10263_v60 = vld [vmem:[%s11187_s29 + $0xac] sm:$0xf0] }
 0x2a1   : > { %v3448_v27 = vmul.f32 0.044715, %v3432_v14 }
 0x2a2   : > { %6042 = vmatpush.bf16.msrb.mxu0 %v9162_v6  ;;  %5975 = vmatpush.bf16.msrb.mxu3 %v9662_v46  ;;  %v10421_v6 = vld [vmem:[%s11187_s29 + $0x5a4] sm:$0xf]  ;;  %v3343_v46 = vpop.f32.mrf.mxu3 }
 0x2a3   : > { %v3464_v48 = vadd.f32 %v3448_v27, %v12508_v24 }
 0x2a4   : > { %6056 = vmatpush.bf16.msrb.mxu1 %v9354_v25  ;;  %v9039_v25 = vld [vmem:[%s11187_s29 + $0x5b8] sm:$0xf0] }
 0x2a5   : > { %v9042_v15 = vor.u32 %v10421_v6, %v9039_v25  ;;  %v3480_v34 = vmul.f32 0.7978846, %v3464_v48  ;;  %v10257_v6 = vld [vmem:[%s11187_s29 + $0x7c] sm:$0xf0]  ;;  %v3330_v48 = vadd.f32 %v3329_v41, %v801_v30  ;;  %v10391_v30 = vld [vmem:[%s11187_s29 + $0x4b4] sm:$0xf] }
 0x2a6   : > { %6043 = vmatpush.bf16.msrb.mxu0 %v9138_v43  ;;  %6024 = vmatpush.bf16.msra.mxu3 %v9066_v5  ;;  %v9018_v43 = vor.u32 %v10415_v32, %v9015_v33  ;;  %v10757_v22 = vpop.eup %10756  ;;  %v10571_v5 = vld [vmem:[%s11187_s29 + $0xa54] sm:$0xf]  ;;  %v10385_v41 = vld [vmem:[%s11187_s29 + $0x484] sm:$0xf] }
 0x2a7   : > { %10758 = vtanh.f32 %v3480_v34  ;;  %v3504_v51 = vadd.f32 1.0, %v10757_v22  ;;  %v8374_v34 = vor.u32 %v10257_v6, %v8373_v12 }
 0x2a8   : > { %6057 = vmatpush.bf16.msrb.mxu1 %v9330_v44  ;;  %v10323_v44 = vld [vmem:[%s11187_s29 + $0x28c] sm:$0xf0] }
 0x2a9   : > { %v8638_v28 = vor.u32 %v10323_v44, %v8637_v4  ;;  %v3520_v37 = vmul.f32 0.5, %v3504_v51  ;;  %v8919_v4 = vld [vmem:[%s11187_s29 + $0x4c8] sm:$0xf0]  ;;  %v3344_v44 = vadd.f32 %v3343_v46, %v3330_v48  ;;  %v10559_v51 = vld [vmem:[%s11187_s29 + $0x9f4] sm:$0xf] }
 0x2aa   : > { %6044 = vmatpush.bf16.msrb.mxu0 %v9114_v36  ;;  %6025 = vmatpush.bf16.msra.mxu3 %v9042_v15  ;;  %v10403_v36 = vld [vmem:[%s11187_s29 + $0x514] sm:$0xf]  ;;  %v10305_v15 = vld [vmem:[%s11187_s29 + $0x1fc] sm:$0xf0]  ;;  %v8922_v55 = vor.u32 %v10391_v30, %v8919_v4  ;;  %v9405_v4 = vld [vmem:[%s11187_s29 + $0x878] sm:$0xf] }
 0x2ab   : > { %v8970_v19 = vor.u32 %v10403_v36, %v8967_v53  ;;  %v3536_v42 = vmul.f32 %v3520_v37, %v12486_v52  ;;  %v8349_v52 = vld [vmem:[%s11187_s29 + $0x38] sm:$0xf]  ;;  %v8566_v45 = vor.u32 %v10305_v15, %v8565_v61  ;;  %v10245_v36 = vld [vmem:[%s11187_s29 + $0x1c] sm:$0xf0]  ;;  %v10479_v37 = vld [vmem:[%s11187_s29 + $0x76c] sm:$0xf0] }
 0x2ac   : > { %6058 = vmatpush.bf16.msrb.mxu1 %v9306_v2  ;;  %v8614_v2 = vor.u32 %v10317_v62, %v8613_v11  ;;  %v9429_v61 = vld [vmem:[%s11187_s29 + $0x8a8] sm:$0xf]  ;;  %v10521_v15 = vld [vmem:[%s11187_s29 + $0x8bc] sm:$0xf0] }
 0x2ad   : > { %v10759_v54 = vpop.eup %10758 }
 0x2ae   : > { %6045 = vmatpush.bf16.msrb.mxu0 %v9090_v63  ;;  %6026 = vmatpush.bf16.msra.mxu3 %v9018_v43  ;;  %v3512_v50 = vadd.f32 1.0, %v10759_v54  ;;  %v3355_v47 = vpop.f32.mrf.mxu0  ;;  %v10251_v43 = vld [vmem:[%s11187_s29 + $0x4c] sm:$0xf0]  ;;  %v8517_v54 = vld [vmem:[%s11187_s29 + $0x188] sm:$0xf] }
 0x2af   : > { %v3356_v63 = vadd.f32 %v3355_v47, %v3342_v10  ;;  %v8350_v62 = vor.u32 %v10251_v43, %v8349_v52  ;;  %v9453_v47 = vld [vmem:[%s11187_s29 + $0x8d8] sm:$0xf]  ;;  %v10467_v43 = vld [vmem:[%s11187_s29 + $0x70c] sm:$0xf0] }
 0x2b0   : > { %6059 = vmatpush.bf16.msrb.mxu1 %v9282_v17  ;;  %v3528_v14 = vmul.f32 0.5, %v3512_v50  ;;  %v8398_v17 = vor.u32 %v10263_v60, %v8397_v57  ;;  %v3369_v27 = vpop.f32.mrf.mxu1  ;;  %v10293_v60 = vld [vmem:[%s11187_s29 + $0x19c] sm:$0xf0] }
 0x2b1   : > { %6046 = vmatmul.bf16.vlgmr.msrb.gmra.mxu0 %v12393_v20  ;;  %v3370_v33 = vadd.f32 %v3369_v27, %v3356_v63  ;;  %v10553_v63 = vld [vmem:[%s11187_s29 + $0x9c4] sm:$0xf]  ;;  %v8518_v13 = vor.u32 %v10293_v60, %v8517_v54  ;;  %v10455_v60 = vld [vmem:[%s11187_s29 + $0x6ac] sm:$0xf0] }
 0x2b2   : > { %6094 = vmatpush.bf16.msra.mxu0 %v8494_v7  ;;  %6027 = vmatpush.bf16.msra.mxu3 %v8994_v18  ;;  %v9639_v7 = vld [vmem:[%s11187_s29 + $0xa68] sm:$0xf0]  ;;  %v3544_v25 = vmul.f32 %v3528_v14, %v12508_v24 }
 0x2b3   : > { %6060 = vmatmul.bf16.vlgmr.msrb.gmra.mxu1 %v12436_v40  ;;  %v9591_v18 = vld [vmem:[%s11187_s29 + $0xa08] sm:$0xf0] }
 0x2b4   : > { %6108 = vmatpush.bf16.msra.mxu1 %v8686_v38  ;;  %v8590_v38 = vor.u32 %v10311_v3, %v8589_v35  ;;  %v12561_v32 = vpack.c.bf16 %v3544_v25, %v3536_v42  ;;  %v9594_v46 = vor.u32 %v10559_v51, %v9591_v18  ;;  %v10527_v35 = vld [vmem:[%s11187_s29 + $0x8ec] sm:$0xf0]  ;;  %v10473_v42 = vld [vmem:[%s11187_s29 + $0x73c] sm:$0xf0] }
 0x2b5   : > { %v9454_v6 = vor.u32 %v10527_v35, %v9453_v47  ;;  %v10461_v51 = vld [vmem:[%s11187_s29 + $0x6dc] sm:$0xf0]  ;;  %v9471_v47 = vld [vmem:[%s11187_s29 + $0x918] sm:$0xf0] }
 0x2b6   : > { %6095 = vmatpush.bf16.msra.mxu0 %v8470_v31  ;;  %6028 = vmatpush.bf16.msra.mxu3 %v8970_v19  ;;  %v9642_v31 = vor.u32 %v10571_v5, %v9639_v7  ;;  %v3357_v9 = vpop.f32.mrf.mxu0  ;;  %v9261_v19 = vld [vmem:[%s11187_s29 + $0x758] sm:$0xf]  ;;  %v10509_v18 = vld [vmem:[%s11187_s29 + $0x85c] sm:$0xf0] }
 0x2b7   : > { %5962 = vmatmul.bf16.vlgmr.msrb.gmra.mxu2 %v12561_v32  ;;  %v3358_v11 = vadd.f32 %v3357_v9, %v3344_v44  ;;  %v9262_v27 = vor.u32 %v10479_v37, %v9261_v19  ;;  %v10515_v44 = vld [vmem:[%s11187_s29 + $0x88c] sm:$0xf0]  ;;  %v9519_v9 = vld [vmem:[%s11187_s29 + $0x978] sm:$0xf0]  ;;  %v9357_v37 = vld [vmem:[%s11187_s29 + $0x818] sm:$0xf] }
 0x2b8   : > { %6109 = vmatpush.bf16.msra.mxu1 %v8662_v16  ;;  %v10565_v16 = vld [vmem:[%s11187_s29 + $0xa24] sm:$0xf]  ;;  %v3383_v24 = vpop.f32.mrf.mxu2  ;;  %6066 = vmatpush.bf16.msrb.mxu2 %v9642_v31  ;;  %v3371_v10 = vpop.f32.mrf.mxu1 }
 0x2b9   : > { %v3384_v22 = vadd.f32 %v3383_v24, %v3370_v33  ;;  %v9618_v58 = vor.u32 %v10565_v16, %v9615_v26  ;;  %v3372_v5 = vadd.f32 %v3371_v10, %v3358_v11  ;;  %v10547_v33 = vld [vmem:[%s11187_s29 + $0x994] sm:$0xf]  ;;  %v9238_v16 = vor.u32 %v10473_v42, %v9237_v21  ;;  %v8853_v21 = vld [vmem:[%s11187_s29 + $0x428] sm:$0xf]  ;;  %v10377_v42 = vld [vmem:[%s11187_s29 + $0x43c] sm:$0xf0] }
 0x2ba   : > { %6096 = vmatpush.bf16.msra.mxu0 %v8446_v29  ;;  %6029 = vmatpush.bf16.msra.mxu3 %v8946_v1  ;;  %v3397_v29 = vpop.f32.mrf.mxu3  ;;  %v9430_v24 = vor.u32 %v10521_v15, %v9429_v61  ;;  %v9117_v61 = vld [vmem:[%s11187_s29 + $0x638] sm:$0xf]  ;;  %v10443_v15 = vld [vmem:[%s11187_s29 + $0x64c] sm:$0xf0] }
 0x2bb   : > { %v12573_v23 = vadd.f32 %v3397_v29, %v3384_v22  ;;  %v10541_v29 = vld [vmem:[%s11187_s29 + $0x964] sm:$0xf] }
 0x2bc   : > { %6110 = vmatpush.bf16.msra.mxu1 %v8638_v28  ;;  %v8541_v28 = vld [vmem:[%s11187_s29 + $0x1b8] sm:$0xf]  ;;  %6067 = vmatpush.bf16.msrb.mxu2 %v9618_v58  ;;  %v9189_v58 = vld [vmem:[%s11187_s29 + $0x6c8] sm:$0xf]  ;;  %v9522_v11 = vor.u32 %v10541_v29, %v9519_v9  ;;  %v10437_v29 = vld [vmem:[%s11187_s29 + $0x61c] sm:$0xf0] }
 0x2bd   : > { %v8542_v53 = vor.u32 %v10299_v0, %v8541_v28  ;;  %v3409_v57 = vmul.f32 %v12573_v23, %v12573_v23  ;;  %v9190_v54 = vor.u32 %v10461_v51, %v9189_v58  ;;  %v9285_v9 = vld [vmem:[%s11187_s29 + $0x788] sm:$0xf]  ;;  %v10284_v58 = vld [vmem:[%s11187_s29 + $0x15c] sm:$0xf]  ;;  %v8495_v51 = vld [vmem:[%s11187_s29 + $0x170] sm:$0xf0] }
 0x2be   : > { %6097 = vmatpush.bf16.msra.mxu0 %v8422_v8  ;;  %v8325_v8 = vld [vmem:[%s11187_s29 + $0x8] sm:$0xf]  ;;  %6030 = vmatpush.bf16.msra.mxu3 %v8922_v55  ;;  %v9406_v55 = vor.u32 %v10515_v44, %v9405_v4  ;;  %v10371_v4 = vld [vmem:[%s11187_s29 + $0x40c] sm:$0xf0] }
 0x2bf   : > { %v3425_v3 = vmul.f32 %v3409_v57, %v12573_v23  ;;  %v8326_v14 = vor.u32 %v10245_v36, %v8325_v8  ;;  %v10535_v36 = vld [vmem:[%s11187_s29 + $0x934] sm:$0xf]  ;;  %v9165_v57 = vld [vmem:[%s11187_s29 + $0x698] sm:$0xf] }
 0x2c0   : > { %6111 = vmatpush.bf16.msra.mxu1 %v8614_v2  ;;  %v8895_v2 = vld [vmem:[%s11187_s29 + $0x498] sm:$0xf0]  ;;  %v3385_v7 = vpop.f32.mrf.mxu2  ;;  %6068 = vmatpush.bf16.msrb.mxu2 %v9594_v46  ;;  %v10529_v46 = vld [vmem:[%s11187_s29 + $0x904] sm:$0xf]  ;;  %v9166_v35 = vor.u32 %v10455_v60, %v9165_v57  ;;  %v10365_v57 = vld [vmem:[%s11187_s29 + $0x3dc] sm:$0xf0] }
 0x2c1   : > { %v8898_v50 = vor.u32 %v10385_v41, %v8895_v2  ;;  %v3386_v12 = vadd.f32 %v3385_v7, %v3372_v5  ;;  %v10383_v5 = vld [vmem:[%s11187_s29 + $0x46c] sm:$0xf0] }
 0x2c2   : > { %6098 = vmatpush.bf16.msra.mxu0 %v8398_v17  ;;  %v9567_v17 = vld [vmem:[%s11187_s29 + $0x9d8] sm:$0xf0]  ;;  %v3399_v25 = vpop.f32.mrf.mxu3 }
 0x2c3   : > { %6031 = vmatpush.bf16.msra.mxu3 %v8898_v50  ;;  %v9570_v48 = vor.u32 %v10553_v63, %v9567_v17  ;;  %v12596_v31 = vadd.f32 %v3399_v25, %v3386_v12  ;;  %v10503_v50 = vld [vmem:[%s11187_s29 + $0x82c] sm:$0xf0]  ;;  %v9141_v63 = vld [vmem:[%s11187_s29 + $0x668] sm:$0xf]  ;;  %v10449_v17 = vld [vmem:[%s11187_s29 + $0x67c] sm:$0xf0] }
 0x2c4   : > { %6112 = vmatpush.bf16.msra.mxu1 %v8590_v38  ;;  %v3441_v38 = vmul.f32 0.044715, %v3425_v3  ;;  %v8877_v3 = vld [vmem:[%s11187_s29 + $0x458] sm:$0xf] }
 0x2c5   : > { %v3417_v52 = vmul.f32 %v12596_v31, %v12596_v31  ;;  %6069 = vmatpush.bf16.msrb.mxu2 %v9570_v48  ;;  %v8878_v12 = vor.u32 %v10383_v5, %v8877_v3  ;;  %v9783_v3 = vld [vmem:[%s11187_s29 + $0xb88] sm:$0xf0] }
 0x2c6   : > { %6099 = vmatpush.bf16.msra.mxu0 %v8374_v34  ;;  %v3457_v1 = vadd.f32 %v3441_v38, %v12573_v23  ;;  %v9543_v34 = vld [vmem:[%s11187_s29 + $0x9a8] sm:$0xf0]  ;;  %v10497_v38 = vld [vmem:[%s11187_s29 + $0x7fc] sm:$0xf0] }
 0x2c7   : > { %v9546_v30 = vor.u32 %v10547_v33, %v9543_v34  ;;  %v3433_v22 = vmul.f32 %v3417_v52, %v12596_v31  ;;  %6018 = vmatmul.bf16.vlgmr.msra.gmra.mxu2 %v12330_v39  ;;  %v9309_v34 = vld [vmem:[%s11187_s29 + $0x7b8] sm:$0xf]  ;;  %v10619_v52 = vld [vmem:[%s11187_s29 + $0xbd4] sm:$0xf] }
 0x2c8   : > { %6113 = vmatpush.bf16.msra.mxu1 %v8566_v45  ;;  %v3473_v26 = vmul.f32 0.7978846, %v3457_v1  ;;  %v9213_v45 = vld [vmem:[%s11187_s29 + $0x6f8] sm:$0xf] }
 0x2c9   : > { %v9214_v28 = vor.u32 %v10467_v43, %v9213_v45  ;;  %v3449_v0 = vmul.f32 0.044715, %v3433_v22  ;;  %6070 = vmatpush.bf16.msrb.mxu2 %v9546_v30  ;;  %v9118_v43 = vor.u32 %v10443_v15, %v9117_v61  ;;  %v8829_v30 = vld [vmem:[%s11187_s29 + $0x3f8] sm:$0xf]  ;;  %v9093_v22 = vld [vmem:[%s11187_s29 + $0x608] sm:$0xf] }
 0x2ca   : > { %6100 = vmatpush.bf16.msra.mxu0 %v8350_v62  ;;  %10760 = vtanh.f32 %v3473_v26  ;;  %v9381_v62 = vld [vmem:[%s11187_s29 + $0x848] sm:$0xf]  ;;  %v8854_v26 = vor.u32 %v10377_v42, %v8853_v21  ;;  %v10601_v21 = vld [vmem:[%s11187_s29 + $0xb44] sm:$0xf]  ;;  %v9759_v42 = vld [vmem:[%s11187_s29 + $0xb58] sm:$0xf0] }
 0x2cb   : > { %v3465_v8 = vadd.f32 %v3449_v0, %v12596_v31  ;;  %v9382_v2 = vor.u32 %v10509_v18, %v9381_v62  ;;  %v8830_v62 = vor.u32 %v10371_v4, %v8829_v30  ;;  %v10332_v18 = vld [vmem:[%s11187_s29 + $0x2dc] sm:$0xf]  ;;  %v10353_v61 = vld [vmem:[%s11187_s29 + $0x37c] sm:$0xf0]  ;;  %v8733_v30 = vld [vmem:[%s11187_s29 + $0x338] sm:$0xf] }
 0x2cc   : > { %6114 = vmatpush.bf16.msra.mxu1 %v8542_v53  ;;  %v9495_v53 = vld [vmem:[%s11187_s29 + $0x948] sm:$0xf0]  ;;  %v10347_v4 = vld [vmem:[%s11187_s29 + $0x34c] sm:$0xf0] }
 0x2cd   : > { %v3481_v41 = vmul.f32 0.7978846, %v3465_v8  ;;  %6071 = vmatpush.bf16.msrb.mxu2 %v9522_v11  ;;  %v9498_v19 = vor.u32 %v10535_v36, %v9495_v53  ;;  %v8687_v8 = vld [vmem:[%s11187_s29 + $0x2f0] sm:$0xf0]  ;;  %v9094_v53 = vor.u32 %v10437_v29, %v9093_v22  ;;  %v10260_v22 = vld [vmem:[%s11187_s29 + $0x9c] sm:$0xf] }
 0x2ce   : > { %6101 = vmatpush.bf16.msra.mxu0 %v8326_v14  ;;  %v9358_v14 = vor.u32 %v10503_v50, %v9357_v37  ;;  %v8690_v60 = vor.u32 %v10332_v18, %v8687_v8  ;;  %v8471_v37 = vld [vmem:[%s11187_s29 + $0x140] sm:$0xf0]  ;;  %v8399_v29 = vld [vmem:[%s11187_s29 + $0xb0] sm:$0xf0]  ;;  %v10341_v18 = vld [vmem:[%s11187_s29 + $0x31c] sm:$0xf0] }
 0x2cf   : > { %10762 = vtanh.f32 %v3481_v41  ;;  %v8498_v41 = vor.u32 %v10284_v58, %v8495_v51  ;;  %v10589_v58 = vld [vmem:[%s11187_s29 + $0xae4] sm:$0xf]  ;;  %v9711_v51 = vld [vmem:[%s11187_s29 + $0xaf8] sm:$0xf0]  ;;  %v9645_v8 = vld [vmem:[%s11187_s29 + $0xa58] sm:$0xf] }
 0x2d0   : > { %6115 = vmatpush.bf16.msra.mxu1 %v8518_v13  ;;  %v10761_v10 = vpop.eup %10760  ;;  %v9474_v13 = vor.u32 %v10529_v46, %v9471_v47  ;;  %v8663_v46 = vld [vmem:[%s11187_s29 + $0x2c0] sm:$0xf0] }
 0x2d1   : > { %6102 = vmatmul.bf16.vlgmr.msra.gmra.mxu0 %v12324_v56  ;;  %v3505_v7 = vadd.f32 1.0, %v10761_v10  ;;  %6072 = vmatpush.bf16.msrb.mxu2 %v9498_v19  ;;  %v10278_v19 = vld [vmem:[%s11187_s29 + $0x12c] sm:$0xf] }
 0x2d2   : > { %6150 = vmatpush.bf16.msrb.mxu0 %v9262_v27  ;;  %v9333_v27 = vld [vmem:[%s11187_s29 + $0x7e8] sm:$0xf]  ;;  %v10326_v10 = vld [vmem:[%s11187_s29 + $0x2ac] sm:$0xf]  ;;  %v8474_v5 = vor.u32 %v10278_v19, %v8471_v37  ;;  %v10583_v19 = vld [vmem:[%s11187_s29 + $0xab4] sm:$0xf] }
 0x2d3   : > { %6116 = vmatmul.bf16.vlgmr.msra.gmra.mxu1 %v12328_v59  ;;  %v9334_v48 = vor.u32 %v10497_v38, %v9333_v27  ;;  %v3521_v1 = vmul.f32 0.5, %v3505_v7  ;;  %v10272_v7 = vld [vmem:[%s11187_s29 + $0xfc] sm:$0xf]  ;;  %v9687_v37 = vld [vmem:[%s11187_s29 + $0xac8] sm:$0xf0] }
 0x2d4   : > { %6164 = vmatpush.bf16.msrb.mxu1 %v9454_v6  ;;  %v9142_v6 = vor.u32 %v10449_v17, %v9141_v63  ;;  %v10359_v63 = vld [vmem:[%s11187_s29 + $0x3ac] sm:$0xf0]  ;;  %v8666_v17 = vor.u32 %v10326_v10, %v8663_v46  ;;  %v10320_v38 = vld [vmem:[%s11187_s29 + $0x27c] sm:$0xf]  ;;  %v9621_v46 = vld [vmem:[%s11187_s29 + $0xa28] sm:$0xf] }
 0x2d5   : > { %v10763_v25 = vpop.eup %10762  ;;  %6073 = vmatpush.bf16.msrb.mxu2 %v9474_v13  ;;  %v8447_v13 = vld [vmem:[%s11187_s29 + $0x110] sm:$0xf0] }
 0x2d6   : > { %6151 = vmatpush.bf16.msrb.mxu0 %v9238_v16  ;;  %v3513_v33 = vadd.f32 1.0, %v10763_v25  ;;  %v10491_v16 = vld [vmem:[%s11187_s29 + $0x7cc] sm:$0xf0]  ;;  %v8450_v25 = vor.u32 %v10272_v7, %v8447_v13  ;;  %v10577_v7 = vld [vmem:[%s11187_s29 + $0xa84] sm:$0xf] }
 0x2d7   : > { %v9310_v44 = vor.u32 %v10491_v16, %v9309_v34  ;;  %v9762_v34 = vor.u32 %v10601_v21, %v9759_v42  ;;  %v10314_v16 = vld [vmem:[%s11187_s29 + $0x24c] sm:$0xf]  ;;  %v9663_v13 = vld [vmem:[%s11187_s29 + $0xa98] sm:$0xf0]  ;;  %v9597_v21 = vld [vmem:[%s11187_s29 + $0x9f8] sm:$0xf] }
 0x2d8   : > { %6165 = vmatpush.bf16.msrb.mxu1 %v9430_v24  ;;  %v9831_v24 = vld [vmem:[%s11187_s29 + $0xbe8] sm:$0xf0]  ;;  %v3529_v45 = vmul.f32 0.5, %v3513_v33  ;;  %6074 = vmatmul.bf16.vlgmr.msrb.gmra.mxu2 %v12561_v32  ;;  %v8423_v33 = vld [vmem:[%s11187_s29 + $0xe0] sm:$0xf0] }
 0x2d9   : > { %6122 = vmatpush.bf16.msra.mxu2 %v8878_v12  ;;  %v9834_v11 = vor.u32 %v10619_v52, %v9831_v24  ;;  %v8639_v12 = vld [vmem:[%s11187_s29 + $0x290] sm:$0xf0] }
 0x2da   : > { %6152 = vmatpush.bf16.msrb.mxu0 %v9214_v28  ;;  %v3537_v28 = vmul.f32 %v3521_v1, %v12573_v23  ;;  %v3545_v0 = vmul.f32 %v3529_v45, %v12596_v31  ;;  %v10613_v23 = vld [vmem:[%s11187_s29 + $0xba4] sm:$0xf]  ;;  %v9807_v31 = vld [vmem:[%s11187_s29 + $0xbb8] sm:$0xf0]  ;;  %v8642_v15 = vor.u32 %v10320_v38, %v8639_v12  ;;  %v10266_v1 = vld [vmem:[%s11187_s29 + $0xcc] sm:$0xf] }
 0x2db   : > { %v9810_v50 = vor.u32 %v10613_v23, %v9807_v31  ;;  %v10595_v24 = vld [vmem:[%s11187_s29 + $0xb14] sm:$0xf]  ;;  %v9735_v45 = vld [vmem:[%s11187_s29 + $0xb28] sm:$0xf0]  ;;  %v10575_v23 = vld [vmem:[%s11187_s29 + $0xa6c] sm:$0xf0] }
 0x2dc   : > { %6166 = vmatpush.bf16.msrb.mxu1 %v9406_v55  ;;  %v10485_v55 = vld [vmem:[%s11187_s29 + $0x79c] sm:$0xf0]  ;;  %v12652_v36 = vpack.c.bf16 %v3545_v0, %v3537_v28  ;;  %v10308_v28 = vld [vmem:[%s11187_s29 + $0x21c] sm:$0xf]  ;;  %v8591_v0 = vld [vmem:[%s11187_s29 + $0x230] sm:$0xf0] }
 0x2dd   : > { %6123 = vmatpush.bf16.msra.mxu2 %v8854_v26  ;;  %v8615_v26 = vld [vmem:[%s11187_s29 + $0x260] sm:$0xf0]  ;;  %v10254_v31 = vld [vmem:[%s11187_s29 + $0x6c] sm:$0xf]  ;;  %v9069_v12 = vld [vmem:[%s11187_s29 + $0x5d8] sm:$0xf] }
 0x2de   : > { %6153 = vmatpush.bf16.msrb.mxu0 %v9190_v54  ;;  %v9286_v54 = vor.u32 %v10485_v55, %v9285_v9  ;;  %5976 = vmatmul.bf16.vlgmr.msrb.gmra.mxu3 %v12652_v36  ;;  %v9738_v9 = vor.u32 %v10595_v24, %v9735_v45  ;;  %v8734_v55 = vor.u32 %v10347_v4, %v8733_v30  ;;  %v9455_v24 = vld [vmem:[%s11187_s29 + $0x8f0] sm:$0xf0]  ;;  %v9045_v30 = vld [vmem:[%s11187_s29 + $0x5a8] sm:$0xf]  ;;  %v10425_v4 = vld [vmem:[%s11187_s29 + $0x5bc] sm:$0xf0] }
 0x2df   : > { %6080 = vmatpush.bf16.msrb.mxu3 %v9834_v11  ;;  %v8402_v11 = vor.u32 %v10260_v22, %v8399_v29  ;;  %v9573_v22 = vld [vmem:[%s11187_s29 + $0x9c8] sm:$0xf]  ;;  %v10557_v29 = vld [vmem:[%s11187_s29 + $0x9dc] sm:$0xf0] }
 0x2e0   : > { %6167 = vmatpush.bf16.msrb.mxu1 %v9382_v2  ;;  %v8805_v2 = vld [vmem:[%s11187_s29 + $0x3c8] sm:$0xf] }
 0x2e1   : > { %6124 = vmatpush.bf16.msra.mxu2 %v8830_v62  ;;  %v8806_v47 = vor.u32 %v10365_v57, %v8805_v2  ;;  %v8709_v62 = vld [vmem:[%s11187_s29 + $0x308] sm:$0xf]  ;;  %v10302_v2 = vld [vmem:[%s11187_s29 + $0x1ec] sm:$0xf]  ;;  %v8567_v57 = vld [vmem:[%s11187_s29 + $0x200] sm:$0xf0] }
 0x2e2   : > { %6154 = vmatpush.bf16.msrb.mxu0 %v9166_v35  ;;  %v10607_v35 = vld [vmem:[%s11187_s29 + $0xb74] sm:$0xf] }
 0x2e3   : > { %6081 = vmatpush.bf16.msrb.mxu3 %v9810_v50  ;;  %v9786_v27 = vor.u32 %v10607_v35, %v9783_v3  ;;  %v9646_v50 = vor.u32 %v10575_v23, %v9645_v8  ;;  %v10569_v35 = vld [vmem:[%s11187_s29 + $0xa3c] sm:$0xf0]  ;;  %v10248_v3 = vld [vmem:[%s11187_s29 + $0x3c] sm:$0xf]  ;;  %v10419_v8 = vld [vmem:[%s11187_s29 + $0x58c] sm:$0xf0] }
 0x2e4   : > { %6168 = vmatpush.bf16.msrb.mxu1 %v9358_v14  ;;  %v8781_v14 = vld [vmem:[%s11187_s29 + $0x398] sm:$0xf]  ;;  %v10551_v23 = vld [vmem:[%s11187_s29 + $0x9ac] sm:$0xf0] }
 0x2e5   : > { %6125 = vmatpush.bf16.msra.mxu2 %v8806_v47  ;;  %v8570_v47 = vor.u32 %v10302_v2, %v8567_v57  ;;  %v9215_v57 = vld [vmem:[%s11187_s29 + $0x710] sm:$0xf0] }
 0x2e6   : > { %6155 = vmatpush.bf16.msrb.mxu0 %v9142_v6  ;;  %v8782_v6 = vor.u32 %v10359_v63, %v8781_v14  ;;  %v9690_v14 = vor.u32 %v10583_v19, %v9687_v37  ;;  %v10296_v63 = vld [vmem:[%s11187_s29 + $0x1bc] sm:$0xf]  ;;  %v9407_v19 = vld [vmem:[%s11187_s29 + $0x890] sm:$0xf0] }
 0x2e7   : > { %6082 = vmatpush.bf16.msrb.mxu3 %v9786_v27  ;;  %v9622_v27 = vor.u32 %v10569_v35, %v9621_v46  ;;  %v9525_v46 = vld [vmem:[%s11187_s29 + $0x968] sm:$0xf] }
 0x2e8   : > { %6169 = vmatpush.bf16.msrb.mxu1 %v9334_v48  ;;  %v8757_v48 = vld [vmem:[%s11187_s29 + $0x368] sm:$0xf] }
 0x2e9   : > { %6126 = vmatpush.bf16.msra.mxu2 %v8782_v6  ;;  %v8758_v52 = vor.u32 %v10353_v61, %v8757_v48  ;;  %v10431_v6 = vld [vmem:[%s11187_s29 + $0x5ec] sm:$0xf0]  ;;  %v10242_v48 = vld [vmem:[%s11187_s29 + $0xc] sm:$0xf]  ;;  %v8327_v61 = vld [vmem:[%s11187_s29 + $0x20] sm:$0xf0] }
 0x2ea   : > { %6156 = vmatpush.bf16.msrb.mxu0 %v9118_v43  ;;  %v8426_v43 = vor.u32 %v10266_v1, %v8423_v33  ;;  %v10290_v1 = vld [vmem:[%s11187_s29 + $0x18c] sm:$0xf]  ;;  %v8519_v33 = vld [vmem:[%s11187_s29 + $0x1a0] sm:$0xf0] }
 0x2eb   : > { %6083 = vmatpush.bf16.msrb.mxu3 %v9762_v34  ;;  %v10476_v34 = vld [vmem:[%s11187_s29 + $0x75c] sm:$0xf] }
 0x2ec   : > { %6170 = vmatpush.bf16.msrb.mxu1 %v9310_v44  ;;  %v8618_v44 = vor.u32 %v10314_v16, %v8615_v26  ;;  %v9070_v16 = vor.u32 %v10431_v6, %v9069_v12  ;;  %v9263_v26 = vld [vmem:[%s11187_s29 + $0x770] sm:$0xf0]  ;;  %v9501_v12 = vld [vmem:[%s11187_s29 + $0x938] sm:$0xf]  ;;  %v10539_v6 = vld [vmem:[%s11187_s29 + $0x94c] sm:$0xf0] }
 0x2ed   : > { %6127 = vmatpush.bf16.msra.mxu2 %v8758_v52  ;;  %v10524_v52 = vld [vmem:[%s11187_s29 + $0x8dc] sm:$0xf] }
 0x2ee   : > { %6157 = vmatpush.bf16.msrb.mxu0 %v9094_v53  ;;  %6032 = vmatmul.bf16.vlgmr.msra.gmra.mxu3 %v12334_v49  ;;  %v8594_v53 = vor.u32 %v10308_v28, %v8591_v0  ;;  %v9458_v28 = vor.u32 %v10524_v52, %v9455_v24  ;;  %v10470_v0 = vld [vmem:[%s11187_s29 + $0x72c] sm:$0xf]  ;;  %v10533_v52 = vld [vmem:[%s11187_s29 + $0x91c] sm:$0xf0] }
 0x2ef   : > { %6084 = vmatpush.bf16.msrb.mxu3 %v9738_v9  ;;  %v9266_v9 = vor.u32 %v10476_v34, %v9263_v26  ;;  %v8949_v34 = vld [vmem:[%s11187_s29 + $0x4e8] sm:$0xf] }
 0x2f0   : > { %6171 = vmatpush.bf16.msrb.mxu1 %v9286_v54  ;;  %v8375_v54 = vld [vmem:[%s11187_s29 + $0x80] sm:$0xf0]  ;;  %v9477_v26 = vld [vmem:[%s11187_s29 + $0x908] sm:$0xf] }
 0x2f1   : > { %6158 = vmatmul.bf16.vlgmr.msrb.gmra.mxu0 %v12393_v20  ;;  %6128 = vmatpush.bf16.msra.mxu2 %v8734_v55  ;;  %v8378_v10 = vor.u32 %v10254_v31, %v8375_v54  ;;  %v9046_v55 = vor.u32 %v10425_v4, %v9045_v30  ;;  %v8879_v30 = vld [vmem:[%s11187_s29 + $0x470] sm:$0xf0]  ;;  %v10446_v4 = vld [vmem:[%s11187_s29 + $0x66c] sm:$0xf] }
 0x2f2   : > { %6206 = vmatpush.bf16.msra.mxu0 %v8498_v41  ;;  %v9714_v41 = vor.u32 %v10589_v58, %v9711_v51  ;;  %v9239_v58 = vld [vmem:[%s11187_s29 + $0x740] sm:$0xf0]  ;;  %v10518_v51 = vld [vmem:[%s11187_s29 + $0x8ac] sm:$0xf] }
 0x2f3   : > { %6172 = vmatmul.bf16.vlgmr.msrb.gmra.mxu1 %v12436_v40  ;;  %v9242_v31 = vor.u32 %v10470_v0, %v9239_v58  ;;  %v8925_v0 = vld [vmem:[%s11187_s29 + $0x4b8] sm:$0xf] }
 0x2f4   : > { %6220 = vmatpush.bf16.msra.mxu1 %v8690_v60  ;;  %v8710_v60 = vor.u32 %v10341_v18, %v8709_v62  ;;  %6085 = vmatpush.bf16.msrb.mxu3 %v9714_v41  ;;  %v9574_v62 = vor.u32 %v10557_v29, %v9573_v22  ;;  %v9021_v18 = vld [vmem:[%s11187_s29 + $0x578] sm:$0xf]  ;;  %v10464_v41 = vld [vmem:[%s11187_s29 + $0x6fc] sm:$0xf]  ;;  %v9143_v22 = vld [vmem:[%s11187_s29 + $0x680] sm:$0xf0] }
 0x2f5   : > { %v9022_v2 = vor.u32 %v10419_v8, %v9021_v18  ;;  %v9218_v35 = vor.u32 %v10464_v41, %v9215_v57  ;;  %v10494_v29 = vld [vmem:[%s11187_s29 + $0x7ec] sm:$0xf]  ;;  %v8855_v18 = vld [vmem:[%s11187_s29 + $0x440] sm:$0xf0]  ;;  %v10440_v8 = vld [vmem:[%s11187_s29 + $0x63c] sm:$0xf] }
 0x2f6   : > { %6207 = vmatpush.bf16.msra.mxu0 %v8474_v5  ;;  %v8351_v5 = vld [vmem:[%s11187_s29 + $0x50] sm:$0xf0]  ;;  %6129 = vmatpush.bf16.msra.mxu2 %v8710_v60  ;;  %v10512_v60 = vld [vmem:[%s11187_s29 + $0x87c] sm:$0xf]  ;;  %v8901_v41 = vld [vmem:[%s11187_s29 + $0x488] sm:$0xf] }
 0x2f7   : > { %v8354_v38 = vor.u32 %v10248_v3, %v8351_v5  ;;  %v9410_v3 = vor.u32 %v10512_v60, %v9407_v19  ;;  %v10458_v5 = vld [vmem:[%s11187_s29 + $0x6cc] sm:$0xf]  ;;  %v9837_v60 = vld [vmem:[%s11187_s29 + $0xbd8] sm:$0xf]  ;;  %v10623_v19 = vld [vmem:[%s11187_s29 + $0xbec] sm:$0xf0] }
 0x2f8   : > { %6221 = vmatpush.bf16.msra.mxu1 %v8666_v17  ;;  %v8543_v17 = vld [vmem:[%s11187_s29 + $0x1d0] sm:$0xf0]  ;;  %6086 = vmatpush.bf16.msrb.mxu3 %v9690_v14 }
 0x2f9   : > { %v8546_v42 = vor.u32 %v10296_v63, %v8543_v17  ;;  %6130 = vmatmul.bf16.vlgmr.msra.gmra.mxu2 %v12330_v39  ;;  %v9191_v63 = vld [vmem:[%s11187_s29 + $0x6e0] sm:$0xf0]  ;;  %v10506_v17 = vld [vmem:[%s11187_s29 + $0x84c] sm:$0xf] }
 0x2fa   : > { %6208 = vmatpush.bf16.msra.mxu0 %v8450_v25  ;;  %6178 = vmatpush.bf16.msrb.mxu2 %v9646_v50  ;;  %v10563_v25 = vld [vmem:[%s11187_s29 + $0xa0c] sm:$0xf0]  ;;  %v8997_v50 = vld [vmem:[%s11187_s29 + $0x548] sm:$0xf] }
 0x2fb   : > { %v9598_v45 = vor.u32 %v10563_v25, %v9597_v21  ;;  %v9194_v21 = vor.u32 %v10458_v5, %v9191_v63  ;;  %v10452_v25 = vld [vmem:[%s11187_s29 + $0x69c] sm:$0xf]  ;;  %v10482_v5 = vld [vmem:[%s11187_s29 + $0x78c] sm:$0xf]  ;;  %v9838_v63 = vor.u32 %v10623_v19, %v9837_v60  ;;  %v10599_v60 = vld [vmem:[%s11187_s29 + $0xb2c] sm:$0xf0] }
 0x2fc   : > { %6222 = vmatpush.bf16.msra.mxu1 %v8642_v15  ;;  %v9666_v15 = vor.u32 %v10577_v7, %v9663_v13  ;;  %v9383_v7 = vld [vmem:[%s11187_s29 + $0x860] sm:$0xf0]  ;;  %v10344_v19 = vld [vmem:[%s11187_s29 + $0x33c] sm:$0xf] }
 0x2fe   : > { %6209 = vmatpush.bf16.msra.mxu0 %v8426_v43  ;;  %6179 = vmatpush.bf16.msrb.mxu2 %v9622_v27  ;;  %v8330_v43 = vor.u32 %v10242_v48, %v8327_v61  ;;  %v8973_v27 = vld [vmem:[%s11187_s29 + $0x518] sm:$0xf]  ;;  %v9167_v61 = vld [vmem:[%s11187_s29 + $0x6b0] sm:$0xf0] }
 0x2ff   : > { %6087 = vmatpush.bf16.msrb.mxu3 %v9666_v15  ;;  %v10500_v15 = vld [vmem:[%s11187_s29 + $0x81c] sm:$0xf]  ;;  %v9170_v24 = vor.u32 %v10452_v25, %v9167_v61  ;;  %v8807_v25 = vld [vmem:[%s11187_s29 + $0x3e0] sm:$0xf0] }
 0x300   : > { %6223 = vmatpush.bf16.msra.mxu1 %v8618_v44  ;;  %v8522_v44 = vor.u32 %v10290_v1, %v8519_v33  ;;  %v9359_v1 = vld [vmem:[%s11187_s29 + $0x830] sm:$0xf0]  ;;  %v9502_v33 = vor.u32 %v10539_v6, %v9501_v12  ;;  %v9813_v12 = vld [vmem:[%s11187_s29 + $0xba8] sm:$0xf]  ;;  %v10617_v6 = vld [vmem:[%s11187_s29 + $0xbbc] sm:$0xf0] }
 0x302   : > { %6210 = vmatpush.bf16.msra.mxu0 %v8402_v11  ;;  %v9431_v11 = vld [vmem:[%s11187_s29 + $0x8c0] sm:$0xf0]  ;;  %6180 = vmatpush.bf16.msrb.mxu2 %v9598_v45  ;;  %v9362_v45 = vor.u32 %v10500_v15, %v9359_v1  ;;  %v9814_v1 = vor.u32 %v10617_v6, %v9813_v12  ;;  %v9647_v12 = vld [vmem:[%s11187_s29 + $0xa70] sm:$0xf0] }
 0x303   : > { %6136 = vmatpush.bf16.msra.mxu3 %v9070_v16  ;;  %v9434_v54 = vor.u32 %v10518_v51, %v9431_v11  ;;  %v10401_v16 = vld [vmem:[%s11187_s29 + $0x4fc] sm:$0xf0]  ;;  %v9146_v51 = vor.u32 %v10446_v4, %v9143_v22 }
 0x304   : > { %6224 = vmatpush.bf16.msra.mxu1 %v8594_v53  ;;  %6088 = vmatmul.bf16.vlgmr.msrb.gmra.mxu3 %v12652_v36  ;;  %v9549_v53 = vld [vmem:[%s11187_s29 + $0x998] sm:$0xf] }
 0x305   : > { %v9550_v37 = vor.u32 %v10551_v23, %v9549_v53  ;;  %v9119_v23 = vld [vmem:[%s11187_s29 + $0x650] sm:$0xf0] }
 0x306   : > { %6211 = vmatpush.bf16.msra.mxu0 %v8378_v10  ;;  %6181 = vmatpush.bf16.msrb.mxu2 %v9574_v62  ;;  %v10413_v10 = vld [vmem:[%s11187_s29 + $0x55c] sm:$0xf0]  ;;  %v10374_v62 = vld [vmem:[%s11187_s29 + $0x42c] sm:$0xf] }
 0x307   : > { %6137 = vmatpush.bf16.msra.mxu3 %v9046_v55  ;;  %v8998_v14 = vor.u32 %v10413_v10, %v8997_v50  ;;  %v10395_v55 = vld [vmem:[%s11187_s29 + $0x4cc] sm:$0xf0]  ;;  %v8858_v57 = vor.u32 %v10374_v62, %v8855_v18  ;;  %v10368_v10 = vld [vmem:[%s11187_s29 + $0x3fc] sm:$0xf]  ;;  %v8759_v62 = vld [vmem:[%s11187_s29 + $0x380] sm:$0xf0] }
 0x308   : > { %6225 = vmatpush.bf16.msra.mxu1 %v8570_v47  ;;  %v10545_v47 = vld [vmem:[%s11187_s29 + $0x97c] sm:$0xf0]  ;;  %v8926_v53 = vor.u32 %v10395_v55, %v8925_v0  ;;  %v10324_v55 = vld [vmem:[%s11187_s29 + $0x294] sm:$0xf0] }
 0x309   : > { %v9526_v13 = vor.u32 %v10545_v47, %v9525_v46  ;;  %v8831_v46 = vld [vmem:[%s11187_s29 + $0x410] sm:$0xf0]  ;;  %v10434_v47 = vld [vmem:[%s11187_s29 + $0x60c] sm:$0xf] }
 0x30a   : > { %6212 = vmatpush.bf16.msra.mxu0 %v8354_v38  ;;  %6182 = vmatpush.bf16.msrb.mxu2 %v9550_v37  ;;  %v10407_v38 = vld [vmem:[%s11187_s29 + $0x52c] sm:$0xf0]  ;;  %v9122_v37 = vor.u32 %v10440_v8, %v9119_v23 }
 0x30b   : > { %6138 = vmatpush.bf16.msra.mxu3 %v9022_v2  ;;  %v8974_v48 = vor.u32 %v10407_v38, %v8973_v27  ;;  %v10389_v2 = vld [vmem:[%s11187_s29 + $0x49c] sm:$0xf0]  ;;  %v8834_v27 = vor.u32 %v10368_v10, %v8831_v46  ;;  %v10336_v38 = vld [vmem:[%s11187_s29 + $0x2f4] sm:$0xf0]  ;;  %v8429_v23 = vld [vmem:[%s11187_s29 + $0xd0] sm:$0xf] }
 0x30c   : > { %6226 = vmatpush.bf16.msra.mxu1 %v8546_v42  ;;  %v9386_v42 = vor.u32 %v10506_v17, %v9383_v7  ;;  %v8501_v17 = vld [vmem:[%s11187_s29 + $0x160] sm:$0xf]  ;;  %v10288_v7 = vld [vmem:[%s11187_s29 + $0x174] sm:$0xf0] }
 0x30d   : > { %v8502_v61 = vor.u32 %v10288_v7, %v8501_v17  ;;  %v10593_v17 = vld [vmem:[%s11187_s29 + $0xafc] sm:$0xf0]  ;;  %v10338_v7 = vld [vmem:[%s11187_s29 + $0x30c] sm:$0xf] }
 0x30e   : > { %6213 = vmatpush.bf16.msra.mxu0 %v8330_v43  ;;  %6183 = vmatpush.bf16.msrb.mxu2 %v9526_v13  ;;  %v10380_v43 = vld [vmem:[%s11187_s29 + $0x45c] sm:$0xf]  ;;  %v8693_v13 = vld [vmem:[%s11187_s29 + $0x2e0] sm:$0xf] }
 0x30f   : > { %6139 = vmatpush.bf16.msra.mxu3 %v8998_v14  ;;  %v8882_v58 = vor.u32 %v10380_v43, %v8879_v30  ;;  %v9287_v14 = vld [vmem:[%s11187_s29 + $0x7a0] sm:$0xf0]  ;;  %v8694_v15 = vor.u32 %v10336_v38, %v8693_v13  ;;  %v10356_v43 = vld [vmem:[%s11187_s29 + $0x39c] sm:$0xf]  ;;  %v8783_v30 = vld [vmem:[%s11187_s29 + $0x3b0] sm:$0xf0] }
 0x310   : > { %6227 = vmatpush.bf16.msra.mxu1 %v8522_v44  ;;  %v8950_v44 = vor.u32 %v10401_v16, %v8949_v34  ;;  %v10282_v34 = vld [vmem:[%s11187_s29 + $0x144] sm:$0xf0]  ;;  %v8669_v16 = vld [vmem:[%s11187_s29 + $0x2b0] sm:$0xf]  ;;  %v8786_v0 = vor.u32 %v10356_v43, %v8783_v30  ;;  %v8711_v13 = vld [vmem:[%s11187_s29 + $0x320] sm:$0xf0] }
 0x311   : > { %6214 = vmatmul.bf16.vlgmr.msra.gmra.mxu0 %v12324_v56  ;;  %v10572_v38 = vld [vmem:[%s11187_s29 + $0xa5c] sm:$0xf]  ;;  %v8357_v43 = vld [vmem:[%s11187_s29 + $0x40] sm:$0xf]  ;;  %v10252_v30 = vld [vmem:[%s11187_s29 + $0x54] sm:$0xf0] }
 0x312   : > { %6262 = vmatpush.bf16.msrb.mxu0 %v9266_v9  ;;  %v9335_v9 = vld [vmem:[%s11187_s29 + $0x800] sm:$0xf0]  ;;  %6184 = vmatpush.bf16.msrb.mxu2 %v9502_v33  ;;  %v8477_v33 = vld [vmem:[%s11187_s29 + $0x130] sm:$0xf] }
 0x313   : > { %6228 = vmatmul.bf16.vlgmr.msra.gmra.mxu1 %v12328_v59  ;;  %6140 = vmatpush.bf16.msra.mxu3 %v8974_v48  ;;  %v9338_v11 = vor.u32 %v10494_v29, %v9335_v9  ;;  %v9290_v48 = vor.u32 %v10482_v5, %v9287_v14  ;;  %v8478_v4 = vor.u32 %v10282_v34, %v8477_v33  ;;  %v8453_v29 = vld [vmem:[%s11187_s29 + $0x100] sm:$0xf]  ;;  %v10276_v9 = vld [vmem:[%s11187_s29 + $0x114] sm:$0xf0]  ;;  %v10587_v33 = vld [vmem:[%s11187_s29 + $0xacc] sm:$0xf0] }
 0x314   : > { %6276 = vmatpush.bf16.msrb.mxu1 %v9458_v28  ;;  %v9478_v28 = vor.u32 %v10533_v52, %v9477_v26  ;;  %v10330_v52 = vld [vmem:[%s11187_s29 + $0x2c4] sm:$0xf0]  ;;  %v8454_v18 = vor.u32 %v10276_v9, %v8453_v29  ;;  %v10312_v14 = vld [vmem:[%s11187_s29 + $0x234] sm:$0xf0]  ;;  %v9650_v34 = vor.u32 %v10572_v38, %v9647_v12  ;;  %v10581_v29 = vld [vmem:[%s11187_s29 + $0xa9c] sm:$0xf0] }
 0x315   : > { %v9023_v38 = vld [vmem:[%s11187_s29 + $0x590] sm:$0xf0]  ;;  %v10548_v12 = vld [vmem:[%s11187_s29 + $0x99c] sm:$0xf] }
 0x316   : > { %6263 = vmatpush.bf16.msrb.mxu0 %v9242_v31  ;;  %v10488_v31 = vld [vmem:[%s11187_s29 + $0x7bc] sm:$0xf]  ;;  %6185 = vmatpush.bf16.msrb.mxu2 %v9478_v28  ;;  %v8645_v28 = vld [vmem:[%s11187_s29 + $0x280] sm:$0xf] }
 0x317   : > { %6141 = vmatpush.bf16.msra.mxu3 %v8950_v44  ;;  %v8670_v44 = vor.u32 %v10330_v52, %v8669_v16  ;;  %v8646_v8 = vor.u32 %v10324_v55, %v8645_v28  ;;  %v9623_v52 = vld [vmem:[%s11187_s29 + $0xa40] sm:$0xf0]  ;;  %v10428_v28 = vld [vmem:[%s11187_s29 + $0x5dc] sm:$0xf]  ;;  %v8358_v55 = vor.u32 %v10252_v30, %v8357_v43  ;;  %v9197_v30 = vld [vmem:[%s11187_s29 + $0x6d0] sm:$0xf] }
 0x318   : > { %6277 = vmatpush.bf16.msrb.mxu1 %v9434_v54  ;;  %v9311_v54 = vld [vmem:[%s11187_s29 + $0x7d0] sm:$0xf0] }
 0x319   : > { %v9314_v50 = vor.u32 %v10488_v31, %v9311_v54  ;;  %6186 = vmatmul.bf16.vlgmr.msrb.gmra.mxu2 %v12561_v32  ;;  %v10270_v31 = vld [vmem:[%s11187_s29 + $0xe4] sm:$0xf0]  ;;  %v8621_v54 = vld [vmem:[%s11187_s29 + $0x250] sm:$0xf] }
 0x31a   : > { %6264 = vmatpush.bf16.msrb.mxu0 %v9218_v35  ;;  %6234 = vmatpush.bf16.msra.mxu2 %v8882_v58  ;;  %v8902_v35 = vor.u32 %v10389_v2, %v8901_v41  ;;  %v9765_v58 = vld [vmem:[%s11187_s29 + $0xb48] sm:$0xf] }
 0x31b   : > { %6142 = vmatpush.bf16.msra.mxu3 %v8926_v53  ;;  %v10318_v2 = vld [vmem:[%s11187_s29 + $0x264] sm:$0xf0] }
 0x31c   : > { %6278 = vmatpush.bf16.msrb.mxu1 %v9410_v3  ;;  %v9095_v3 = vld [vmem:[%s11187_s29 + $0x620] sm:$0xf0]  ;;  %v8622_v10 = vor.u32 %v10318_v2, %v8621_v54  ;;  %v9269_v54 = vld [vmem:[%s11187_s29 + $0x760] sm:$0xf] }
 0x31d   : > { %v9461_v2 = vld [vmem:[%s11187_s29 + $0x8e0] sm:$0xf] }
 0x31e   : > { %6265 = vmatpush.bf16.msrb.mxu0 %v9194_v21  ;;  %6235 = vmatpush.bf16.msra.mxu2 %v8858_v57  ;;  %v9098_v21 = vor.u32 %v10434_v47, %v9095_v3  ;;  %v9741_v57 = vld [vmem:[%s11187_s29 + $0xb18] sm:$0xf]  ;;  %v8405_v47 = vld [vmem:[%s11187_s29 + $0xa0] sm:$0xf] }
 0x31f   : > { %6143 = vmatpush.bf16.msra.mxu3 %v8902_v35  ;;  %v9742_v46 = vor.u32 %v10599_v60, %v9741_v57  ;;  %v10264_v35 = vld [vmem:[%s11187_s29 + $0xb4] sm:$0xf0]  ;;  %v8597_v3 = vld [vmem:[%s11187_s29 + $0x220] sm:$0xf] }
 0x320   : > { %6279 = vmatpush.bf16.msrb.mxu1 %v9386_v42  ;;  %v10362_v42 = vld [vmem:[%s11187_s29 + $0x3cc] sm:$0xf]  ;;  %v8598_v6 = vor.u32 %v10312_v14, %v8597_v3  ;;  %v10528_v60 = vld [vmem:[%s11187_s29 + $0x8f4] sm:$0xf0]  ;;  %v9245_v14 = vld [vmem:[%s11187_s29 + $0x730] sm:$0xf] }
 0x321   : > { %v8810_v26 = vor.u32 %v10362_v42, %v8807_v25  ;;  %v8381_v42 = vld [vmem:[%s11187_s29 + $0x70] sm:$0xf]  ;;  %v10258_v25 = vld [vmem:[%s11187_s29 + $0x84] sm:$0xf0]  ;;  %v9462_v3 = vor.u32 %v10528_v60, %v9461_v2  ;;  %v10398_v2 = vld [vmem:[%s11187_s29 + $0x4ec] sm:$0xf] }
 0x322   : > { %6266 = vmatpush.bf16.msrb.mxu0 %v9170_v24  ;;  %6236 = vmatpush.bf16.msra.mxu2 %v8834_v27  ;;  %v9789_v24 = vld [vmem:[%s11187_s29 + $0xb78] sm:$0xf]  ;;  %v8406_v27 = vor.u32 %v10264_v35, %v8405_v47  ;;  %v8382_v16 = vor.u32 %v10258_v25, %v8381_v42  ;;  %v10530_v60 = vld [vmem:[%s11187_s29 + $0x90c] sm:$0xf] }
 0x323   : > { %6192 = vmatpush.bf16.msrb.mxu3 %v9838_v63  ;;  %v9717_v63 = vld [vmem:[%s11187_s29 + $0xae8] sm:$0xf] }
 0x324   : > { %6280 = vmatpush.bf16.msrb.mxu1 %v9362_v45  ;;  %v10611_v45 = vld [vmem:[%s11187_s29 + $0xb8c] sm:$0xf0]  ;;  %6144 = vmatmul.bf16.vlgmr.msra.gmra.mxu3 %v12334_v49 }
 0x325   : > { %v9790_v22 = vor.u32 %v10611_v45, %v9789_v24 }
 0x326   : > { %6267 = vmatpush.bf16.msrb.mxu0 %v9146_v51  ;;  %6237 = vmatpush.bf16.msra.mxu2 %v8810_v26  ;;  %v10605_v51 = vld [vmem:[%s11187_s29 + $0xb5c] sm:$0xf0]  ;;  %v10566_v26 = vld [vmem:[%s11187_s29 + $0xa2c] sm:$0xf] }
 0x327   : > { %6193 = vmatpush.bf16.msrb.mxu3 %v9814_v1  ;;  %v9766_v53 = vor.u32 %v10605_v51, %v9765_v58  ;;  %v9693_v1 = vld [vmem:[%s11187_s29 + $0xab8] sm:$0xf]  ;;  %v9626_v9 = vor.u32 %v10566_v26, %v9623_v52  ;;  %v10560_v58 = vld [vmem:[%s11187_s29 + $0x9fc] sm:$0xf]  ;;  %v9599_v51 = vld [vmem:[%s11187_s29 + $0xa10] sm:$0xf0] }
 0x328   : > { %6281 = vmatpush.bf16.msrb.mxu1 %v9338_v11  ;;  %v10350_v11 = vld [vmem:[%s11187_s29 + $0x36c] sm:$0xf]  ;;  %v9694_v45 = vor.u32 %v10587_v33, %v9693_v1  ;;  %v9602_v57 = vor.u32 %v10560_v58, %v9599_v51  ;;  %v10516_v33 = vld [vmem:[%s11187_s29 + $0x894] sm:$0xf0]  ;;  %v9527_v52 = vld [vmem:[%s11187_s29 + $0x980] sm:$0xf0]  ;;  %v12892_v51 = vpop.f32.mrf.mxu1 }
 0x329   : > { %v8762_v41 = vor.u32 %v10350_v11, %v8759_v62  ;;  %v8333_v11 = vld [vmem:[%s11187_s29 + $0x10] sm:$0xf]  ;;  %v10542_v26 = vld [vmem:[%s11187_s29 + $0x96c] sm:$0xf]  ;;  %v9503_v58 = vld [vmem:[%s11187_s29 + $0x950] sm:$0xf0] }
 0x32a   : > { %6268 = vmatpush.bf16.msrb.mxu0 %v9122_v37  ;;  %6238 = vmatpush.bf16.msra.mxu2 %v8786_v0  ;;  %v8735_v37 = vld [vmem:[%s11187_s29 + $0x350] sm:$0xf0] }
 0x32b   : > { %6194 = vmatpush.bf16.msrb.mxu3 %v9790_v22  ;;  %v8738_v5 = vor.u32 %v10344_v19, %v8735_v37  ;;  %v9669_v22 = vld [vmem:[%s11187_s29 + $0xa88] sm:$0xf]  ;;  %v9071_v0 = vld [vmem:[%s11187_s29 + $0x5f0] sm:$0xf0]  ;;  %v10422_v19 = vld [vmem:[%s11187_s29 + $0x5ac] sm:$0xf] }
 0x32c   : > { %6282 = vmatpush.bf16.msrb.mxu1 %v9314_v50  ;;  %v8430_v50 = vor.u32 %v10270_v31, %v8429_v23  ;;  %v10294_v23 = vld [vmem:[%s11187_s29 + $0x1a4] sm:$0xf0]  ;;  %v9074_v31 = vor.u32 %v10428_v28, %v9071_v0  ;;  %v9047_v37 = vld [vmem:[%s11187_s29 + $0x5c0] sm:$0xf0]  ;;  %v10404_v28 = vld [vmem:[%s11187_s29 + $0x51c] sm:$0xf] }
 0x32d   : > { %v8975_v0 = vld [vmem:[%s11187_s29 + $0x530] sm:$0xf0] }
 0x32e   : > { %6269 = vmatpush.bf16.msrb.mxu0 %v9098_v21  ;;  %6239 = vmatpush.bf16.msra.mxu2 %v8762_v41  ;;  %v9718_v21 = vor.u32 %v10593_v17, %v9717_v63  ;;  %v10480_v41 = vld [vmem:[%s11187_s29 + $0x774] sm:$0xf0]  ;;  %v10474_v63 = vld [vmem:[%s11187_s29 + $0x744] sm:$0xf0]  ;;  %v9437_v17 = vld [vmem:[%s11187_s29 + $0x8b0] sm:$0xf] }
 0x32f   : > { %6195 = vmatpush.bf16.msrb.mxu3 %v9766_v53  ;;  %v8525_v53 = vld [vmem:[%s11187_s29 + $0x190] sm:$0xf]  ;;  %v9270_v35 = vor.u32 %v10480_v41, %v9269_v54  ;;  %v10504_v41 = vld [vmem:[%s11187_s29 + $0x834] sm:$0xf0] }
 0x330   : > { %6283 = vmatpush.bf16.msrb.mxu1 %v9290_v48  ;;  %v8573_v48 = vld [vmem:[%s11187_s29 + $0x1f0] sm:$0xf]  ;;  %v8526_v47 = vor.u32 %v10294_v23, %v8525_v53  ;;  %v10456_v53 = vld [vmem:[%s11187_s29 + $0x6b4] sm:$0xf0]  ;;  %v9365_v23 = vld [vmem:[%s11187_s29 + $0x820] sm:$0xf] }
 0x331   : > { %6270 = vmatmul.bf16.vlgmr.msrb.gmra.mxu0 %v12393_v20 }
 0x332   : > { %6318 = vmatpush.bf16.msra.mxu0 %v8502_v61  ;;  %6240 = vmatpush.bf16.msra.mxu2 %v8738_v5  ;;  %v8714_v61 = vor.u32 %v10338_v7, %v8711_v13  ;;  %v9050_v5 = vor.u32 %v10422_v19, %v9047_v37  ;;  %v10522_v13 = vld [vmem:[%s11187_s29 + $0x8c4] sm:$0xf0]  ;;  %v9479_v19 = vld [vmem:[%s11187_s29 + $0x920] sm:$0xf0] }
 0x333   : > { %6284 = vmatmul.bf16.vlgmr.msrb.gmra.mxu1 %v12436_v40  ;;  %6196 = vmatpush.bf16.msrb.mxu3 %v9742_v46  ;;  %v9575_v46 = vld [vmem:[%s11187_s29 + $0x9e0] sm:$0xf0]  ;;  %v9438_v42 = vor.u32 %v10522_v13, %v9437_v17  ;;  %v10392_v17 = vld [vmem:[%s11187_s29 + $0x4bc] sm:$0xf] }
 0x334   : > { %6332 = vmatpush.bf16.msra.mxu1 %v8694_v15  ;;  %v10306_v15 = vld [vmem:[%s11187_s29 + $0x204] sm:$0xf0] }
 0x335   : > { %v8574_v24 = vor.u32 %v10306_v15, %v8573_v48  ;;  %v9221_v48 = vld [vmem:[%s11187_s29 + $0x700] sm:$0xf] }
 0x336   : > { %6319 = vmatpush.bf16.msra.mxu0 %v8478_v4  ;;  %v8549_v4 = vld [vmem:[%s11187_s29 + $0x1c0] sm:$0xf]  ;;  %6241 = vmatpush.bf16.msra.mxu2 %v8714_v61  ;;  %v10468_v61 = vld [vmem:[%s11187_s29 + $0x714] sm:$0xf0] }
 0x337   : > { %6197 = vmatpush.bf16.msrb.mxu3 %v9718_v21  ;;  %v9246_v21 = vor.u32 %v10474_v63, %v9245_v14  ;;  %v9413_v15 = vld [vmem:[%s11187_s29 + $0x880] sm:$0xf]  ;;  %v9482_v14 = vor.u32 %v10530_v60, %v9479_v19  ;;  %v10498_v63 = vld [vmem:[%s11187_s29 + $0x804] sm:$0xf0] }
 0x338   : > { %6333 = vmatpush.bf16.msra.mxu1 %v8670_v44  ;;  %v10300_v44 = vld [vmem:[%s11187_s29 + $0x1d4] sm:$0xf0]  ;;  %v10366_v60 = vld [vmem:[%s11187_s29 + $0x3e4] sm:$0xf0] }
 0x339   : > { %v8550_v62 = vor.u32 %v10300_v44, %v8549_v4  ;;  %6242 = vmatmul.bf16.vlgmr.msra.gmra.mxu2 %v12330_v39  ;;  %v10462_v4 = vld [vmem:[%s11187_s29 + $0x6e4] sm:$0xf0]  ;;  %v9389_v44 = vld [vmem:[%s11187_s29 + $0x850] sm:$0xf] }
 0x33a   : > { %6320 = vmatpush.bf16.msra.mxu0 %v8454_v18  ;;  %6290 = vmatpush.bf16.msrb.mxu2 %v9650_v34  ;;  %v9670_v18 = vor.u32 %v10581_v29, %v9669_v22  ;;  %v10410_v34 = vld [vmem:[%s11187_s29 + $0x54c] sm:$0xf]  ;;  %v12885_v22 = vpop.f32.mrf.mxu0  ;;  %v9530_v29 = vor.u32 %v10542_v26, %v9527_v52  ;;  %v10620_v26 = vld [vmem:[%s11187_s29 + $0xbdc] sm:$0xf]  ;;  %v9839_v52 = vld [vmem:[%s11187_s29 + $0xbf0] sm:$0xf0] }
 0x33b   : > { %6198 = vmatpush.bf16.msrb.mxu3 %v9694_v45  ;;  %v9414_v45 = vor.u32 %v10516_v33, %v9413_v15  ;;  %v12919_v15 = vpop.f32.mrf.mxu1  ;;  %v10386_v33 = vld [vmem:[%s11187_s29 + $0x48c] sm:$0xf] }
 0x33c   : > { %6334 = vmatpush.bf16.msra.mxu1 %v8646_v8  ;;  %v10246_v8 = vld [vmem:[%s11187_s29 + $0x24] sm:$0xf0] }
 0x33e   : > { %6321 = vmatpush.bf16.msra.mxu0 %v8430_v50  ;;  %6291 = vmatpush.bf16.msrb.mxu2 %v9626_v9  ;;  %v8334_v50 = vor.u32 %v10246_v8, %v8333_v11  ;;  %v10510_v9 = vld [vmem:[%s11187_s29 + $0x864] sm:$0xf0]  ;;  %v9198_v11 = vor.u32 %v10462_v4, %v9197_v30  ;;  %v9173_v8 = vld [vmem:[%s11187_s29 + $0x6a0] sm:$0xf]  ;;  %v10372_v30 = vld [vmem:[%s11187_s29 + $0x414] sm:$0xf0] }
 0x33f   : > { %6199 = vmatpush.bf16.msrb.mxu3 %v9670_v18  ;;  %v8978_v18 = vor.u32 %v10404_v28, %v8975_v0  ;;  %v9174_v37 = vor.u32 %v10456_v53, %v9173_v8  ;;  %v9101_v4 = vld [vmem:[%s11187_s29 + $0x610] sm:$0xf]  ;;  %v10486_v0 = vld [vmem:[%s11187_s29 + $0x7a4] sm:$0xf0]  ;;  %v8695_v53 = vld [vmem:[%s11187_s29 + $0x2f8] sm:$0xf0] }
 0x340   : > { %6335 = vmatpush.bf16.msra.mxu1 %v8622_v10  ;;  %v10554_v10 = vld [vmem:[%s11187_s29 + $0x9cc] sm:$0xf]  ;;  %v9293_v28 = vld [vmem:[%s11187_s29 + $0x790] sm:$0xf] }
 0x341   : > { %v9578_v7 = vor.u32 %v10554_v10, %v9575_v46  ;;  %v10384_v10 = vld [vmem:[%s11187_s29 + $0x474] sm:$0xf0]  ;;  %v9366_v46 = vor.u32 %v10504_v41, %v9365_v23  ;;  %v10614_v23 = vld [vmem:[%s11187_s29 + $0xbac] sm:$0xf]  ;;  %v9294_v19 = vor.u32 %v10486_v0, %v9293_v28 }
 0x342   : > { %6322 = vmatpush.bf16.msra.mxu0 %v8406_v27  ;;  %6292 = vmatpush.bf16.msrb.mxu2 %v9602_v57  ;;  %v10416_v27 = vld [vmem:[%s11187_s29 + $0x57c] sm:$0xf]  ;;  %v8951_v57 = vld [vmem:[%s11187_s29 + $0x500] sm:$0xf0] }
 0x343   : > { %6248 = vmatpush.bf16.msra.mxu3 %v9074_v31  ;;  %v9026_v25 = vor.u32 %v10416_v27, %v9023_v38  ;;  %v12897_v31 = vpop.f32.mrf.mxu2  ;;  %v12912_v27 = vpop.f32.mrf.mxu0 }
 0x344   : > { %6336 = vmatpush.bf16.msra.mxu1 %v8598_v6  ;;  %6200 = vmatmul.bf16.vlgmr.msrb.gmra.mxu3 %v12652_v36  ;;  %v9551_v6 = vld [vmem:[%s11187_s29 + $0x9b0] sm:$0xf0]  ;;  %v5896_v28 = vadd.f32 %v12919_v15, %v12912_v27 }
 0x345   : > { %v9554_v1 = vor.u32 %v10548_v12, %v9551_v6  ;;  %v8861_v12 = vld [vmem:[%s11187_s29 + $0x430] sm:$0xf]  ;;  %v10378_v6 = vld [vmem:[%s11187_s29 + $0x444] sm:$0xf0] }
 0x346   : > { %6323 = vmatpush.bf16.msra.mxu0 %v8382_v16  ;;  %6293 = vmatpush.bf16.msrb.mxu2 %v9578_v7  ;;  %v8999_v16 = vld [vmem:[%s11187_s29 + $0x560] sm:$0xf0]  ;;  %v8927_v7 = vld [vmem:[%s11187_s29 + $0x4d0] sm:$0xf0] }
 0x347   : > { %6249 = vmatpush.bf16.msra.mxu3 %v9050_v5  ;;  %v9002_v43 = vor.u32 %v10410_v34, %v8999_v16  ;;  %v9341_v5 = vld [vmem:[%s11187_s29 + $0x7f0] sm:$0xf]  ;;  %v8903_v34 = vld [vmem:[%s11187_s29 + $0x4a0] sm:$0xf0]  ;;  %v8862_v16 = vor.u32 %v10378_v6, %v8861_v12  ;;  %v10360_v12 = vld [vmem:[%s11187_s29 + $0x3b4] sm:$0xf0] }
 0x348   : > { %6337 = vmatpush.bf16.msra.mxu1 %v8574_v24  ;;  %v9222_v24 = vor.u32 %v10468_v61, %v9221_v48  ;;  %v10444_v48 = vld [vmem:[%s11187_s29 + $0x654] sm:$0xf0]  ;;  %v9317_v61 = vld [vmem:[%s11187_s29 + $0x7c0] sm:$0xf] }
 0x34a   : > { %6324 = vmatpush.bf16.msra.mxu0 %v8358_v55  ;;  %6294 = vmatpush.bf16.msrb.mxu2 %v9554_v1  ;;  %v10536_v55 = vld [vmem:[%s11187_s29 + $0x93c] sm:$0xf]  ;;  %v10492_v1 = vld [vmem:[%s11187_s29 + $0x7d4] sm:$0xf0] }
 0x34b   : > { %6250 = vmatpush.bf16.msra.mxu3 %v9026_v25  ;;  %v9506_v54 = vor.u32 %v10536_v55, %v9503_v58  ;;  %v9125_v25 = vld [vmem:[%s11187_s29 + $0x640] sm:$0xf]  ;;  %v5921_v55 = vpop.f32.mrf.mxu3  ;;  %v9842_v58 = vor.u32 %v10620_v26, %v9839_v52  ;;  %v5935_v41 = vpop.f32.mrf.mxu0  ;;  %v10354_v26 = vld [vmem:[%s11187_s29 + $0x384] sm:$0xf0] }
 0x34c   : > { %6338 = vmatpush.bf16.msra.mxu1 %v8550_v62  ;;  %v9390_v62 = vor.u32 %v10510_v9, %v9389_v44  ;;  %v9318_v44 = vor.u32 %v10492_v1, %v9317_v61  ;;  %v10438_v9 = vld [vmem:[%s11187_s29 + $0x624] sm:$0xf0]  ;;  %v8647_v1 = vld [vmem:[%s11187_s29 + $0x298] sm:$0xf0] }
 0x34e   : > { %6325 = vmatpush.bf16.msra.mxu0 %v8334_v50  ;;  %6295 = vmatpush.bf16.msrb.mxu2 %v9530_v29  ;;  %v8885_v50 = vld [vmem:[%s11187_s29 + $0x460] sm:$0xf]  ;;  %v8906_v29 = vor.u32 %v10386_v33, %v8903_v34  ;;  %v9767_v33 = vld [vmem:[%s11187_s29 + $0xb60] sm:$0xf0] }
 0x34f   : > { %6251 = vmatpush.bf16.msra.mxu3 %v9002_v43  ;;  %v8886_v13 = vor.u32 %v10384_v10, %v8885_v50  ;;  %v8837_v43 = vld [vmem:[%s11187_s29 + $0x400] sm:$0xf]  ;;  %v5949_v50 = vpop.f32.mrf.mxu1 }
 0x350   : > { %6339 = vmatpush.bf16.msra.mxu1 %v8526_v47  ;;  %v8954_v47 = vor.u32 %v10398_v2, %v8951_v57  ;;  %v8838_v8 = vor.u32 %v10372_v30, %v8837_v43  ;;  %v9102_v2 = vor.u32 %v10438_v9, %v9101_v4  ;;  %v8813_v57 = vld [vmem:[%s11187_s29 + $0x3d0] sm:$0xf]  ;;  %v10315_v9 = vld [vmem:[%s11187_s29 + $0x254] sm:$0xf] }
 0x351   : > { %6326 = vmatmul.bf16.vlgmr.msra.gmra.mxu0 %v12324_v56 }
 0x352   : > { %6374 = vmatpush.bf16.msrb.mxu0 %v9270_v35  ;;  %v9149_v35 = vld [vmem:[%s11187_s29 + $0x670] sm:$0xf]  ;;  %6296 = vmatpush.bf16.msrb.mxu2 %v9506_v54  ;;  %v9815_v54 = vld [vmem:[%s11187_s29 + $0xbc0] sm:$0xf0] }
 0x353   : > { %6340 = vmatmul.bf16.vlgmr.msra.gmra.mxu1 %v12328_v59  ;;  %6252 = vmatpush.bf16.msra.mxu3 %v8978_v18  ;;  %v10333_v18 = vld [vmem:[%s11187_s29 + $0x2e4] sm:$0xf]  ;;  %v5923_v34 = vpop.f32.mrf.mxu3  ;;  %v5937_v43 = vpop.f32.mrf.mxu0 }
 0x354   : > { %6388 = vmatpush.bf16.msrb.mxu1 %v9462_v3  ;;  %v10450_v3 = vld [vmem:[%s11187_s29 + $0x684] sm:$0xf0]  ;;  %v8698_v10 = vor.u32 %v10333_v18, %v8695_v53  ;;  %v10348_v53 = vld [vmem:[%s11187_s29 + $0x354] sm:$0xf0] }
 0x355   : > { %v9150_v38 = vor.u32 %v10450_v3, %v9149_v35  ;;  %v8479_v35 = vld [vmem:[%s11187_s29 + $0x148] sm:$0xf0]  ;;  %v10327_v3 = vld [vmem:[%s11187_s29 + $0x2b4] sm:$0xf] }
 0x356   : > { %6375 = vmatpush.bf16.msrb.mxu0 %v9246_v21  ;;  %v9342_v21 = vor.u32 %v10498_v63, %v9341_v5  ;;  %6297 = vmatpush.bf16.msrb.mxu2 %v9482_v14  ;;  %v5894_v5 = vadd.f32 %v12892_v51, %v12885_v22  ;;  %v8814_v14 = vor.u32 %v10366_v60, %v8813_v57  ;;  %v8671_v63 = vld [vmem:[%s11187_s29 + $0x2c8] sm:$0xf0]  ;;  %v10261_v57 = vld [vmem:[%s11187_s29 + $0xa4] sm:$0xf]  ;;  %v8407_v60 = vld [vmem:[%s11187_s29 + $0xb8] sm:$0xf0] }
 0x357   : > { %6253 = vmatpush.bf16.msra.mxu3 %v8954_v47  ;;  %v10279_v47 = vld [vmem:[%s11187_s29 + $0x134] sm:$0xf]  ;;  %v8674_v51 = vor.u32 %v10327_v3, %v8671_v63  ;;  %v5951_v18 = vpop.f32.mrf.mxu1  ;;  %v8717_v3 = vld [vmem:[%s11187_s29 + $0x310] sm:$0xf] }
 0x358   : > { %6389 = vmatpush.bf16.msrb.mxu1 %v9438_v42  ;;  %v8930_v42 = vor.u32 %v10392_v17, %v8927_v7  ;;  %v10608_v17 = vld [vmem:[%s11187_s29 + $0xb7c] sm:$0xf]  ;;  %v9791_v7 = vld [vmem:[%s11187_s29 + $0xb90] sm:$0xf0]  ;;  %v5908_v6 = vadd.f32 %v12897_v31, %v5894_v5  ;;  %v8482_v22 = vor.u32 %v10279_v47, %v8479_v35  ;;  %v10602_v31 = vld [vmem:[%s11187_s29 + $0xb4c] sm:$0xf] }
 0x359   : > { %6298 = vmatmul.bf16.vlgmr.msrb.gmra.mxu2 %v12561_v32  ;;  %v9770_v4 = vor.u32 %v10602_v31, %v9767_v33  ;;  %v3546_v47 = vld [vmem:[#allocation11] sm:$0xff]  ;;  %v9695_v31 = vld [vmem:[%s11187_s29 + $0xad0] sm:$0xf0] }
 0x35a   : > { %6376 = vmatpush.bf16.msrb.mxu0 %v9222_v24  ;;  %6346 = vmatpush.bf16.msra.mxu2 %v8886_v13  ;;  %v12926_v24 = vpop.f32.mrf.mxu2  ;;  %v5922_v52 = vadd.f32 %v5921_v55, %v5908_v6  ;;  %v10342_v5 = vld [vmem:[%s11187_s29 + $0x324] sm:$0xf0] }
 0x35b   : > { %6254 = vmatpush.bf16.msra.mxu3 %v8930_v42  ;;  %v10273_v42 = vld [vmem:[%s11187_s29 + $0x104] sm:$0xf] }
 0x35c   : > { %6390 = vmatpush.bf16.msrb.mxu1 %v9414_v45  ;;  %v9126_v45 = vor.u32 %v10444_v48, %v9125_v25  ;;  %v8455_v25 = vld [vmem:[%s11187_s29 + $0x118] sm:$0xf0]  ;;  %v10321_v48 = vld [vmem:[%s11187_s29 + $0x284] sm:$0xf]  ;;  %v5936_v0 = vadd.f32 %v5935_v41, %v5922_v52  ;;  %v10570_v52 = vld [vmem:[%s11187_s29 + $0xa44] sm:$0xf0] }
 0x35d   : > { %v8650_v30 = vor.u32 %v10321_v48, %v8647_v1  ;;  %v8718_v48 = vor.u32 %v10342_v5, %v8717_v3  ;;  %v10584_v1 = vld [vmem:[%s11187_s29 + $0xabc] sm:$0xf] }
 0x35e   : > { %6377 = vmatpush.bf16.msrb.mxu0 %v9198_v11  ;;  %v10285_v11 = vld [vmem:[%s11187_s29 + $0x164] sm:$0xf]  ;;  %6347 = vmatpush.bf16.msra.mxu2 %v8862_v16  ;;  %v8765_v16 = vld [vmem:[%s11187_s29 + $0x370] sm:$0xf]  ;;  %v9463_v5 = vld [vmem:[%s11187_s29 + $0x8f8] sm:$0xf0] }
 0x35f   : > { %6255 = vmatpush.bf16.msra.mxu3 %v8906_v29  ;;  %v8431_v29 = vld [vmem:[%s11187_s29 + $0xe8] sm:$0xf0]  ;;  %v8766_v55 = vor.u32 %v10354_v26, %v8765_v16  ;;  %v9629_v26 = vld [vmem:[%s11187_s29 + $0xa30] sm:$0xf] }
 0x360   : > { %6391 = vmatpush.bf16.msrb.mxu1 %v9390_v62  ;;  %v8503_v62 = vld [vmem:[%s11187_s29 + $0x178] sm:$0xf0] }
 0x361   : > { %v5977_v35 = vpop.f32.mrf.mxu3 }
 0x362   : > { %6378 = vmatpush.bf16.msrb.mxu0 %v9174_v37  ;;  %v8506_v37 = vor.u32 %v10285_v11, %v8503_v62  ;;  %6348 = vmatpush.bf16.msra.mxu2 %v8838_v8  ;;  %v5963_v13 = vpop.f32.mrf.mxu2  ;;  %v10596_v11 = vld [vmem:[%s11187_s29 + $0xb1c] sm:$0xf]  ;;  %v9743_v62 = vld [vmem:[%s11187_s29 + $0xb30] sm:$0xf0]  ;;  %v8741_v8 = vld [vmem:[%s11187_s29 + $0x340] sm:$0xf] }
 0x363   : > { %6304 = vmatpush.bf16.msrb.mxu3 %v9842_v58  ;;  %v8623_v58 = vld [vmem:[%s11187_s29 + $0x268] sm:$0xf0] }
 0x364   : > { %6392 = vmatpush.bf16.msrb.mxu1 %v9366_v46  ;;  %v9818_v46 = vor.u32 %v10614_v23, %v9815_v54  ;;  %6256 = vmatmul.bf16.vlgmr.msra.gmra.mxu3 %v12334_v49  ;;  %v5910_v23 = vadd.f32 %v12926_v24, %v5896_v28  ;;  %v5950_v54 = vadd.f32 %v5949_v50, %v5936_v0  ;;  %v10590_v50 = vld [vmem:[%s11187_s29 + $0xaec] sm:$0xf]  ;;  %v8551_v28 = vld [vmem:[%s11187_s29 + $0x1d8] sm:$0xf0] }
 0x365   : > { %v8626_v41 = vor.u32 %v10315_v9, %v8623_v58  ;;  %v8742_v24 = vor.u32 %v10348_v53, %v8741_v8  ;;  %v10578_v0 = vld [vmem:[%s11187_s29 + $0xa8c] sm:$0xf]  ;;  %v9077_v8 = vld [vmem:[%s11187_s29 + $0x5e0] sm:$0xf]  ;;  %v10432_v53 = vld [vmem:[%s11187_s29 + $0x5f4] sm:$0xf0] }
 0x366   : > { %6379 = vmatpush.bf16.msrb.mxu0 %v9150_v38  ;;  %v8789_v38 = vld [vmem:[%s11187_s29 + $0x3a0] sm:$0xf]  ;;  %6349 = vmatpush.bf16.msra.mxu2 %v8814_v14  ;;  %v5924_v14 = vadd.f32 %v5923_v34, %v5910_v23 }
 0x367   : > { %6305 = vmatpush.bf16.msrb.mxu3 %v9818_v46  ;;  %v8790_v61 = vor.u32 %v10360_v12, %v8789_v38  ;;  %v9719_v46 = vld [vmem:[%s11187_s29 + $0xb00] sm:$0xf0]  ;;  %v12986_v38 = vpop.f32.mrf.mxu0 }
 0x368   : > { %6393 = vmatpush.bf16.msrb.mxu1 %v9342_v21  ;;  %v9794_v21 = vor.u32 %v10608_v17, %v9791_v7  ;;  %v8410_v17 = vor.u32 %v10261_v57, %v8407_v60  ;;  %v9653_v7 = vld [vmem:[%s11187_s29 + $0xa60] sm:$0xf]  ;;  %v9722_v6 = vor.u32 %v10590_v50, %v9719_v46  ;;  %v8335_v60 = vld [vmem:[%s11187_s29 + $0x28] sm:$0xf0]  ;;  %v10477_v50 = vld [vmem:[%s11187_s29 + $0x764] sm:$0xf] }
 0x369   : > { %v9271_v46 = vld [vmem:[%s11187_s29 + $0x778] sm:$0xf0] }
 0x36a   : > { %6380 = vmatpush.bf16.msrb.mxu0 %v9126_v45  ;;  %v8458_v45 = vor.u32 %v10273_v42, %v8455_v25  ;;  %6350 = vmatpush.bf16.msra.mxu2 %v8790_v61  ;;  %v5965_v15 = vpop.f32.mrf.mxu2  ;;  %v5938_v42 = vadd.f32 %v5937_v43, %v5924_v14  ;;  %v8575_v61 = vld [vmem:[%s11187_s29 + $0x208] sm:$0xf0]  ;;  %v9053_v14 = vld [vmem:[%s11187_s29 + $0x5b0] sm:$0xf] }
 0x36b   : > { %6306 = vmatpush.bf16.msrb.mxu3 %v9794_v21  ;;  %v10303_v21 = vld [vmem:[%s11187_s29 + $0x1f4] sm:$0xf] }
 0x36c   : > { %6394 = vmatpush.bf16.msrb.mxu1 %v9318_v44  ;;  %v10267_v44 = vld [vmem:[%s11187_s29 + $0xd4] sm:$0xf]  ;;  %v5952_v34 = vadd.f32 %v5951_v18, %v5938_v42  ;;  %v8578_v43 = vor.u32 %v10303_v21, %v8575_v61  ;;  %v9630_v18 = vor.u32 %v10570_v52, %v9629_v26  ;;  %v10552_v52 = vld [vmem:[%s11187_s29 + $0x9b4] sm:$0xf0] }
 0x36d   : > { %v8434_v27 = vor.u32 %v10267_v44, %v8431_v29  ;;  %v8359_v44 = vld [vmem:[%s11187_s29 + $0x58] sm:$0xf0]  ;;  %v10297_v29 = vld [vmem:[%s11187_s29 + $0x1c4] sm:$0xf]  ;;  %v10471_v42 = vld [vmem:[%s11187_s29 + $0x734] sm:$0xf] }
 0x36e   : > { %6381 = vmatpush.bf16.msrb.mxu0 %v9102_v2  ;;  %v9746_v2 = vor.u32 %v10596_v11, %v9743_v62  ;;  %6351 = vmatpush.bf16.msra.mxu2 %v8766_v55  ;;  %v5966_v9 = vadd.f32 %v5965_v15, %v5952_v34  ;;  %v9671_v55 = vld [vmem:[%s11187_s29 + $0xaa0] sm:$0xf0]  ;;  %v3552_v11 = vld [vmem:[#allocation11 + $0x30] sm:$0xff]  ;;  %v5979_v62 = vpop.f32.mrf.mxu3  ;;  %v9029_v34 = vld [vmem:[%s11187_s29 + $0x580] sm:$0xf] }
 0x36f   : > { %6307 = vmatpush.bf16.msrb.mxu3 %v9770_v4  ;;  %v10249_v4 = vld [vmem:[%s11187_s29 + $0x44] sm:$0xf]  ;;  %v10564_v15 = vld [vmem:[%s11187_s29 + $0xa14] sm:$0xf0]  ;;  %v9674_v57 = vor.u32 %v10578_v0, %v9671_v55 }
 0x370   : > { %6395 = vmatpush.bf16.msrb.mxu1 %v9294_v19  ;;  %v10309_v19 = vld [vmem:[%s11187_s29 + $0x224] sm:$0xf]  ;;  %v5980_v23 = vadd.f32 %v5979_v62, %v5966_v9  ;;  %v9223_v9 = vld [vmem:[%s11187_s29 + $0x718] sm:$0xf0]  ;;  %v10414_v62 = vld [vmem:[%s11187_s29 + $0x564] sm:$0xf0] }
 0x371   : > { %6382 = vmatmul.bf16.vlgmr.msrb.gmra.mxu0 %v12393_v20 }
 0x372   : > { %6430 = vmatpush.bf16.msra.mxu0 %v8506_v37  ;;  %v5964_v37 = vadd.f32 %v5963_v13, %v5950_v54  ;;  %v10576_v13 = vld [vmem:[%s11187_s29 + $0xa74] sm:$0xf0]  ;;  %6352 = vmatpush.bf16.msra.mxu2 %v8742_v24  ;;  %v6019_v58 = vpop.f32.mrf.mxu2  ;;  %v8362_v54 = vor.u32 %v10249_v4, %v8359_v44  ;;  %v6548_v24 = vadd.f32 %v5980_v23, %v3552_v11  ;;  %v9005_v11 = vld [vmem:[%s11187_s29 + $0x550] sm:$0xf] }
 0x373   : > { %6396 = vmatmul.bf16.vlgmr.msrb.gmra.mxu1 %v12436_v40  ;;  %6308 = vmatpush.bf16.msrb.mxu3 %v9746_v2  ;;  %v9654_v33 = vor.u32 %v10576_v13, %v9653_v7  ;;  %v8554_v2 = vor.u32 %v10297_v29, %v8551_v28  ;;  %v9581_v7 = vld [vmem:[%s11187_s29 + $0x9d0] sm:$0xf]  ;;  %v10558_v13 = vld [vmem:[%s11187_s29 + $0x9e4] sm:$0xf0]  ;;  %v10465_v29 = vld [vmem:[%s11187_s29 + $0x704] sm:$0xf] }
 0x374   : > { %6444 = vmatpush.bf16.msra.mxu1 %v8698_v10  ;;  %v8599_v10 = vld [vmem:[%s11187_s29 + $0x238] sm:$0xf0]  ;;  %v5978_v63 = vadd.f32 %v5977_v35, %v5964_v37  ;;  %v8527_v37 = vld [vmem:[%s11187_s29 + $0x1a8] sm:$0xf0]  ;;  %v5993_v35 = vpop.f32.mrf.mxu0  ;;  %6560 = vst [vmem:[#allocation11 + $0x30] sm:$0xff] %v6548_v24  ;;  %v9226_v23 = vor.u32 %v10465_v29, %v9223_v9 }
 0x375   : > { %v8602_v12 = vor.u32 %v10309_v19, %v8599_v10  ;;  %v10291_v19 = vld [vmem:[%s11187_s29 + $0x194] sm:$0xf]  ;;  %v9078_v10 = vor.u32 %v10432_v53, %v9077_v8  ;;  %v10513_v28 = vld [vmem:[%s11187_s29 + $0x884] sm:$0xf]  ;;  %v10546_v8 = vld [vmem:[%s11187_s29 + $0x984] sm:$0xf0] }
 0x376   : > { %6431 = vmatpush.bf16.msra.mxu0 %v8482_v22  ;;  %v10255_v22 = vld [vmem:[%s11187_s29 + $0x74] sm:$0xf]  ;;  %v6542_v25 = vadd.f32 %v5978_v63, %v3546_v47  ;;  %6353 = vmatpush.bf16.msra.mxu2 %v8718_v48  ;;  %v10525_v47 = vld [vmem:[%s11187_s29 + $0x8e4] sm:$0xf]  ;;  %v10426_v63 = vld [vmem:[%s11187_s29 + $0x5c4] sm:$0xf0] }
 0x377   : > { %6309 = vmatpush.bf16.msrb.mxu3 %v9722_v6  ;;  %v9274_v6 = vor.u32 %v10477_v50, %v9271_v46  ;;  %v9054_v21 = vor.u32 %v10426_v63, %v9053_v14  ;;  %v10519_v48 = vld [vmem:[%s11187_s29 + $0x8b4] sm:$0xf]  ;;  %v10408_v24 = vld [vmem:[%s11187_s29 + $0x534] sm:$0xf0]  ;;  %v9509_v50 = vld [vmem:[%s11187_s29 + $0x940] sm:$0xf] }
 0x378   : > { %6445 = vmatpush.bf16.msra.mxu1 %v8674_v51  ;;  %v8383_v51 = vld [vmem:[%s11187_s29 + $0x88] sm:$0xf0]  ;;  %6554 = vst [vmem:[#allocation11] sm:$0xff] %v6542_v25  ;;  %v10540_v46 = vld [vmem:[%s11187_s29 + $0x954] sm:$0xf0] }
 0x379   : > { %v8386_v16 = vor.u32 %v10255_v22, %v8383_v51  ;;  %6354 = vmatmul.bf16.vlgmr.msra.gmra.mxu2 %v12330_v39  ;;  %v9466_v51 = vor.u32 %v10525_v47, %v9463_v5  ;;  %v9247_v25 = vld [vmem:[%s11187_s29 + $0x748] sm:$0xf0]  ;;  %v10396_v29 = vld [vmem:[%s11187_s29 + $0x4d4] sm:$0xf0] }
 0x37a   : > { %6432 = vmatpush.bf16.msra.mxu0 %v8458_v45  ;;  %v6005_v45 = vpop.f32.mrf.mxu1  ;;  %6402 = vmatpush.bf16.msrb.mxu2 %v9654_v33  ;;  %v9439_v33 = vld [vmem:[%s11187_s29 + $0x8c8] sm:$0xf0] }
 0x37b   : > { %v6006_v22 = vadd.f32 %v6005_v45, %v12986_v38  ;;  %v9557_v38 = vld [vmem:[%s11187_s29 + $0x9a0] sm:$0xf]  ;;  %v6021_v45 = vpop.f32.mrf.mxu2  ;;  %v9442_v4 = vor.u32 %v10519_v48, %v9439_v33  ;;  %v10447_v33 = vld [vmem:[%s11187_s29 + $0x674] sm:$0xf] }
 0x37c   : > { %6446 = vmatpush.bf16.msra.mxu1 %v8650_v30  ;;  %v9698_v30 = vor.u32 %v10584_v1, %v9695_v31  ;;  %v6033_v1 = vpop.f32.mrf.mxu3  ;;  %v9582_v31 = vor.u32 %v10558_v13, %v9581_v7  ;;  %v6047_v0 = vpop.f32.mrf.mxu0  ;;  %v9558_v55 = vor.u32 %v10552_v52, %v9557_v38  ;;  %v10501_v7 = vld [vmem:[%s11187_s29 + $0x824] sm:$0xf]  ;;  %v9367_v13 = vld [vmem:[%s11187_s29 + $0x838] sm:$0xf0]  ;;  %v9151_v38 = vld [vmem:[%s11187_s29 + $0x688] sm:$0xf0] }
 0x37d   : > { %v6020_v26 = vadd.f32 %v6019_v58, %v6006_v22  ;;  %v9415_v58 = vld [vmem:[%s11187_s29 + $0x898] sm:$0xf0]  ;;  %v8957_v22 = vld [vmem:[%s11187_s29 + $0x4f0] sm:$0xf]  ;;  %v10495_v52 = vld [vmem:[%s11187_s29 + $0x7f4] sm:$0xf] }
 0x37e   : > { %6433 = vmatpush.bf16.msra.mxu0 %v8434_v27  ;;  %v9605_v27 = vld [vmem:[%s11187_s29 + $0xa00] sm:$0xf]  ;;  %6310 = vmatpush.bf16.msrb.mxu3 %v9698_v30 }
 0x37f   : > { %6403 = vmatpush.bf16.msrb.mxu2 %v9630_v18  ;;  %v9606_v3 = vor.u32 %v10564_v15, %v9605_v27  ;;  %v6034_v30 = vadd.f32 %v6033_v1, %v6020_v26  ;;  %v9533_v18 = vld [vmem:[%s11187_s29 + $0x970] sm:$0xf]  ;;  %v9418_v27 = vor.u32 %v10513_v28, %v9415_v58  ;;  %v9006_v15 = vor.u32 %v10414_v62, %v9005_v11  ;;  %v10381_v1 = vld [vmem:[%s11187_s29 + $0x464] sm:$0xf]  ;;  %v10375_v11 = vld [vmem:[%s11187_s29 + $0x434] sm:$0xf] }
 0x380   : > { %6447 = vmatpush.bf16.msra.mxu1 %v8626_v41  ;;  %v10243_v41 = vld [vmem:[%s11187_s29 + $0x14] sm:$0xf]  ;;  %v8863_v62 = vld [vmem:[%s11187_s29 + $0x448] sm:$0xf0] }
 0x382   : > { %6434 = vmatpush.bf16.msra.mxu0 %v8410_v17  ;;  %v8338_v17 = vor.u32 %v10243_v41, %v8335_v60  ;;  %6311 = vmatpush.bf16.msrb.mxu3 %v9674_v57  ;;  %v6007_v61 = vpop.f32.mrf.mxu1  ;;  %v9199_v41 = vld [vmem:[%s11187_s29 + $0x6e8] sm:$0xf0] }
 0x383   : > { %6404 = vmatpush.bf16.msrb.mxu2 %v9606_v3  ;;  %v6008_v53 = vadd.f32 %v6007_v61, %v5993_v35  ;;  %v9391_v57 = vld [vmem:[%s11187_s29 + $0x868] sm:$0xf0]  ;;  %v10453_v3 = vld [vmem:[%s11187_s29 + $0x6a4] sm:$0xf]  ;;  %v9370_v61 = vor.u32 %v10501_v7, %v9367_v13 }
 0x384   : > { %6448 = vmatpush.bf16.msra.mxu1 %v8602_v12  ;;  %v8530_v12 = vor.u32 %v10291_v19, %v8527_v37  ;;  %v6035_v60 = vpop.f32.mrf.mxu3  ;;  %v9534_v19 = vor.u32 %v10546_v8, %v9533_v18  ;;  %v8981_v37 = vld [vmem:[%s11187_s29 + $0x520] sm:$0xf] }
 0x385   : > { %6312 = vmatmul.bf16.vlgmr.msrb.gmra.mxu3 %v12652_v36  ;;  %v8982_v14 = vor.u32 %v10408_v24, %v8981_v37  ;;  %v10369_v37 = vld [vmem:[%s11187_s29 + $0x404] sm:$0xf]  ;;  %v8839_v24 = vld [vmem:[%s11187_s29 + $0x418] sm:$0xf0] }
 0x386   : > { %6435 = vmatpush.bf16.msra.mxu0 %v8386_v16  ;;  %6360 = vmatpush.bf16.msra.mxu3 %v9078_v10  ;;  %v10420_v16 = vld [vmem:[%s11187_s29 + $0x594] sm:$0xf0]  ;;  %v6022_v10 = vadd.f32 %v6021_v45, %v6008_v53  ;;  %v9343_v45 = vld [vmem:[%s11187_s29 + $0x808] sm:$0xf0]  ;;  %v8842_v13 = vor.u32 %v10369_v37, %v8839_v24  ;;  %v10429_v37 = vld [vmem:[%s11187_s29 + $0x5e4] sm:$0xf] }
 0x387   : > { %v9030_v44 = vor.u32 %v10420_v16, %v9029_v34  ;;  %6405 = vmatpush.bf16.msrb.mxu2 %v9582_v31  ;;  %v8887_v31 = vld [vmem:[%s11187_s29 + $0x478] sm:$0xf0]  ;;  %v9346_v58 = vor.u32 %v10495_v52, %v9343_v45  ;;  %v10606_v52 = vld [vmem:[%s11187_s29 + $0xb64] sm:$0xf0]  ;;  %v10351_v45 = vld [vmem:[%s11187_s29 + $0x374] sm:$0xf] }
 0x388   : > { %6449 = vmatpush.bf16.msra.mxu1 %v8578_v43  ;;  %v9250_v43 = vor.u32 %v10471_v42, %v9247_v25  ;;  %v6036_v5 = vadd.f32 %v6035_v60, %v6022_v10  ;;  %v10534_v42 = vld [vmem:[%s11187_s29 + $0x924] sm:$0xf0]  ;;  %v6049_v25 = vpop.f32.mrf.mxu0  ;;  %v8890_v28 = vor.u32 %v10381_v1, %v8887_v31  ;;  %v9797_v1 = vld [vmem:[%s11187_s29 + $0xb80] sm:$0xf]  ;;  %v10612_v31 = vld [vmem:[%s11187_s29 + $0xb94] sm:$0xf0] }
 0x389   : > { %v9079_v24 = vld [vmem:[%s11187_s29 + $0x5f8] sm:$0xf0] }
 0x38a   : > { %6436 = vmatpush.bf16.msra.mxu0 %v8362_v54  ;;  %6361 = vmatpush.bf16.msra.mxu3 %v9054_v21  ;;  %v10459_v54 = vld [vmem:[%s11187_s29 + $0x6d4] sm:$0xf]  ;;  %v9485_v21 = vld [vmem:[%s11187_s29 + $0x910] sm:$0xf]  ;;  %v6050_v34 = vadd.f32 %v6049_v25, %v6036_v5 }
 0x38b   : > { %6406 = vmatpush.bf16.msrb.mxu2 %v9558_v55  ;;  %v9202_v47 = vor.u32 %v10459_v54, %v9199_v41  ;;  %v9154_v55 = vor.u32 %v10447_v33, %v9151_v38  ;;  %v9127_v54 = vld [vmem:[%s11187_s29 + $0x658] sm:$0xf0]  ;;  %v10390_v41 = vld [vmem:[%s11187_s29 + $0x4a4] sm:$0xf0]  ;;  %v10357_v33 = vld [vmem:[%s11187_s29 + $0x3a4] sm:$0xf] }
 0x38c   : > { %6450 = vmatpush.bf16.msra.mxu1 %v8554_v2  ;;  %v10507_v2 = vld [vmem:[%s11187_s29 + $0x854] sm:$0xf]  ;;  %v9773_v38 = vld [vmem:[%s11187_s29 + $0xb50] sm:$0xf] }
 0x38d   : > { %v9394_v35 = vor.u32 %v10507_v2, %v9391_v57  ;;  %v8866_v2 = vor.u32 %v10375_v11, %v8863_v62  ;;  %v9845_v57 = vld [vmem:[%s11187_s29 + $0xbe0] sm:$0xf]  ;;  %v8719_v11 = vld [vmem:[%s11187_s29 + $0x328] sm:$0xf0]  ;;  %v10573_v62 = vld [vmem:[%s11187_s29 + $0xa64] sm:$0xf] }
 0x38e   : > { %6437 = vmatpush.bf16.msra.mxu0 %v8338_v17  ;;  %6362 = vmatpush.bf16.msra.mxu3 %v9030_v44  ;;  %v9175_v17 = vld [vmem:[%s11187_s29 + $0x6b8] sm:$0xf0]  ;;  %v8933_v44 = vld [vmem:[%s11187_s29 + $0x4c0] sm:$0xf] }
 0x38f   : > { %6407 = vmatpush.bf16.msrb.mxu2 %v9534_v19  ;;  %v9178_v48 = vor.u32 %v10453_v3, %v9175_v17  ;;  %v8934_v8 = vor.u32 %v10396_v29, %v8933_v44  ;;  %v3553_v3 = vld [vmem:[#allocation11 + $0x38] sm:$0xff]  ;;  %v9295_v17 = vld [vmem:[%s11187_s29 + $0x7a8] sm:$0xf0] }
 0x390   : > { %6451 = vmatpush.bf16.msra.mxu1 %v8530_v12  ;;  %v6075_v12 = vpop.f32.mrf.mxu2  ;;  %v9749_v44 = vld [vmem:[%s11187_s29 + $0xb20] sm:$0xf]  ;;  %v10345_v29 = vld [vmem:[%s11187_s29 + $0x344] sm:$0xf] }
 0x391   : > { %6438 = vmatmul.bf16.vlgmr.msra.gmra.mxu0 %v12324_v56  ;;  %v6048_v56 = vadd.f32 %v6047_v0, %v6034_v30  ;;  %v6089_v30 = vpop.f32.mrf.mxu3 }
 0x392   : > { %6486 = vmatpush.bf16.msrb.mxu0 %v9274_v6  ;;  %6363 = vmatpush.bf16.msra.mxu3 %v9006_v15  ;;  %v9510_v6 = vor.u32 %v10540_v46, %v9509_v50  ;;  %v8909_v15 = vld [vmem:[%s11187_s29 + $0x490] sm:$0xf] }
 0x393   : > { %6452 = vmatmul.bf16.vlgmr.msra.gmra.mxu1 %v12328_v59  ;;  %v6061_v59 = vpop.f32.mrf.mxu1  ;;  %v8910_v46 = vor.u32 %v10390_v41, %v8909_v15  ;;  %v10567_v15 = vld [vmem:[%s11187_s29 + $0xa34] sm:$0xf]  ;;  %v9631_v41 = vld [vmem:[%s11187_s29 + $0xa48] sm:$0xf0] }
 0x394   : > { %6500 = vmatpush.bf16.msrb.mxu1 %v9466_v51  ;;  %v6062_v63 = vadd.f32 %v6061_v59, %v6048_v56  ;;  %v10402_v51 = vld [vmem:[%s11187_s29 + $0x504] sm:$0xf0]  ;;  %6408 = vmatpush.bf16.msrb.mxu2 %v9510_v6  ;;  %v10489_v56 = vld [vmem:[%s11187_s29 + $0x7c4] sm:$0xf]  ;;  %v10624_v59 = vld [vmem:[%s11187_s29 + $0xbf4] sm:$0xf0] }
 0x395   : > { %v8958_v26 = vor.u32 %v10402_v51, %v8957_v22  ;;  %v10618_v6 = vld [vmem:[%s11187_s29 + $0xbc4] sm:$0xf0]  ;;  %v10363_v51 = vld [vmem:[%s11187_s29 + $0x3d4] sm:$0xf] }
 0x396   : > { %6487 = vmatpush.bf16.msrb.mxu0 %v9250_v43  ;;  %6364 = vmatpush.bf16.msra.mxu3 %v8982_v14  ;;  %v6076_v16 = vadd.f32 %v6075_v12, %v6062_v63  ;;  %v3547_v43 = vld [vmem:[#allocation11 + $0x8] sm:$0xff]  ;;  %v9846_v14 = vor.u32 %v10624_v59, %v9845_v57 }
 0x397   : > { %v10483_v63 = vld [vmem:[%s11187_s29 + $0x794] sm:$0xf]  ;;  %v9821_v12 = vld [vmem:[%s11187_s29 + $0xbb0] sm:$0xf] }
 0x398   : > { %6501 = vmatpush.bf16.msrb.mxu1 %v9442_v4  ;;  %v9486_v4 = vor.u32 %v10534_v42, %v9485_v21  ;;  %v6090_v9 = vadd.f32 %v6089_v30, %v6076_v16  ;;  %v6077_v60 = vpop.f32.mrf.mxu2  ;;  %v8815_v21 = vld [vmem:[%s11187_s29 + $0x3e8] sm:$0xf0]  ;;  %v9298_v25 = vor.u32 %v10483_v63, %v9295_v17  ;;  %v9798_v16 = vor.u32 %v10612_v31, %v9797_v1  ;;  %v9677_v59 = vld [vmem:[%s11187_s29 + $0xa90] sm:$0xf]  ;;  %v10555_v17 = vld [vmem:[%s11187_s29 + $0x9d4] sm:$0xf] }
 0x399   : > { %v6091_v5 = vpop.f32.mrf.mxu3  ;;  %v9774_v30 = vor.u32 %v10606_v52, %v9773_v38  ;;  %v9055_v63 = vld [vmem:[%s11187_s29 + $0x5c8] sm:$0xf0]  ;;  %v10543_v38 = vld [vmem:[%s11187_s29 + $0x974] sm:$0xf] }
 0x39a   : > { %6488 = vmatpush.bf16.msrb.mxu0 %v9226_v23  ;;  %v6543_v18 = vadd.f32 %v6090_v9, %v3547_v43  ;;  %6365 = vmatpush.bf16.msra.mxu3 %v8958_v26  ;;  %v10441_v23 = vld [vmem:[%s11187_s29 + $0x644] sm:$0xf]  ;;  %v8767_v43 = vld [vmem:[%s11187_s29 + $0x388] sm:$0xf0]  ;;  %v8743_v9 = vld [vmem:[%s11187_s29 + $0x358] sm:$0xf0] }
 0x39b   : > { %v6063_v0 = vpop.f32.mrf.mxu1  ;;  %6409 = vmatpush.bf16.msrb.mxu2 %v9486_v4  ;;  %v9130_v19 = vor.u32 %v10441_v23, %v9127_v54  ;;  %v8770_v4 = vor.u32 %v10351_v45, %v8767_v43  ;;  %v9701_v54 = vld [vmem:[%s11187_s29 + $0xac0] sm:$0xf]  ;;  %v9535_v52 = vld [vmem:[%s11187_s29 + $0x988] sm:$0xf0] }
 0x39c   : > { %6502 = vmatpush.bf16.msrb.mxu1 %v9418_v27  ;;  %v6064_v53 = vadd.f32 %v6063_v0, %v6050_v34  ;;  %v9319_v27 = vld [vmem:[%s11187_s29 + $0x7d8] sm:$0xf0]  ;;  %6555 = vst [vmem:[#allocation11 + $0x8] sm:$0xff] %v6543_v18  ;;  %v9725_v0 = vld [vmem:[%s11187_s29 + $0xaf0] sm:$0xf] }
 0x39d   : > { %v9322_v50 = vor.u32 %v10489_v56, %v9319_v27  ;;  %v8791_v34 = vld [vmem:[%s11187_s29 + $0x3b8] sm:$0xf0]  ;;  %v10588_v56 = vld [vmem:[%s11187_s29 + $0xad4] sm:$0xf0] }
 0x39e   : > { %6489 = vmatpush.bf16.msrb.mxu0 %v9202_v47  ;;  %6366 = vmatpush.bf16.msra.mxu3 %v8934_v8  ;;  %v6078_v10 = vadd.f32 %v6077_v60, %v6064_v53  ;;  %v10435_v47 = vld [vmem:[%s11187_s29 + $0x614] sm:$0xf]  ;;  %v8794_v26 = vor.u32 %v10357_v33, %v8791_v34  ;;  %v9655_v18 = vld [vmem:[%s11187_s29 + $0xa78] sm:$0xf0]  ;;  %v6103_v8 = vpop.f32.mrf.mxu0  ;;  %v9702_v57 = vor.u32 %v10588_v56, %v9701_v54  ;;  %v10582_v60 = vld [vmem:[%s11187_s29 + $0xaa4] sm:$0xf0] }
 0x39f   : > { %6458 = vmatpush.bf16.msra.mxu2 %v8890_v28  ;;  %v9658_v27 = vor.u32 %v10573_v62, %v9655_v18  ;;  %v9487_v54 = vld [vmem:[%s11187_s29 + $0x928] sm:$0xf0] }
 0x3a0   : > { %6503 = vmatpush.bf16.msrb.mxu1 %v9394_v35  ;;  %v9103_v35 = vld [vmem:[%s11187_s29 + $0x628] sm:$0xf0]  ;;  %6410 = vmatmul.bf16.vlgmr.msrb.gmra.mxu2 %v12561_v32  ;;  %v6092_v7 = vadd.f32 %v6091_v5, %v6078_v10  ;;  %v10561_v10 = vld [vmem:[%s11187_s29 + $0xa04] sm:$0xf] }
 0x3a1   : > { %v9106_v22 = vor.u32 %v10435_v47, %v9103_v35  ;;  %v9678_v47 = vor.u32 %v10582_v60, %v9677_v59  ;;  %v9082_v35 = vor.u32 %v10429_v37, %v9079_v24  ;;  %v10393_v60 = vld [vmem:[%s11187_s29 + $0x4c4] sm:$0xf] }
 0x3a2   : > { %6490 = vmatpush.bf16.msrb.mxu0 %v9178_v48  ;;  %v6549_v42 = vadd.f32 %v6092_v7, %v3553_v3  ;;  %6367 = vmatpush.bf16.msra.mxu3 %v8910_v46  ;;  %v9822_v48 = vor.u32 %v10618_v6, %v9821_v12  ;;  %v6131_v46 = vpop.f32.mrf.mxu2  ;;  %v9583_v7 = vld [vmem:[%s11187_s29 + $0x9e8] sm:$0xf0] }
 0x3a3   : > { %6459 = vmatpush.bf16.msra.mxu2 %v8866_v2  ;;  %v6117_v2 = vpop.f32.mrf.mxu1 }
 0x3a4   : > { %6504 = vmatpush.bf16.msrb.mxu1 %v9370_v61  ;;  %6561 = vst [vmem:[#allocation11 + $0x38] sm:$0xff] %v6549_v42  ;;  %v8818_v61 = vor.u32 %v10363_v51, %v8815_v21  ;;  %v6118_v12 = vadd.f32 %v6117_v2, %v6103_v8  ;;  %v10417_v51 = vld [vmem:[%s11187_s29 + $0x584] sm:$0xf]  ;;  %v9031_v21 = vld [vmem:[%s11187_s29 + $0x598] sm:$0xf0] }
 0x3a5   : > { %6368 = vmatmul.bf16.vlgmr.msra.gmra.mxu3 %v12334_v49  ;;  %v9034_v1 = vor.u32 %v10417_v51, %v9031_v21  ;;  %v10399_v8 = vld [vmem:[%s11187_s29 + $0x4f4] sm:$0xf] }
 0x3a6   : > { %6491 = vmatpush.bf16.msrb.mxu0 %v9154_v55  ;;  %6416 = vmatpush.bf16.msrb.mxu3 %v9846_v14  ;;  %v10594_v55 = vld [vmem:[%s11187_s29 + $0xb04] sm:$0xf0]  ;;  %v6105_v3 = vpop.f32.mrf.mxu0  ;;  %v10423_v14 = vld [vmem:[%s11187_s29 + $0x5b4] sm:$0xf]  ;;  %v6132_v42 = vadd.f32 %v6131_v46, %v6118_v12 }
 0x3a7   : > { %6460 = vmatpush.bf16.msra.mxu2 %v8842_v13  ;;  %v9726_v53 = vor.u32 %v10594_v55, %v9725_v0  ;;  %v6145_v13 = vpop.f32.mrf.mxu3  ;;  %v9058_v6 = vor.u32 %v10423_v14, %v9055_v63  ;;  %v9511_v0 = vld [vmem:[%s11187_s29 + $0x958] sm:$0xf0] }
 0x3a8   : > { %6505 = vmatpush.bf16.msrb.mxu1 %v9346_v58  ;;  %v10339_v58 = vld [vmem:[%s11187_s29 + $0x314] sm:$0xf] }
 0x3a9   : > { %v8722_v23 = vor.u32 %v10339_v58, %v8719_v11  ;;  %v3548_v2 = vld [vmem:[#allocation11 + $0x10] sm:$0xff] }
 0x3aa   : > { %6492 = vmatpush.bf16.msrb.mxu0 %v9130_v19  ;;  %6417 = vmatpush.bf16.msrb.mxu3 %v9822_v48  ;;  %v9634_v19 = vor.u32 %v10567_v15, %v9631_v41  ;;  %v9559_v48 = vld [vmem:[%s11187_s29 + $0x9b8] sm:$0xf0]  ;;  %v6133_v33 = vpop.f32.mrf.mxu2 }
 0x3ab   : > { %6461 = vmatpush.bf16.msra.mxu2 %v8818_v61  ;;  %v6146_v61 = vadd.f32 %v6145_v13, %v6132_v42  ;;  %v10609_v42 = vld [vmem:[%s11187_s29 + $0xb84] sm:$0xf] }
 0x3ac   : > { %6506 = vmatpush.bf16.msrb.mxu1 %v9322_v50  ;;  %v9607_v50 = vld [vmem:[%s11187_s29 + $0xa18] sm:$0xf0] }
 0x3ad   : > { %v9610_v5 = vor.u32 %v10561_v10, %v9607_v50 }
 0x3ae   : > { %6493 = vmatpush.bf16.msrb.mxu0 %v9106_v22  ;;  %6418 = vmatpush.bf16.msrb.mxu3 %v9798_v16  ;;  %v6119_v22 = vpop.f32.mrf.mxu1  ;;  %v6159_v31 = vpop.f32.mrf.mxu0  ;;  %v10411_v16 = vld [vmem:[%s11187_s29 + $0x554] sm:$0xf] }
 0x3af   : > { %6462 = vmatpush.bf16.msra.mxu2 %v8794_v26  ;;  %v9007_v26 = vld [vmem:[%s11187_s29 + $0x568] sm:$0xf0]  ;;  %v6120_v45 = vadd.f32 %v6119_v22, %v6105_v3  ;;  %v6160_v43 = vadd.f32 %v6159_v31, %v6146_v61  ;;  %v10621_v3 = vld [vmem:[%s11187_s29 + $0xbe4] sm:$0xf]  ;;  %v10615_v22 = vld [vmem:[%s11187_s29 + $0xbb4] sm:$0xf] }
 0x3b0   : > { %6507 = vmatpush.bf16.msrb.mxu1 %v9298_v25  ;;  %v10549_v25 = vld [vmem:[%s11187_s29 + $0x9a4] sm:$0xf]  ;;  %v9775_v61 = vld [vmem:[%s11187_s29 + $0xb68] sm:$0xf0] }
 0x3b1   : > { %6494 = vmatmul.bf16.vlgmr.msrb.gmra.mxu0 %v12393_v20  ;;  %v10600_v20 = vld [vmem:[%s11187_s29 + $0xb34] sm:$0xf0]  ;;  %v9562_v34 = vor.u32 %v10549_v25, %v9559_v48  ;;  %v10603_v48 = vld [vmem:[%s11187_s29 + $0xb54] sm:$0xf]  ;;  %v10597_v31 = vld [vmem:[%s11187_s29 + $0xb24] sm:$0xf] }
 0x3b2   : > { %6419 = vmatpush.bf16.msrb.mxu3 %v9774_v30  ;;  %v9750_v28 = vor.u32 %v10600_v20, %v9749_v44  ;;  %v9010_v30 = vor.u32 %v10411_v16, %v9007_v26  ;;  %v6147_v44 = vpop.f32.mrf.mxu3  ;;  %v9538_v20 = vor.u32 %v10543_v38, %v9535_v52  ;;  %v6187_v62 = vpop.f32.mrf.mxu2  ;;  %v10591_v16 = vld [vmem:[%s11187_s29 + $0xaf4] sm:$0xf]  ;;  %v9727_v26 = vld [vmem:[%s11187_s29 + $0xb08] sm:$0xf0] }
 0x3b3   : > { %6508 = vmatmul.bf16.vlgmr.msrb.gmra.mxu1 %v12436_v40  ;;  %6463 = vmatpush.bf16.msra.mxu2 %v8770_v4  ;;  %v8746_v40 = vor.u32 %v10345_v29, %v8743_v9  ;;  %v10405_v29 = vld [vmem:[%s11187_s29 + $0x524] sm:$0xf]  ;;  %v8983_v9 = vld [vmem:[%s11187_s29 + $0x538] sm:$0xf0]  ;;  %v9730_v52 = vor.u32 %v10591_v16, %v9727_v26 }
 0x3b4   : > { %v8986_v58 = vor.u32 %v10405_v29, %v8983_v9  ;;  %v3550_v26 = vld [vmem:[#allocation11 + $0x20] sm:$0xff] }
 0x3b6   : > { %6420 = vmatpush.bf16.msrb.mxu3 %v9750_v28  ;;  %v6173_v4 = vpop.f32.mrf.mxu1  ;;  %v6134_v28 = vadd.f32 %v6133_v33, %v6120_v45  ;;  %v6161_v56 = vpop.f32.mrf.mxu0  ;;  %v9751_v33 = vld [vmem:[%s11187_s29 + $0xb38] sm:$0xf0] }
 0x3b7   : > { %6464 = vmatpush.bf16.msra.mxu2 %v8746_v40  ;;  %v10537_v40 = vld [vmem:[%s11187_s29 + $0x944] sm:$0xf]  ;;  %v6174_v11 = vadd.f32 %v6173_v4, %v6160_v43  ;;  %v9703_v45 = vld [vmem:[%s11187_s29 + $0xad8] sm:$0xf0]  ;;  %v10579_v4 = vld [vmem:[%s11187_s29 + $0xa94] sm:$0xf] }
 0x3b8   : > { %v6148_v55 = vadd.f32 %v6147_v44, %v6134_v28  ;;  %v9514_v18 = vor.u32 %v10537_v40, %v9511_v0  ;;  %v9679_v44 = vld [vmem:[%s11187_s29 + $0xaa8] sm:$0xf0] }
 0x3b9   : > { %v6188_v15 = vadd.f32 %v6187_v62, %v6174_v11  ;;  %v9682_v29 = vor.u32 %v10579_v4, %v9679_v44  ;;  %v3556_v44 = vld [vmem:[#allocation11 + $0x50] sm:$0xff] }
 0x3ba   : > { %6421 = vmatpush.bf16.msrb.mxu3 %v9726_v53  ;;  %v8959_v53 = vld [vmem:[%s11187_s29 + $0x508] sm:$0xf0]  ;;  %v6189_v14 = vpop.f32.mrf.mxu2 }
 0x3bb   : > { %6465 = vmatpush.bf16.msra.mxu2 %v8722_v23  ;;  %v10531_v23 = vld [vmem:[%s11187_s29 + $0x914] sm:$0xf]  ;;  %v8962_v41 = vor.u32 %v10399_v8, %v8959_v53 }
 0x3bc   : > { %v9490_v59 = vor.u32 %v10531_v23, %v9487_v54 }
 0x3be   : > { %6422 = vmatpush.bf16.msrb.mxu3 %v9702_v57  ;;  %6466 = vmatmul.bf16.vlgmr.msra.gmra.mxu2 %v12330_v39  ;;  %v9586_v39 = vor.u32 %v10555_v17, %v9583_v7  ;;  %v6175_v24 = vpop.f32.mrf.mxu1  ;;  %v3554_v7 = vld [vmem:[#allocation11 + $0x40] sm:$0xff]  ;;  %v6215_v38 = vpop.f32.mrf.mxu0 }
 0x3bf   : > { %6514 = vmatpush.bf16.msrb.mxu2 %v9658_v27  ;;  %v6162_v27 = vadd.f32 %v6161_v56, %v6148_v55 }
 0x3c1   : > { %v6176_v46 = vadd.f32 %v6175_v24, %v6162_v27 }
 0x3c2   : > { %6423 = vmatpush.bf16.msrb.mxu3 %v9678_v47  ;;  %v10387_v47 = vld [vmem:[%s11187_s29 + $0x494] sm:$0xf] }
 0x3c3   : > { %6515 = vmatpush.bf16.msrb.mxu2 %v9634_v19  ;;  %v8935_v19 = vld [vmem:[%s11187_s29 + $0x4d8] sm:$0xf0]  ;;  %v6190_v63 = vadd.f32 %v6189_v14, %v6176_v46  ;;  %v3555_v46 = vld [vmem:[#allocation11 + $0x48] sm:$0xff] }
 0x3c4   : > { %v8938_v50 = vor.u32 %v10393_v60, %v8935_v19 }
 0x3c5   : > { %6424 = vmatmul.bf16.vlgmr.msrb.gmra.mxu3 %v12652_v36 }
 0x3c6   : > { %6472 = vmatpush.bf16.msra.mxu3 %v9082_v35  ;;  %v8911_v35 = vld [vmem:[%s11187_s29 + $0x4a8] sm:$0xf0]  ;;  %v6229_v43 = vpop.f32.mrf.mxu1  ;;  %v6217_v9 = vpop.f32.mrf.mxu0 }
 0x3c7   : > { %6516 = vmatpush.bf16.msrb.mxu2 %v9610_v5  ;;  %v6201_v57 = vpop.f32.mrf.mxu3  ;;  %v9847_v5 = vld [vmem:[%s11187_s29 + $0xbf8] sm:$0xf0]  ;;  %v8914_v17 = vor.u32 %v10387_v47, %v8911_v35  ;;  %v6230_v40 = vadd.f32 %v6229_v43, %v6215_v38 }
 0x3c8   : > { %v6202_v37 = vadd.f32 %v6201_v57, %v6188_v15  ;;  %v9850_v12 = vor.u32 %v10621_v3, %v9847_v5 }
 0x3ca   : > { %6473 = vmatpush.bf16.msra.mxu3 %v9058_v6  ;;  %v6544_v10 = vadd.f32 %v6202_v37, %v3548_v2 }
 0x3cb   : > { %6517 = vmatpush.bf16.msrb.mxu2 %v9586_v39  ;;  %v9823_v39 = vld [vmem:[%s11187_s29 + $0xbc8] sm:$0xf0] }
 0x3cc   : > { %6556 = vst [vmem:[#allocation11 + $0x10] sm:$0xff] %v6544_v10  ;;  %v9826_v21 = vor.u32 %v10615_v22, %v9823_v39 }
 0x3ce   : > { %6474 = vmatpush.bf16.msra.mxu3 %v9034_v1  ;;  %v9778_v1 = vor.u32 %v10603_v48, %v9775_v61  ;;  %v6231_v0 = vpop.f32.mrf.mxu1  ;;  %v6271_v11 = vpop.f32.mrf.mxu0 }
 0x3cf   : > { %6518 = vmatpush.bf16.msrb.mxu2 %v9562_v34  ;;  %v6203_v13 = vpop.f32.mrf.mxu3  ;;  %v9754_v34 = vor.u32 %v10597_v31, %v9751_v33 }
 0x3d0   : > { %v6204_v6 = vadd.f32 %v6203_v13, %v6190_v63 }
 0x3d2   : > { %6475 = vmatpush.bf16.msra.mxu3 %v9010_v30  ;;  %v6550_v51 = vadd.f32 %v6204_v6, %v3554_v7 }
 0x3d3   : > { %6519 = vmatpush.bf16.msrb.mxu2 %v9538_v20  ;;  %v6243_v20 = vpop.f32.mrf.mxu2 }
 0x3d4   : > { %6562 = vst [vmem:[#allocation11 + $0x40] sm:$0xff] %v6550_v51  ;;  %v6244_v55 = vadd.f32 %v6243_v20, %v6230_v40 }
 0x3d6   : > { %6476 = vmatpush.bf16.msra.mxu3 %v8986_v58  ;;  %v6285_v53 = vpop.f32.mrf.mxu1 }
 0x3d7   : > { %6520 = vmatpush.bf16.msrb.mxu2 %v9514_v18  ;;  %v6232_v18 = vadd.f32 %v6231_v0, %v6217_v9 }
 0x3da   : > { %6477 = vmatpush.bf16.msra.mxu3 %v8962_v41  ;;  %v6273_v41 = vpop.f32.mrf.mxu0 }
 0x3db   : > { %6521 = vmatpush.bf16.msrb.mxu2 %v9490_v59  ;;  %v6245_v62 = vpop.f32.mrf.mxu2  ;;  %v3549_v59 = vld [vmem:[#allocation11 + $0x18] sm:$0xff] }
 0x3dc   : > { %v6246_v54 = vadd.f32 %v6245_v62, %v6232_v18 }
 0x3de   : > { %6478 = vmatpush.bf16.msra.mxu3 %v8938_v50  ;;  %6522 = vmatmul.bf16.vlgmr.msrb.gmra.mxu2 %v12561_v32  ;;  %v9799_v32 = vld [vmem:[%s11187_s29 + $0xb98] sm:$0xf0]  ;;  %v6287_v37 = vpop.f32.mrf.mxu1 }
 0x3df   : > { %v9802_v25 = vor.u32 %v10609_v42, %v9799_v32 }
 0x3e2   : > { %6479 = vmatpush.bf16.msra.mxu3 %v8914_v17  ;;  %v6327_v5 = vpop.f32.mrf.mxu0 }
 0x3e3   : > { %v6299_v15 = vpop.f32.mrf.mxu2 }
 0x3e5   : > { %6480 = vmatmul.bf16.vlgmr.msra.gmra.mxu3 %v12334_v49  ;;  %v10585_v49 = vld [vmem:[%s11187_s29 + $0xac4] sm:$0xf] }
 0x3e6   : > { %6528 = vmatpush.bf16.msrb.mxu3 %v9850_v12  ;;  %v9706_v30 = vor.u32 %v10585_v49, %v9703_v45  ;;  %v6341_v14 = vpop.f32.mrf.mxu1 }
 0x3e7   : > { %v6257_v28 = vpop.f32.mrf.mxu3  ;;  %v6342_v13 = vadd.f32 %v6341_v14, %v6327_v5  ;;  %v3557_v5 = vld [vmem:[#allocation11 + $0x58] sm:$0xff] }
 0x3e8   : > { %v6258_v58 = vadd.f32 %v6257_v28, %v6244_v55 }
 0x3ea   : > { %6529 = vmatpush.bf16.msrb.mxu3 %v9826_v21  ;;  %v6272_v8 = vadd.f32 %v6271_v11, %v6258_v58  ;;  %v6329_v17 = vpop.f32.mrf.mxu0 }
 0x3eb   : > { %v6301_v10 = vpop.f32.mrf.mxu2 }
 0x3ec   : > { %v6286_v27 = vadd.f32 %v6285_v53, %v6272_v8 }
 0x3ee   : > { %6530 = vmatpush.bf16.msrb.mxu3 %v9802_v25  ;;  %v6300_v57 = vadd.f32 %v6299_v15, %v6286_v27  ;;  %v6343_v12 = vpop.f32.mrf.mxu1 }
 0x3ef   : > { %v6259_v23 = vpop.f32.mrf.mxu3  ;;  %v6344_v21 = vadd.f32 %v6343_v12, %v6329_v17 }
 0x3f0   : > { %v6260_v56 = vadd.f32 %v6259_v23, %v6246_v54 }
 0x3f2   : > { %6531 = vmatpush.bf16.msrb.mxu3 %v9778_v1  ;;  %v6274_v2 = vadd.f32 %v6273_v41, %v6260_v56  ;;  %v6383_v39 = vpop.f32.mrf.mxu0 }
 0x3f6   : > { %6532 = vmatpush.bf16.msrb.mxu3 %v9754_v34  ;;  %v6397_v32 = vpop.f32.mrf.mxu1 }
 0x3fa   : > { %6533 = vmatpush.bf16.msrb.mxu3 %v9730_v52  ;;  %v6385_v33 = vpop.f32.mrf.mxu0 }
 0x3fc   : > { %v6355_v63 = vpop.f32.mrf.mxu2 }
 0x3fd   : > { %v6356_v6 = vadd.f32 %v6355_v63, %v6342_v13 }
 0x3fe   : > { %6534 = vmatpush.bf16.msrb.mxu3 %v9706_v30  ;;  %v6399_v49 = vpop.f32.mrf.mxu1 }
 0x402   : > { %6535 = vmatpush.bf16.msrb.mxu3 %v9682_v29 }
 0x404   : > { %v6357_v51 = vpop.f32.mrf.mxu2 }
 0x405   : > { %6536 = vmatmul.bf16.vlgmr.msrb.gmra.mxu3 %v12652_v36  ;;  %v6288_v36 = vadd.f32 %v6287_v37, %v6274_v2  ;;  %v6358_v48 = vadd.f32 %v6357_v51, %v6344_v21 }
 0x407   : > { %v6302_v50 = vadd.f32 %v6301_v10, %v6288_v36 }
 0x408   : > { %v6313_v60 = vpop.f32.mrf.mxu3 }
 0x409   : > { %v6314_v19 = vadd.f32 %v6313_v60, %v6300_v57 }
 0x40b   : > { %v6545_v24 = vadd.f32 %v6314_v19, %v3549_v59 }
 0x40d   : > { %6557 = vst [vmem:[#allocation11 + $0x18] sm:$0xff] %v6545_v24  ;;  %v3551_v24 = vld [vmem:[#allocation11 + $0x28] sm:$0xff] }
 0x40e   : > { %v6439_v28 = vpop.f32.mrf.mxu0 }
 0x410   : > { %v6315_v47 = vpop.f32.mrf.mxu3  ;;  %v6453_v40 = vpop.f32.mrf.mxu1 }
 0x411   : > { %v6316_v35 = vadd.f32 %v6315_v47, %v6302_v50  ;;  %v6454_v11 = vadd.f32 %v6453_v40, %v6439_v28 }
 0x413   : > { %v6551_v3 = vadd.f32 %v6316_v35, %v3555_v46 }
 0x415   : > { %6563 = vst [vmem:[#allocation11 + $0x48] sm:$0xff] %v6551_v3 }
 0x416   : > { %v6441_v55 = vpop.f32.mrf.mxu0 }
 0x418   : > { %v6455_v62 = vpop.f32.mrf.mxu1 }
 0x419   : > { %v6456_v54 = vadd.f32 %v6455_v62, %v6441_v55 }
 0x423   : > { %v6411_v31 = vpop.f32.mrf.mxu2 }
 0x428   : > { %v6369_v7 = vpop.f32.mrf.mxu3 }
 0x429   : > { %v6370_v22 = vadd.f32 %v6369_v7, %v6356_v6 }
 0x42b   : > { %v6384_v42 = vadd.f32 %v6383_v39, %v6370_v22  ;;  %v6413_v30 = vpop.f32.mrf.mxu2 }
 0x42d   : > { %v6398_v1 = vadd.f32 %v6397_v32, %v6384_v42 }
 0x42e   : > { %v6495_v53 = vpop.f32.mrf.mxu0 }
 0x42f   : > { %v6412_v16 = vadd.f32 %v6411_v31, %v6398_v1 }
 0x430   : > { %v6371_v25 = vpop.f32.mrf.mxu3  ;;  %v6509_v27 = vpop.f32.mrf.mxu1 }
 0x431   : > { %v6372_v61 = vadd.f32 %v6371_v25, %v6358_v48 }
 0x433   : > { %v6386_v34 = vadd.f32 %v6385_v33, %v6372_v61 }
 0x435   : > { %v6400_v43 = vadd.f32 %v6399_v49, %v6386_v34 }
 0x436   : > { %v6497_v60 = vpop.f32.mrf.mxu0 }
 0x437   : > { %v6414_v4 = vadd.f32 %v6413_v30, %v6400_v43 }
 0x438   : > { %v6511_v50 = vpop.f32.mrf.mxu1 }
 0x441   : > { %v6467_v0 = vpop.f32.mrf.mxu2 }
 0x442   : > { %v6468_v18 = vadd.f32 %v6467_v0, %v6454_v11 }
 0x448   : > { %v6425_v38 = vpop.f32.mrf.mxu3 }
 0x449   : > { %v6426_v52 = vadd.f32 %v6425_v38, %v6412_v16  ;;  %v6469_v23 = vpop.f32.mrf.mxu2 }
 0x44a   : > { %v6470_v41 = vadd.f32 %v6469_v23, %v6456_v54 }
 0x44b   : > { %v6546_v45 = vadd.f32 %v6426_v52, %v3550_v26 }
 0x44d   : > { %6558 = vst [vmem:[#allocation11 + $0x20] sm:$0xff] %v6546_v45 }
 0x450   : > { %v6427_v20 = vpop.f32.mrf.mxu3 }
 0x451   : > { %v6428_v29 = vadd.f32 %v6427_v20, %v6414_v4 }
 0x453   : > { %v6552_v9 = vadd.f32 %v6428_v29, %v3556_v44 }
 0x455   : > { %6564 = vst [vmem:[#allocation11 + $0x50] sm:$0xff] %v6552_v9 }
 0x461   : > { %v6523_v59 = vpop.f32.mrf.mxu2 }
 0x468   : > { %v6481_v58 = vpop.f32.mrf.mxu3 }
 0x469   : > { %v6482_v8 = vadd.f32 %v6481_v58, %v6468_v18  ;;  %v6525_v35 = vpop.f32.mrf.mxu2 }
 0x46b   : > { %v6496_v56 = vadd.f32 %v6495_v53, %v6482_v8 }
 0x46d   : > { %v6510_v57 = vadd.f32 %v6509_v27, %v6496_v56 }
 0x46f   : > { %v6524_v37 = vadd.f32 %v6523_v59, %v6510_v57 }
 0x470   : > { %v6483_v15 = vpop.f32.mrf.mxu3 }
 0x471   : > { %v6484_v2 = vadd.f32 %v6483_v15, %v6470_v41 }
 0x473   : > { %v6498_v19 = vadd.f32 %v6497_v60, %v6484_v2 }
 0x475   : > { %v6512_v47 = vadd.f32 %v6511_v50, %v6498_v19 }
 0x477   : > { %v6526_v3 = vadd.f32 %v6525_v35, %v6512_v47 }
 0x488   : > { %v6537_v36 = vpop.f32.mrf.mxu3 }
 0x489   : > { %v6538_v10 = vadd.f32 %v6537_v36, %v6524_v37 }
 0x48b   : > { %v6547_v46 = vadd.f32 %v6538_v10, %v3551_v24 }
 0x48d   : > { %6559 = vst [vmem:[#allocation11 + $0x28] sm:$0xff] %v6547_v46 }
 0x490   : > { %v6539_v14 = vpop.f32.mrf.mxu3 }
 0x491   : > { %v6540_v63 = vadd.f32 %v6539_v14, %v6526_v3  ;;  %6569 = sbr.rel (%p9851_p2) target bundleno = 1191 (0x4a7), region = 68 }
 0x493   : > { %v6553_v17 = vadd.f32 %v6540_v63, %v3557_v5 }
 0x495   : > { %6565 = vst [vmem:[#allocation11 + $0x58] sm:$0xff] %v6553_v17 }
 0x496   : > { %v6570_v7 = vld [vmem:[#allocation11] sm:$0xff]  ;;  %v6582_v13 = vld [vmem:[#allocation10] sm:$0x3f]  ;;  %v6571_v12 = vld [vmem:[#allocation11 + $0x8] sm:$0xff] }
 0x497   : > { %v6584_v6 = vperm.slane %v6582_v13, 0  ;;  %v6585_v22 = vperm.slane %v6582_v13, 1  ;;  %v6572_v39 = vld [vmem:[#allocation11 + $0x10] sm:$0xff]  ;;  %v6586_v51 = vperm.slane %v6582_v13, 2  ;;  %v6573_v21 = vld [vmem:[#allocation11 + $0x18] sm:$0xff]  ;;  %v6587_v42 = vperm.slane %v6582_v13, 3 }
 0x498   : > { %v6574_v32 = vld [vmem:[#allocation11 + $0x20] sm:$0xff]  ;;  %v6588_v25 = vperm.slane %v6582_v13, 4  ;;  %v6589_v48 = vperm.slane %v6582_v13, 5  ;;  %v6575_v33 = vld [vmem:[#allocation11 + $0x28] sm:$0xff]  ;;  %v6576_v16 = vld [vmem:[#allocation11 + $0x30] sm:$0xff] }
 0x499   : > { %v6596_v61 = vadd.f32 %v6584_v6, %v6570_v7  ;;  %v6597_v1 = vadd.f32 %v6585_v22, %v6571_v12  ;;  %v6598_v31 = vadd.f32 %v6586_v51, %v6572_v39  ;;  %v6599_v34 = vadd.f32 %v6587_v42, %v6573_v21  ;;  %v6577_v38 = vld [vmem:[#allocation11 + $0x38] sm:$0xff]  ;;  %v6578_v49 = vld [vmem:[#allocation11 + $0x40] sm:$0xff]  ;;  %v6579_v43 = vld [vmem:[#allocation11 + $0x48] sm:$0xff] }
 0x49a   : > { %v6600_v26 = vadd.f32 %v6588_v25, %v6574_v32  ;;  %v6601_v52 = vadd.f32 %v6589_v48, %v6575_v33  ;;  %v6602_v45 = vadd.f32 %v6584_v6, %v6576_v16  ;;  %v6603_v30 = vadd.f32 %v6585_v22, %v6577_v38  ;;  %v6580_v4 = vld [vmem:[#allocation11 + $0x50] sm:$0xff] }
 0x49b   : > { %6608 = vst [vmem:[#allocation11] sm:$0xff] %v6596_v61  ;;  %v6604_v44 = vadd.f32 %v6586_v51, %v6578_v49  ;;  %v6605_v29 = vadd.f32 %v6587_v42, %v6579_v43  ;;  %v6606_v9 = vadd.f32 %v6588_v25, %v6580_v4 }
 0x49c   : > { %6609 = vst [vmem:[#allocation11 + $0x8] sm:$0xff] %v6597_v1  ;;  %v6581_v20 = vld [vmem:[#allocation11 + $0x58] sm:$0xff] }
 0x49d   : > { %6610 = vst [vmem:[#allocation11 + $0x10] sm:$0xff] %v6598_v31  ;;  %v6607_v28 = vadd.f32 %v6589_v48, %v6581_v20 }
 0x49e   : > { %6611 = vst [vmem:[#allocation11 + $0x18] sm:$0xff] %v6599_v34 }
 0x49f   : > { %6612 = vst [vmem:[#allocation11 + $0x20] sm:$0xff] %v6600_v26 }
 0x4a0   : > { %6613 = vst [vmem:[#allocation11 + $0x28] sm:$0xff] %v6601_v52 }
 0x4a1   : > { %6614 = vst [vmem:[#allocation11 + $0x30] sm:$0xff] %v6602_v45 }
 0x4a2   : > { %6615 = vst [vmem:[#allocation11 + $0x38] sm:$0xff] %v6603_v30 }
 0x4a3   : > { %6616 = vst [vmem:[#allocation11 + $0x40] sm:$0xff] %v6604_v44 }
 0x4a4   : > { %6617 = vst [vmem:[#allocation11 + $0x48] sm:$0xff] %v6605_v29 }
 0x4a5   : > { %6618 = vst [vmem:[#allocation11 + $0x50] sm:$0xff] %v6606_v9 }
 0x4a6   : > { %6619 = vst [vmem:[#allocation11 + $0x58] sm:$0xff] %v6607_v28 }
 0x4a7 PF: > { %p10669_p3 = scmp.eq.s32.totalorder %s11084_s24, 2  ;;  %s13204_s7 = sld [smem:[#allocation21_spill]] }
 0x4a8   : > { %s11022_s13 = smov [#allocation11]   ;;  %s11023_s25 = smov 768  }
 0x4a9   : > { %s6629_s17 = sshll.u32 %s11022_s13, 4  ;;  %s11024_s9 = smov 48   ;;  %s6630_s17 = int_to_ptr.vmem [resolvable:$true] %s6629_s17 }
 0x4ad   : > { %s6631_s15 = sshll.u32 %s13204_s7, 4  ;;  %s6632_s15 = int_to_ptr.hbm [resolvable:$true] %s6631_s15 }
 0x4ae   : > { %10644 = dma.vmem_to_hbm [thread:$0]  (%p10669_p3), %s6630_s17, 1536, %s6632_s15, [#allocation4], %s11023_s25, %s11023_s25, %s11024_s9  }
 0x4af   : > { %10985 = dma.done.wait (%p10669_p3), [#allocation4], 1536  }
 0x4b0   : > { %10987 = vsyncadd (%p10669_p3), [#allocation4], 4294965760 }
 0x4b1 PF: > { %s23_s23 = sadd.s32 1, %s11010_s23   ;;  %s13205_s24 = sld [smem:[#allocation18_spill]] }
 0x4b2   : > { %p20_p4 = scmp.ge.s32.totalorder %s23_s23, 5   ;;  %s13206_s1 = sld [smem:[#allocation17_spill]] }
 0x4b3   : > { %s13207_s18 = smov %s10994_s19  ;;  %s13208_s19 = smov %s10998_s20 }
 0x4b4   : > { %s13210_s21 = smov %s11006_s22  ;;  %22 = sbr.rel (!%p20_p4) target bundleno = 12 (0xc), region = 120 }
 0x4b7   : > { %s13209_s20 = smov %s13205_s24 }
 0x4b8   : > { %s13211_s22 = smov %s13206_s1 }
 0x4b9   :  { %6648 = vsyncpa [#allocation3], 1 }
 0x4ba   :  { %6650 = vsyncpa [#allocation3 + $0x1], 1 }
 0x4bb   :  { %6651 = vsyncpa [#allocation6], 1 }
 0x4bc   :  { %6653 = vsyncpa [#allocation6 + $0x1], 1 }
 0x4bd   :  { %6654 = vsyncpa [#allocation9], 1 }
 0x4be   :  { %6656 = vsyncpa [#allocation9 + $0x1], 1 }
 0x4bf   :  { %6657 = vsyncpa [#allocation4], 1 }
 0x4c0   :  { %6659 = vsyncpa [#allocation4 + $0x1], 1 }

</bundles_post_ra>
